<compile_context>
chip_gen: v5e
topology: v5e:2x2
jax: 0.10.0
libtpu: 0.0.40
codegen_flags: <defaults>
</compile_context>

<pallas_src>
import jax
import jax.numpy as jnp
from jax import lax
from jax.experimental import pallas as pl
from jax.experimental.pallas import tpu as pltpu

# ---------------- small synthetic configuration ----------------
B, T = 2, 8                      # batch, sequence length
IMG_H, IMG_W, C_IN = 16, 16, 3   # FLAGS.img_height / FLAGS.img_width, RGB
HW = IMG_H * IMG_W
N_IMG = B * T                    # frames per forward
CONV_OUT = 128                   # stand-in CNN conv width (lane-dense)
K_RAW = 9 * C_IN                 # im2col contraction dim (27)
K_PAD = 32                       # padded to a lane/sublane friendly size
FEATURE_DIM = 32                 # self.feature_dim (512 in the real backbone)
POS_DIM = 2
POS_PAD = 8                      # positions zero-padded 2 -> 8 for packing
HIDDEN = 32                      # self.hidden_units (512 in the original)
GATES = 4 * HIDDEN               # fused i|f|g|o gate width (128 lanes)
NUM_CLASSES = 10
FPB = 8                          # frames per grid step in the CNN call

# Packed RNN weight-slab row offsets (bf16, all GATES=128 columns wide).
R_WXF = 0                        # W_ih[:, :FEATURE_DIM].T
R_WXP = R_WXF + FEATURE_DIM      # 32: W_ih[:, FEATURE_DIM:].T (zero-pad to 8 rows)
R_WH = R_WXP + POS_PAD           # 40: W_hh.T
R_MLP = R_WH + HIDDEN            # 72: mlp weight, zero-pad to GATES columns
R_END = R_MLP + HIDDEN           # 104


def _vmem_spec():
    return pl.BlockSpec(memory_space=pltpu.MemorySpace.VMEM)


# ---------------------------------------------------------------------------
# Call 1: CNN stand-in.  Grid over frames ("parallel" -> both v7x TCs).
#   patches (FPB*HW, K_PAD) bf16  @ conv_w -> ReLU -> global-avg-pool -> fc
# ---------------------------------------------------------------------------
def cnn_kernel(patches_ref, cnn_w_ref, bias1_ref, feats_ref):
    # cnn_w rows [0:K_PAD] = conv_w (K_PAD, CONV_OUT); rows [K_PAD:] = fc_w.T.
    conv = jnp.dot(patches_ref[...], cnn_w_ref[0:K_PAD, :],
                   preferred_element_type=jnp.float32)         # (FPB*HW, 128)
    conv = jnp.maximum(conv + bias1_ref[0:1, :], 0.0)          # bias + ReLU, f32
    # Global average pool: leading-dim split (layout-free) + sublane reduce,
    # fully lane-dense at 128 channels.
    pooled = jnp.mean(conv.reshape(FPB, HW, CONV_OUT), axis=1)  # (FPB, 128)
    # fc projection: contract against the stored fc_w.T (trans_b matmul).
    feats = lax.dot_general(
        pooled.astype(jnp.bfloat16), cnn_w_ref[K_PAD:, :],
        dimension_numbers=(((1,), (1,)), ((), ())),
        preferred_element_type=jnp.float32)                    # (FPB, FEATURE_DIM)
    feats_ref[...] = feats + bias1_ref[1:2, 0:FEATURE_DIM]


# ---------------------------------------------------------------------------
# Call 2: LSTM (hoisted input projection + recurrence) + final Linear.
# Rows of feats/pos are time-major (row = t*B + b).
# ---------------------------------------------------------------------------
def lstm_kernel(feats_ref, pos_ref, rnn_w_ref, bias2_ref, out_ref, xproj_ref):
    # --- input projection for ALL timesteps, hoisted out of the recurrence ---
    # Equivalent to concat([feats, pos], -1) @ W_ih.T + (b_ih + b_hh); W_ih is
    # split into a 32-wide feature part and an 8-wide (zero-padded) pos part so
    # operands stay lane/sublane aligned.  Output (T*B, GATES) = 128 lanes.
    xproj = (jnp.dot(feats_ref[...].astype(jnp.bfloat16),
                     rnn_w_ref[R_WXF:R_WXP, :],
                     preferred_element_type=jnp.float32)
             + jnp.dot(pos_ref[...], rnn_w_ref[R_WXP:R_WH, :],
                       preferred_element_type=jnp.float32)
             + bias2_ref[0:1, :])
    xproj_ref[...] = xproj          # stage in VMEM; the loop reads ref slices

    wh = rnn_w_ref[R_WH:R_MLP, :]   # (HIDDEN, GATES) bf16, loaded once
    h = jnp.zeros((B, HIDDEN), jnp.float32)
    c = jnp.zeros((B, HIDDEN), jnp.float32)
    # T is small & static: fully unrolled; h/c live in vregs.
    # TODO(synk): for long sequences switch to lax.fori_loop with a dynamic
    # pl.ds read of xproj_ref.
    for t in range(T):
        gates = xproj_ref[t * B:(t + 1) * B, :] + jnp.dot(
            h.astype(jnp.bfloat16), wh, preferred_element_type=jnp.float32)
        # One dense sigmoid + one dense tanh over the full 128-lane gates vreg,
        # then static lane slices (gate order i|f|g|o, PyTorch convention).
        sig = jax.nn.sigmoid(gates)
        tnh = jnp.tanh(gates)
        i = sig[:, 0 * HIDDEN:1 * HIDDEN]
        f = sig[:, 1 * HIDDEN:2 * HIDDEN]
        g = tnh[:, 2 * HIDDEN:3 * HIDDEN]
        o = sig[:, 3 * HIDDEN:4 * HIDDEN]
        c = f * c + i * g
        h = o * jnp.tanh(c)

    # --- final Linear on the last hidden state (r_out[:, -1, :]) ------------
    logits = (jnp.dot(h.astype(jnp.bfloat16), rnn_w_ref[R_MLP:R_END, :],
                      preferred_element_type=jnp.float32)
              + bias2_ref[1:2, :])                      # (B, GATES), cols>=10 zero
    out_ref[...] = logits[:, 0:NUM_CLASSES]


# ---------------------------------------------------------------------------
# JAX glue (layout only; all compute lives in the kernels above)
# ---------------------------------------------------------------------------
def _im2col_time_major(images):
    # Time-major flattening (row = t*B + b) so the hoisted LSTM input
    # projection is consumed with per-timestep row slices inside the kernel.
    imgs_tb = jnp.transpose(images, (1, 0, 2, 3, 4)).reshape(
        T * B, C_IN, IMG_H, IMG_W)
    x = jnp.transpose(imgs_tb, (0, 2, 3, 1))                   # NCHW -> NHWC
    xp = jnp.pad(x, ((0, 0), (1, 1), (1, 1), (0, 0)))          # SAME padding
    taps = [xp[:, dy:dy + IMG_H, dx:dx + IMG_W, :]
            for dy in range(3) for dx in range(3)]
    return jnp.stack(taps, axis=3).reshape(T * B * HW, K_RAW)  # f32


def deepseqslam_forward(params, images, positions):
    # TODO(synk): at real sizes replace this XLA-side im2col with 9 shifted
    # accumulating matmuls inside the CNN kernel to cut HBM traffic ~10x.
    patches = _im2col_time_major(images)
    patches = jnp.pad(patches, ((0, 0), (0, K_PAD - K_RAW)))   # 27 -> 32
    patches = patches.astype(jnp.bfloat16)

    pos_tb = jnp.transpose(positions, (1, 0, 2)).reshape(T * B, POS_DIM)
    pos_pad = jnp.pad(pos_tb, ((0, 0), (0, POS_PAD - POS_DIM)))
    pos_pad = pos_pad.astype(jnp.bfloat16)

    cnn, rnn = params["cnn"], params["rnn"]

    # --- CNN stage: gridded over frames, parallel for v7x's two TCs ---------
    feats = pl.pallas_call(
        cnn_kernel,
        out_shape=jax.ShapeDtypeStruct((N_IMG, FEATURE_DIM), jnp.float32),
        grid=(N_IMG // FPB,),
        in_specs=[
            pl.BlockSpec((FPB * HW, K_PAD), lambda i: (i, 0)),
            pl.BlockSpec((K_PAD + FEATURE_DIM, CONV_OUT), lambda i: (0, 0)),
            pl.BlockSpec((2, CONV_OUT), lambda i: (0, 0)),
        ],
        out_specs=pl.BlockSpec((FPB, FEATURE_DIM), lambda i: (i, 0)),
        compiler_params=pltpu.CompilerParams(
            dimension_semantics=("parallel",)),
    )(patches, cnn["w"], cnn["b"])

    # --- LSTM + MLP stage: tiny, serial, gridless ----------------------------
    return pl.pallas_call(
        lstm_kernel,
        out_shape=jax.ShapeDtypeStruct((B, NUM_CLASSES), jnp.float32),
        in_specs=[_vmem_spec()] * 4,
        out_specs=_vmem_spec(),
        scratch_shapes=[pltpu.VMEM((T * B, GATES), jnp.float32)],
    )(feats, pos_pad, rnn["w"], rnn["b"])


# ---------------------------------------------------------------------------
# Deterministic parameter initialization (PyTorch-style uniform bounds).
# Returns (packed kernel params, raw f32 params for the pure-JAX reference).
# ---------------------------------------------------------------------------
def init_params(key):
    ks = jax.random.split(key, 11)

    def u(k, shape, bound):
        return jax.random.uniform(k, shape, jnp.float32, -bound, bound)

    cb = 1.0 / float(K_RAW) ** 0.5
    fb = 1.0 / float(CONV_OUT) ** 0.5
    conv_w = u(ks[0], (K_RAW, CONV_OUT), cb)
    conv_b = u(ks[1], (CONV_OUT,), cb)
    fc_w = u(ks[2], (CONV_OUT, FEATURE_DIM), fb)
    fc_b = u(ks[3], (FEATURE_DIM,), fb)

    s = 1.0 / float(HIDDEN) ** 0.5
    wx_f = u(ks[4], (FEATURE_DIM, GATES), s)    # W_ih[:, :FEATURE_DIM].T
    wx_p = u(ks[5], (POS_DIM, GATES), s)        # W_ih[:, FEATURE_DIM:].T
    wh = u(ks[6], (HIDDEN, GATES), s)           # W_hh.T
    b = u(ks[7], (GATES,), s) + u(ks[8], (GATES,), s)   # b_ih + b_hh
    mlp_w = u(ks[9], (HIDDEN, NUM_CLASSES), s)
    mlp_b = u(ks[10], (NUM_CLASSES,), s)

    # ---- packed kernel params (one bf16 weight slab + one f32 bias slab) ----
    conv_w_pad = jnp.pad(conv_w, ((0, K_PAD - K_RAW), (0, 0)))  # zero pad rows
    cnn_w = jnp.concatenate([conv_w_pad, fc_w.T], axis=0).astype(jnp.bfloat16)
    cnn_b = jnp.stack(
        [conv_b, jnp.pad(fc_b, (0, CONV_OUT - FEATURE_DIM))], axis=0)

    wx_p_pad = jnp.pad(wx_p, ((0, POS_PAD - POS_DIM), (0, 0)))
    mlp_w_pad = jnp.pad(mlp_w, ((0, 0), (0, GATES - NUM_CLASSES)))
    rnn_w = jnp.concatenate([wx_f, wx_p_pad, wh, mlp_w_pad],
                            axis=0).astype(jnp.bfloat16)        # (104, 128)
    rnn_b = jnp.stack([b, jnp.pad(mlp_b, (0, GATES - NUM_CLASSES))], axis=0)

    packed = dict(cnn=dict(w=cnn_w, b=cnn_b), rnn=dict(w=rnn_w, b=rnn_b))
    raw = dict(conv_w=conv_w, conv_b=conv_b, fc_w=fc_w, fc_b=fc_b,
               wx_f=wx_f, wx_p=wx_p, wh=wh, b=b, mlp_w=mlp_w, mlp_b=mlp_b)
    return packed, raw


# ---------------------------------------------------------------------------
# Pure-JAX f32 reference (same semantics as the PyTorch module w/ the stand-in
# CNN), used to validate the bf16-operand kernels with a relaxed tolerance.
# ---------------------------------------------------------------------------
def reference_forward(raw, images, positions):
    patches = _im2col_time_major(images)                        # (T*B*HW, 27)
    conv = jnp.maximum(patches @ raw["conv_w"] + raw["conv_b"], 0.0)
    pooled = jnp.mean(conv.reshape(T * B, HW, CONV_OUT), axis=1)
    feats = pooled @ raw["fc_w"] + raw["fc_b"]                  # (T*B, 32)
    pos_tb = jnp.transpose(positions, (1, 0, 2)).reshape(T * B, POS_DIM)
    x = jnp.concatenate([feats, pos_tb], axis=1)                # (T*B, 34)
    w_ih = jnp.concatenate([raw["wx_f"], raw["wx_p"]], axis=0)  # (34, GATES)
    h = jnp.zeros((B, HIDDEN), jnp.float32)
    c = jnp.zeros((B, HIDDEN), jnp.float32)
    for t in range(T):
        gates = x[t * B:(t + 1) * B] @ w_ih + h @ raw["wh"] + raw["b"]
        i = jax.nn.sigmoid(gates[:, 0 * HIDDEN:1 * HIDDEN])
        f = jax.nn.sigmoid(gates[:, 1 * HIDDEN:2 * HIDDEN])
        g = jnp.tanh(gates[:, 2 * HIDDEN:3 * HIDDEN])
        o = jax.nn.sigmoid(gates[:, 3 * HIDDEN:4 * HIDDEN])
        c = f * c + i * g
        h = o * jnp.tanh(c)
    return h @ raw["mlp_w"] + raw["mlp_b"]


if __name__ == "__main__":
    key = jax.random.PRNGKey(0)
    k_img, k_pos, k_par = jax.random.split(key, 3)

    images = jax.random.normal(k_img, (B, T, C_IN, IMG_H, IMG_W), jnp.float32)
    positions = jax.random.normal(k_pos, (B, T, POS_DIM), jnp.float32)
    params, raw = init_params(k_par)

    out = jax.jit(deepseqslam_forward)(params, images, positions)
    out = jax.block_until_ready(out)

    assert out.shape == (B, NUM_CLASSES), out.shape
    assert out.dtype == jnp.float32
    assert bool(jnp.all(jnp.isfinite(out)))

    ref = jax.jit(reference_forward)(raw, images, positions)
    ref = jax.block_until_ready(ref)
    assert bool(jnp.allclose(out, ref, atol=5e-2)), (
        float(jnp.max(jnp.abs(out - ref))))

    print("KERNEL_OK")
</pallas_src>

<mosaic_0001>
module attributes {stable_mosaic.version = 11 : i64} {
  func.func @cnn_kernel(%arg0: i32, %arg1: memref<2048x32xbf16, #tpu.memory_space<vmem>>, %arg2: memref<64x128xbf16, #tpu.memory_space<vmem>>, %arg3: memref<2x128xf32, #tpu.memory_space<vmem>>, %arg4: memref<8x32xf32, #tpu.memory_space<vmem>>) attributes {dimension_semantics = [#tpu.dimension_semantics<parallel>], iteration_bounds = array<i64: 2>, scalar_prefetch = 0 : i64, scratch_operands = 0 : i64, tpu.core_type = #tpu.core_type<tc>, window_params = [{transform_indices = @transform_0, window_bounds = array<i64: 2048, 32>}, {pipeline_mode = #tpu.pipeline_mode<synchronous>, transform_indices = @transform_1, window_bounds = array<i64: 64, 128>}, {pipeline_mode = #tpu.pipeline_mode<synchronous>, transform_indices = @transform_2, window_bounds = array<i64: 2, 128>}, {transform_indices = @transform_3, window_bounds = array<i64: 8, 32>}]} {
    %c0 = arith.constant 0 : index
    %c0_0 = arith.constant 0 : index
    %0 = vector.load %arg1[%c0, %c0_0] : memref<2048x32xbf16, #tpu.memory_space<vmem>>, vector<2048x32xbf16>
    %c0_1 = arith.constant 0 : index
    %c0_2 = arith.constant 0 : index
    %1 = vector.load %arg2[%c0_1, %c0_2] : memref<64x128xbf16, #tpu.memory_space<vmem>>, vector<32x128xbf16>
    %cst = arith.constant dense<0.000000e+00> : vector<2048x128xf32>
    %2 = tpu.matmul %0, %1, %cst {dimension_numbers = #tpu.dot_dimension_numbers<[1], [0], [0], [1], [0, 0, 1, 1], [], []>} : vector<2048x32xbf16>, vector<32x128xbf16>, vector<2048x128xf32> -> vector<2048x128xf32>
    %c0_3 = arith.constant 0 : index
    %c0_4 = arith.constant 0 : index
    %3 = vector.load %arg3[%c0_3, %c0_4] : memref<2x128xf32, #tpu.memory_space<vmem>>, vector<1x128xf32>
    %4 = vector.broadcast %3 : vector<1x128xf32> to vector<2048x128xf32>
    %5 = arith.addf %2, %4 : vector<2048x128xf32>
    %cst_5 = arith.constant 0.000000e+00 : f32
    %6 = vector.broadcast %cst_5 : f32 to vector<2048x128xf32>
    %7 = arith.maximumf %5, %6 : vector<2048x128xf32>
    %8 = vector.shape_cast %7 : vector<2048x128xf32> to vector<8x256x128xf32>
    %cst_6 = arith.constant dense<0.000000e+00> : vector<8x128xf32>
    %9 = vector.multi_reduction <add>, %8, %cst_6 [1] : vector<8x256x128xf32> to vector<8x128xf32>
    %cst_7 = arith.constant 2.560000e+02 : f32
    %10 = vector.broadcast %cst_7 : f32 to vector<8x128xf32>
    %11 = arith.divf %9, %10 : vector<8x128xf32>
    %12 = arith.truncf %11 : vector<8x128xf32> to vector<8x128xbf16>
    %c32 = arith.constant 32 : index
    %c0_8 = arith.constant 0 : index
    %13 = vector.load %arg2[%c32, %c0_8] : memref<64x128xbf16, #tpu.memory_space<vmem>>, vector<32x128xbf16>
    %cst_9 = arith.constant dense<0.000000e+00> : vector<8x32xf32>
    %14 = tpu.matmul %12, %13, %cst_9 {dimension_numbers = #tpu.dot_dimension_numbers<[1], [1], [0], [0], [0, 0, 1, 0], [], []>} : vector<8x128xbf16>, vector<32x128xbf16>, vector<8x32xf32> -> vector<8x32xf32>
    %c1 = arith.constant 1 : index
    %c0_10 = arith.constant 0 : index
    %15 = vector.load %arg3[%c1, %c0_10] : memref<2x128xf32, #tpu.memory_space<vmem>>, vector<1x32xf32>
    %16 = vector.broadcast %15 : vector<1x32xf32> to vector<8x32xf32>
    %17 = arith.addf %14, %16 : vector<8x32xf32>
    %c0_11 = arith.constant 0 : index
    %c0_12 = arith.constant 0 : index
    %18 = vector.load %arg4[%c0_11, %c0_12] : memref<8x32xf32, #tpu.memory_space<vmem>>, vector<8x32xf32>
    tpu.vector_store %arg4[%c0_11, %c0_12], %17 {strides = array<i32>} : memref<8x32xf32, #tpu.memory_space<vmem>>, vector<8x32xf32>,
    return
  }
  func.func @transform_0(%arg0: i32) -> (i32, i32) {
    %c0_i32 = arith.constant 0 : i32
    %c0_i32_0 = arith.constant 0 : i32
    return %arg0, %c0_i32 : i32, i32
  }
  func.func @transform_1(%arg0: i32) -> (i32, i32) {
    %c0_i32 = arith.constant 0 : i32
    %c0_i32_0 = arith.constant 0 : i32
    %c0_i32_1 = arith.constant 0 : i32
    return %c0_i32, %c0_i32_0 : i32, i32
  }
  func.func @transform_2(%arg0: i32) -> (i32, i32) {
    %c0_i32 = arith.constant 0 : i32
    %c0_i32_0 = arith.constant 0 : i32
    %c0_i32_1 = arith.constant 0 : i32
    return %c0_i32, %c0_i32_0 : i32, i32
  }
  func.func @transform_3(%arg0: i32) -> (i32, i32) {
    %c0_i32 = arith.constant 0 : i32
    %c0_i32_0 = arith.constant 0 : i32
    return %arg0, %c0_i32 : i32, i32
  }
}

module attributes {stable_mosaic.version = 11 : i64} {
  func.func @lstm_kernel(%arg0: memref<16x32xf32, #tpu.memory_space<vmem>>, %arg1: memref<16x8xbf16, #tpu.memory_space<vmem>>, %arg2: memref<104x128xbf16, #tpu.memory_space<vmem>>, %arg3: memref<2x128xf32, #tpu.memory_space<vmem>>, %arg4: memref<2x10xf32, #tpu.memory_space<vmem>>, %arg5: memref<16x128xf32, #tpu.memory_space<vmem>>) attributes {dimension_semantics = [], scalar_prefetch = 0 : i64, scratch_operands = 1 : i64, tpu.core_type = #tpu.core_type<tc>} {
    %c0 = arith.constant 0 : index
    %c0_0 = arith.constant 0 : index
    %0 = vector.load %arg0[%c0, %c0_0] : memref<16x32xf32, #tpu.memory_space<vmem>>, vector<16x32xf32>
    %1 = arith.truncf %0 : vector<16x32xf32> to vector<16x32xbf16>
    %c0_1 = arith.constant 0 : index
    %c0_2 = arith.constant 0 : index
    %2 = vector.load %arg2[%c0_1, %c0_2] : memref<104x128xbf16, #tpu.memory_space<vmem>>, vector<32x128xbf16>
    %cst = arith.constant dense<0.000000e+00> : vector<16x128xf32>
    %3 = tpu.matmul %1, %2, %cst {dimension_numbers = #tpu.dot_dimension_numbers<[1], [0], [0], [1], [0, 0, 1, 1], [], []>} : vector<16x32xbf16>, vector<32x128xbf16>, vector<16x128xf32> -> vector<16x128xf32>
    %c0_3 = arith.constant 0 : index
    %c0_4 = arith.constant 0 : index
    %4 = vector.load %arg1[%c0_3, %c0_4] : memref<16x8xbf16, #tpu.memory_space<vmem>>, vector<16x8xbf16>
    %c32 = arith.constant 32 : index
    %c0_5 = arith.constant 0 : index
    %5 = vector.load %arg2[%c32, %c0_5] : memref<104x128xbf16, #tpu.memory_space<vmem>>, vector<8x128xbf16>
    %cst_6 = arith.constant dense<0.000000e+00> : vector<16x128xf32>
    %6 = tpu.matmul %4, %5, %cst_6 {dimension_numbers = #tpu.dot_dimension_numbers<[1], [0], [0], [1], [0, 0, 1, 1], [], []>} : vector<16x8xbf16>, vector<8x128xbf16>, vector<16x128xf32> -> vector<16x128xf32>
    %7 = arith.addf %3, %6 : vector<16x128xf32>
    %c0_7 = arith.constant 0 : index
    %c0_8 = arith.constant 0 : index
    %8 = vector.load %arg3[%c0_7, %c0_8] : memref<2x128xf32, #tpu.memory_space<vmem>>, vector<1x128xf32>
    %9 = vector.broadcast %8 : vector<1x128xf32> to vector<16x128xf32>
    %10 = arith.addf %7, %9 : vector<16x128xf32>
    %c0_9 = arith.constant 0 : index
    %c0_10 = arith.constant 0 : index
    %11 = vector.load %arg5[%c0_9, %c0_10] : memref<16x128xf32, #tpu.memory_space<vmem>>, vector<16x128xf32>
    tpu.vector_store %arg5[%c0_9, %c0_10], %10 {strides = array<i32>} : memref<16x128xf32, #tpu.memory_space<vmem>>, vector<16x128xf32>,
    %c40 = arith.constant 40 : index
    %c0_11 = arith.constant 0 : index
    %12 = vector.load %arg2[%c40, %c0_11] : memref<104x128xbf16, #tpu.memory_space<vmem>>, vector<32x128xbf16>
    %cst_12 = arith.constant 0.000000e+00 : f32
    %13 = vector.broadcast %cst_12 : f32 to vector<2x32xf32>
    %cst_13 = arith.constant 0.000000e+00 : f32
    %14 = vector.broadcast %cst_13 : f32 to vector<2x32xf32>
    %c0_14 = arith.constant 0 : index
    %c0_15 = arith.constant 0 : index
    %15 = vector.load %arg5[%c0_14, %c0_15] : memref<16x128xf32, #tpu.memory_space<vmem>>, vector<2x128xf32>
    %16 = arith.truncf %13 : vector<2x32xf32> to vector<2x32xbf16>
    %cst_16 = arith.constant dense<0.000000e+00> : vector<2x128xf32>
    %17 = tpu.matmul %16, %12, %cst_16 {dimension_numbers = #tpu.dot_dimension_numbers<[1], [0], [0], [1], [0, 0, 1, 1], [], []>} : vector<2x32xbf16>, vector<32x128xbf16>, vector<2x128xf32> -> vector<2x128xf32>
    %18 = arith.addf %15, %17 : vector<2x128xf32>
    %19 = arith.negf %18 : vector<2x128xf32>
    %20 = math.exp %19 : vector<2x128xf32>
    %cst_17 = arith.constant 1.000000e+00 : f32
    %21 = vector.broadcast %cst_17 : f32 to vector<2x128xf32>
    %22 = arith.addf %21, %20 : vector<2x128xf32>
    %23 = arith.divf %21, %22 : vector<2x128xf32>
    %24 = math.tanh %18 : vector<2x128xf32>
    %25 = vector.extract_strided_slice %23 {offsets = [0, 0], sizes = [2, 32], strides = [1, 1]} : vector<2x128xf32> to vector<2x32xf32>
    %26 = vector.extract_strided_slice %23 {offsets = [0, 32], sizes = [2, 32], strides = [1, 1]} : vector<2x128xf32> to vector<2x32xf32>
    %27 = vector.extract_strided_slice %24 {offsets = [0, 64], sizes = [2, 32], strides = [1, 1]} : vector<2x128xf32> to vector<2x32xf32>
    %28 = vector.extract_strided_slice %23 {offsets = [0, 96], sizes = [2, 32], strides = [1, 1]} : vector<2x128xf32> to vector<2x32xf32>
    %29 = arith.mulf %26, %14 : vector<2x32xf32>
    %30 = arith.mulf %25, %27 : vector<2x32xf32>
    %31 = arith.addf %29, %30 : vector<2x32xf32>
    %32 = math.tanh %31 : vector<2x32xf32>
    %33 = arith.mulf %28, %32 : vector<2x32xf32>
    %c2 = arith.constant 2 : index
    %c0_18 = arith.constant 0 : index
    %34 = vector.load %arg5[%c2, %c0_18] : memref<16x128xf32, #tpu.memory_space<vmem>>, vector<2x128xf32>
    %35 = arith.truncf %33 : vector<2x32xf32> to vector<2x32xbf16>
    %cst_19 = arith.constant dense<0.000000e+00> : vector<2x128xf32>
    %36 = tpu.matmul %35, %12, %cst_19 {dimension_numbers = #tpu.dot_dimension_numbers<[1], [0], [0], [1], [0, 0, 1, 1], [], []>} : vector<2x32xbf16>, vector<32x128xbf16>, vector<2x128xf32> -> vector<2x128xf32>
    %37 = arith.addf %34, %36 : vector<2x128xf32>
    %38 = arith.negf %37 : vector<2x128xf32>
    %39 = math.exp %38 : vector<2x128xf32>
    %cst_20 = arith.constant 1.000000e+00 : f32
    %40 = vector.broadcast %cst_20 : f32 to vector<2x128xf32>
    %41 = arith.addf %40, %39 : vector<2x128xf32>
    %42 = arith.divf %40, %41 : vector<2x128xf32>
    %43 = math.tanh %37 : vector<2x128xf32>
    %44 = vector.extract_strided_slice %42 {offsets = [0, 0], sizes = [2, 32], strides = [1, 1]} : vector<2x128xf32> to vector<2x32xf32>
    %45 = vector.extract_strided_slice %42 {offsets = [0, 32], sizes = [2, 32], strides = [1, 1]} : vector<2x128xf32> to vector<2x32xf32>
    %46 = vector.extract_strided_slice %43 {offsets = [0, 64], sizes = [2, 32], strides = [1, 1]} : vector<2x128xf32> to vector<2x32xf32>
    %47 = vector.extract_strided_slice %42 {offsets = [0, 96], sizes = [2, 32], strides = [1, 1]} : vector<2x128xf32> to vector<2x32xf32>
    %48 = arith.mulf %45, %31 : vector<2x32xf32>
    %49 = arith.mulf %44, %46 : vector<2x32xf32>
    %50 = arith.addf %48, %49 : vector<2x32xf32>
    %51 = math.tanh %50 : vector<2x32xf32>
    %52 = arith.mulf %47, %51 : vector<2x32xf32>
    %c4 = arith.constant 4 : index
    %c0_21 = arith.constant 0 : index
    %53 = vector.load %arg5[%c4, %c0_21] : memref<16x128xf32, #tpu.memory_space<vmem>>, vector<2x128xf32>
    %54 = arith.truncf %52 : vector<2x32xf32> to vector<2x32xbf16>
    %cst_22 = arith.constant dense<0.000000e+00> : vector<2x128xf32>
    %55 = tpu.matmul %54, %12, %cst_22 {dimension_numbers = #tpu.dot_dimension_numbers<[1], [0], [0], [1], [0, 0, 1, 1], [], []>} : vector<2x32xbf16>, vector<32x128xbf16>, vector<2x128xf32> -> vector<2x128xf32>
    %56 = arith.addf %53, %55 : vector<2x128xf32>
    %57 = arith.negf %56 : vector<2x128xf32>
    %58 = math.exp %57 : vector<2x128xf32>
    %cst_23 = arith.constant 1.000000e+00 : f32
    %59 = vector.broadcast %cst_23 : f32 to vector<2x128xf32>
    %60 = arith.addf %59, %58 : vector<2x128xf32>
    %61 = arith.divf %59, %60 : vector<2x128xf32>
    %62 = math.tanh %56 : vector<2x128xf32>
    %63 = vector.extract_strided_slice %61 {offsets = [0, 0], sizes = [2, 32], strides = [1, 1]} : vector<2x128xf32> to vector<2x32xf32>
    %64 = vector.extract_strided_slice %61 {offsets = [0, 32], sizes = [2, 32], strides = [1, 1]} : vector<2x128xf32> to vector<2x32xf32>
    %65 = vector.extract_strided_slice %62 {offsets = [0, 64], sizes = [2, 32], strides = [1, 1]} : vector<2x128xf32> to vector<2x32xf32>
    %66 = vector.extract_strided_slice %61 {offsets = [0, 96], sizes = [2, 32], strides = [1, 1]} : vector<2x128xf32> to vector<2x32xf32>
    %67 = arith.mulf %64, %50 : vector<2x32xf32>
    %68 = arith.mulf %63, %65 : vector<2x32xf32>
    %69 = arith.addf %67, %68 : vector<2x32xf32>
    %70 = math.tanh %69 : vector<2x32xf32>
    %71 = arith.mulf %66, %70 : vector<2x32xf32>
    %c6 = arith.constant 6 : index
    %c0_24 = arith.constant 0 : index
    %72 = vector.load %arg5[%c6, %c0_24] : memref<16x128xf32, #tpu.memory_space<vmem>>, vector<2x128xf32>
    %73 = arith.truncf %71 : vector<2x32xf32> to vector<2x32xbf16>
    %cst_25 = arith.constant dense<0.000000e+00> : vector<2x128xf32>
    %74 = tpu.matmul %73, %12, %cst_25 {dimension_numbers = #tpu.dot_dimension_numbers<[1], [0], [0], [1], [0, 0, 1, 1], [], []>} : vector<2x32xbf16>, vector<32x128xbf16>, vector<2x128xf32> -> vector<2x128xf32>
    %75 = arith.addf %72, %74 : vector<2x128xf32>
    %76 = arith.negf %75 : vector<2x128xf32>
    %77 = math.exp %76 : vector<2x128xf32>
    %cst_26 = arith.constant 1.000000e+00 : f32
    %78 = vector.broadcast %cst_26 : f32 to vector<2x128xf32>
    %79 = arith.addf %78, %77 : vector<2x128xf32>
    %80 = arith.divf %78, %79 : vector<2x128xf32>
    %81 = math.tanh %75 : vector<2x128xf32>
    %82 = vector.extract_strided_slice %80 {offsets = [0, 0], sizes = [2, 32], strides = [1, 1]} : vector<2x128xf32> to vector<2x32xf32>
    %83 = vector.extract_strided_slice %80 {offsets = [0, 32], sizes = [2, 32], strides = [1, 1]} : vector<2x128xf32> to vector<2x32xf32>
    %84 = vector.extract_strided_slice %81 {offsets = [0, 64], sizes = [2, 32], strides = [1, 1]} : vector<2x128xf32> to vector<2x32xf32>
    %85 = vector.extract_strided_slice %80 {offsets = [0, 96], sizes = [2, 32], strides = [1, 1]} : vector<2x128xf32> to vector<2x32xf32>
    %86 = arith.mulf %83, %69 : vector<2x32xf32>
    %87 = arith.mulf %82, %84 : vector<2x32xf32>
    %88 = arith.addf %86, %87 : vector<2x32xf32>
    %89 = math.tanh %88 : vector<2x32xf32>
    %90 = arith.mulf %85, %89 : vector<2x32xf32>
    %c8 = arith.constant 8 : index
    %c0_27 = arith.constant 0 : index
    %91 = vector.load %arg5[%c8, %c0_27] : memref<16x128xf32, #tpu.memory_space<vmem>>, vector<2x128xf32>
    %92 = arith.truncf %90 : vector<2x32xf32> to vector<2x32xbf16>
    %cst_28 = arith.constant dense<0.000000e+00> : vector<2x128xf32>
    %93 = tpu.matmul %92, %12, %cst_28 {dimension_numbers = #tpu.dot_dimension_numbers<[1], [0], [0], [1], [0, 0, 1, 1], [], []>} : vector<2x32xbf16>, vector<32x128xbf16>, vector<2x128xf32> -> vector<2x128xf32>
    %94 = arith.addf %91, %93 : vector<2x128xf32>
    %95 = arith.negf %94 : vector<2x128xf32>
    %96 = math.exp %95 : vector<2x128xf32>
    %cst_29 = arith.constant 1.000000e+00 : f32
    %97 = vector.broadcast %cst_29 : f32 to vector<2x128xf32>
    %98 = arith.addf %97, %96 : vector<2x128xf32>
    %99 = arith.divf %97, %98 : vector<2x128xf32>
    %100 = math.tanh %94 : vector<2x128xf32>
    %101 = vector.extract_strided_slice %99 {offsets = [0, 0], sizes = [2, 32], strides = [1, 1]} : vector<2x128xf32> to vector<2x32xf32>
    %102 = vector.extract_strided_slice %99 {offsets = [0, 32], sizes = [2, 32], strides = [1, 1]} : vector<2x128xf32> to vector<2x32xf32>
    %103 = vector.extract_strided_slice %100 {offsets = [0, 64], sizes = [2, 32], strides = [1, 1]} : vector<2x128xf32> to vector<2x32xf32>
    %104 = vector.extract_strided_slice %99 {offsets = [0, 96], sizes = [2, 32], strides = [1, 1]} : vector<2x128xf32> to vector<2x32xf32>
    %105 = arith.mulf %102, %88 : vector<2x32xf32>
    %106 = arith.mulf %101, %103 : vector<2x32xf32>
    %107 = arith.addf %105, %106 : vector<2x32xf32>
    %108 = math.tanh %107 : vector<2x32xf32>
    %109 = arith.mulf %104, %108 : vector<2x32xf32>
    %c10 = arith.constant 10 : index
    %c0_30 = arith.constant 0 : index
    %110 = vector.load %arg5[%c10, %c0_30] : memref<16x128xf32, #tpu.memory_space<vmem>>, vector<2x128xf32>
    %111 = arith.truncf %109 : vector<2x32xf32> to vector<2x32xbf16>
    %cst_31 = arith.constant dense<0.000000e+00> : vector<2x128xf32>
    %112 = tpu.matmul %111, %12, %cst_31 {dimension_numbers = #tpu.dot_dimension_numbers<[1], [0], [0], [1], [0, 0, 1, 1], [], []>} : vector<2x32xbf16>, vector<32x128xbf16>, vector<2x128xf32> -> vector<2x128xf32>
    %113 = arith.addf %110, %112 : vector<2x128xf32>
    %114 = arith.negf %113 : vector<2x128xf32>
    %115 = math.exp %114 : vector<2x128xf32>
    %cst_32 = arith.constant 1.000000e+00 : f32
    %116 = vector.broadcast %cst_32 : f32 to vector<2x128xf32>
    %117 = arith.addf %116, %115 : vector<2x128xf32>
    %118 = arith.divf %116, %117 : vector<2x128xf32>
    %119 = math.tanh %113 : vector<2x128xf32>
    %120 = vector.extract_strided_slice %118 {offsets = [0, 0], sizes = [2, 32], strides = [1, 1]} : vector<2x128xf32> to vector<2x32xf32>
    %121 = vector.extract_strided_slice %118 {offsets = [0, 32], sizes = [2, 32], strides = [1, 1]} : vector<2x128xf32> to vector<2x32xf32>
    %122 = vector.extract_strided_slice %119 {offsets = [0, 64], sizes = [2, 32], strides = [1, 1]} : vector<2x128xf32> to vector<2x32xf32>
    %123 = vector.extract_strided_slice %118 {offsets = [0, 96], sizes = [2, 32], strides = [1, 1]} : vector<2x128xf32> to vector<2x32xf32>
    %124 = arith.mulf %121, %107 : vector<2x32xf32>
    %125 = arith.mulf %120, %122 : vector<2x32xf32>
    %126 = arith.addf %124, %125 : vector<2x32xf32>
    %127 = math.tanh %126 : vector<2x32xf32>
    %128 = arith.mulf %123, %127 : vector<2x32xf32>
    %c12 = arith.constant 12 : index
    %c0_33 = arith.constant 0 : index
    %129 = vector.load %arg5[%c12, %c0_33] : memref<16x128xf32, #tpu.memory_space<vmem>>, vector<2x128xf32>
    %130 = arith.truncf %128 : vector<2x32xf32> to vector<2x32xbf16>
    %cst_34 = arith.constant dense<0.000000e+00> : vector<2x128xf32>
    %131 = tpu.matmul %130, %12, %cst_34 {dimension_numbers = #tpu.dot_dimension_numbers<[1], [0], [0], [1], [0, 0, 1, 1], [], []>} : vector<2x32xbf16>, vector<32x128xbf16>, vector<2x128xf32> -> vector<2x128xf32>
    %132 = arith.addf %129, %131 : vector<2x128xf32>
    %133 = arith.negf %132 : vector<2x128xf32>
    %134 = math.exp %133 : vector<2x128xf32>
    %cst_35 = arith.constant 1.000000e+00 : f32
    %135 = vector.broadcast %cst_35 : f32 to vector<2x128xf32>
    %136 = arith.addf %135, %134 : vector<2x128xf32>
    %137 = arith.divf %135, %136 : vector<2x128xf32>
    %138 = math.tanh %132 : vector<2x128xf32>
    %139 = vector.extract_strided_slice %137 {offsets = [0, 0], sizes = [2, 32], strides = [1, 1]} : vector<2x128xf32> to vector<2x32xf32>
    %140 = vector.extract_strided_slice %137 {offsets = [0, 32], sizes = [2, 32], strides = [1, 1]} : vector<2x128xf32> to vector<2x32xf32>
    %141 = vector.extract_strided_slice %138 {offsets = [0, 64], sizes = [2, 32], strides = [1, 1]} : vector<2x128xf32> to vector<2x32xf32>
    %142 = vector.extract_strided_slice %137 {offsets = [0, 96], sizes = [2, 32], strides = [1, 1]} : vector<2x128xf32> to vector<2x32xf32>
    %143 = arith.mulf %140, %126 : vector<2x32xf32>
    %144 = arith.mulf %139, %141 : vector<2x32xf32>
    %145 = arith.addf %143, %144 : vector<2x32xf32>
    %146 = math.tanh %145 : vector<2x32xf32>
    %147 = arith.mulf %142, %146 : vector<2x32xf32>
    %c14 = arith.constant 14 : index
    %c0_36 = arith.constant 0 : index
    %148 = vector.load %arg5[%c14, %c0_36] : memref<16x128xf32, #tpu.memory_space<vmem>>, vector<2x128xf32>
    %149 = arith.truncf %147 : vector<2x32xf32> to vector<2x32xbf16>
    %cst_37 = arith.constant dense<0.000000e+00> : vector<2x128xf32>
    %150 = tpu.matmul %149, %12, %cst_37 {dimension_numbers = #tpu.dot_dimension_numbers<[1], [0], [0], [1], [0, 0, 1, 1], [], []>} : vector<2x32xbf16>, vector<32x128xbf16>, vector<2x128xf32> -> vector<2x128xf32>
    %151 = arith.addf %148, %150 : vector<2x128xf32>
    %152 = arith.negf %151 : vector<2x128xf32>
    %153 = math.exp %152 : vector<2x128xf32>
    %cst_38 = arith.constant 1.000000e+00 : f32
    %154 = vector.broadcast %cst_38 : f32 to vector<2x128xf32>
    %155 = arith.addf %154, %153 : vector<2x128xf32>
    %156 = arith.divf %154, %155 : vector<2x128xf32>
    %157 = math.tanh %151 : vector<2x128xf32>
    %158 = vector.extract_strided_slice %156 {offsets = [0, 0], sizes = [2, 32], strides = [1, 1]} : vector<2x128xf32> to vector<2x32xf32>
    %159 = vector.extract_strided_slice %156 {offsets = [0, 32], sizes = [2, 32], strides = [1, 1]} : vector<2x128xf32> to vector<2x32xf32>
    %160 = vector.extract_strided_slice %157 {offsets = [0, 64], sizes = [2, 32], strides = [1, 1]} : vector<2x128xf32> to vector<2x32xf32>
    %161 = vector.extract_strided_slice %156 {offsets = [0, 96], sizes = [2, 32], strides = [1, 1]} : vector<2x128xf32> to vector<2x32xf32>
    %162 = arith.mulf %159, %145 : vector<2x32xf32>
    %163 = arith.mulf %158, %160 : vector<2x32xf32>
    %164 = arith.addf %162, %163 : vector<2x32xf32>
    %165 = math.tanh %164 : vector<2x32xf32>
    %166 = arith.mulf %161, %165 : vector<2x32xf32>
    %167 = arith.truncf %166 : vector<2x32xf32> to vector<2x32xbf16>
    %c72 = arith.constant 72 : index
    %c0_39 = arith.constant 0 : index
    %168 = vector.load %arg2[%c72, %c0_39] : memref<104x128xbf16, #tpu.memory_space<vmem>>, vector<32x128xbf16>
    %cst_40 = arith.constant dense<0.000000e+00> : vector<2x128xf32>
    %169 = tpu.matmul %167, %168, %cst_40 {dimension_numbers = #tpu.dot_dimension_numbers<[1], [0], [0], [1], [0, 0, 1, 1], [], []>} : vector<2x32xbf16>, vector<32x128xbf16>, vector<2x128xf32> -> vector<2x128xf32>
    %c1 = arith.constant 1 : index
    %c0_41 = arith.constant 0 : index
    %170 = vector.load %arg3[%c1, %c0_41] : memref<2x128xf32, #tpu.memory_space<vmem>>, vector<1x128xf32>
    %171 = vector.broadcast %170 : vector<1x128xf32> to vector<2x128xf32>
    %172 = arith.addf %169, %171 : vector<2x128xf32>
    %173 = vector.extract_strided_slice %172 {offsets = [0, 0], sizes = [2, 10], strides = [1, 1]} : vector<2x128xf32> to vector<2x10xf32>
    %c0_42 = arith.constant 0 : index
    %c0_43 = arith.constant 0 : index
    %174 = vector.load %arg4[%c0_42, %c0_43] : memref<2x10xf32, #tpu.memory_space<vmem>>, vector<2x10xf32>
    tpu.vector_store %arg4[%c0_42, %c0_43], %173 {strides = array<i32>} : memref<2x10xf32, #tpu.memory_space<vmem>>, vector<2x10xf32>,
    return
  }
}

</mosaic_0001>

<bundles_post_ra>
// kernel: deepseqslam_forward.2
= control target key start
LH: loop header
LB: loop body
LE: loop exit
PB: predicated region body
PF: predicated region fallthrough
CT: control target
= control target key end

     0   :  { %s3660_s12 = smov 0   ;;  %s4419_s0 = inlined_call_operand.vmem [shape: bf16[4096,32], index: 0, kind: input, shape index: {}]   ;;  %s4420_s1 = inlined_call_operand.vmem [shape: bf16[64,128], index: 1, kind: input, shape index: {}]   ;;  %s4421_s2 = inlined_call_operand.vmem [shape: f32[2,128], index: 2, kind: input, shape index: {}]   ;;  %s4422_s3 = inlined_call_operand.vmem [shape: f32[16,32], index: 3, kind: output, shape index: {}]  }
   0x1 LB: > { %s3666_s13 = sadd.s32 4294967295, %s3637_s12   ;;  %p2816_p0 = scmp.ge.s32.totalorder %s3637_s12, 1  ;;  %s3637_s12 = sphi %s3660_s12, %s13_s12  }
   0x2   : > { %p138_p1 = scmp.lt.s32.totalorder %s3637_s12, 3 }
   0x4   : > { %p139_p2 = pnand %p2816_p0, %p138_p1 }
   0x6   : > { %142 = sbr.rel (%p139_p2) target bundleno = 891 (0x37b), region = 32 }
   0xb   : > { %v3607_v0 = vld [vmem:[%s4420_s1 + $0x8] sm:$0xff]  ;;  %s2817_s16 = sshll.u32 %s3666_s13, 8  ;;  %v3606_v1 = vld [vmem:[%s4420_s1] sm:$0xff]  ;;  %vm1086_vm0 = vcmask 261120   ;;  %vm2717_vm2 = vcmask 1041409   ;;  %vm2719_vm3 = vcmask 1042434  }
   0xc   : > { %p162_p3 = scmp.lt.s32.totalorder %s2817_s16, 511  ;;  %1477 = vmatpush.bf16.msra.mxu0 %v3607_v0  ;;  %3610 = vmatpush.bf16.msra.mxu1 %v3607_v0  ;;  %v3755_v40 = vld [vmem:[%s4421_s2] ss:$0 sm:$0xff]  ;;  %vm2721_vm4 = vcmask 1043459   ;;  %vm2723_vm5 = vcmask 1044484   ;;  %vm2725_vm6 = vcmask 1045509  }
   0xd   : > { %3611 = vmatpush.bf16.msra.mxu2 %v3607_v0  ;;  %3612 = vmatpush.bf16.msra.mxu3 %v3607_v0  ;;  %vm2727_vm7 = vcmask 1046534   ;;  %vm2729_vm8 = vcmask 1047559   ;;  %p167_p4 = scmp.lt.s32.totalorder %s3666_s13, 1 }
   0xe   : > { %s4447_s16 = smov (!%p162_p3, %s2817_s16), 511 }
   0xf   : > { %s2818_s19 = sshll.u32 %s4447_s16, 2  ;;  %s4449_s13 = smov (!%p167_p4, %s3666_s13), 1 }
  0x10   : > { %1478 = vmatpush.bf16.msra.mxu0 %v3606_v1  ;;  %3613 = vmatpush.bf16.msra.mxu1 %v3606_v1  ;;  %s3680_s22 = scalar_lea.vmem %s4419_s0, %s2818_s19  ;;  %s2819_s6 = sshll.u32 %s4449_s13, 3 }
  0x11   : > { %3614 = vmatpush.bf16.msra.mxu2 %v3606_v1  ;;  %3615 = vmatpush.bf16.msra.mxu3 %v3606_v1  ;;  %v3478_v2 = vld [vmem:[%s3680_s22] sm:$0xff]  ;;  %v3511_v3 = vld [vmem:[%s3680_s22 + $0x108] sm:$0xff]  ;;  %v3540_v4 = vld [vmem:[%s3680_s22 + $0x1f0] sm:$0xff]  ;;  %s170_s11 = scalar_lea.vmem %s4422_s3, %s2819_s6 }
  0x12   : > { %v3573_v5 = vld [vmem:[%s3680_s22 + $0x2f8] sm:$0xff]  ;;  %v3479_v6 = vld [vmem:[%s3680_s22 + $0x8] sm:$0xff]  ;;  %v3512_v7 = vld [vmem:[%s3680_s22 + $0x110] sm:$0xff] }
  0x13   : > { %3340 = vmatmul.msk.bf16.vlgmr.msra.gmra.mxu0 %vm1086_vm0, %v3478_v2  ;;  %3373 = vmatmul.msk.bf16.vlgmr.msra.gmra.mxu1 %vm1086_vm0, %v3511_v3  ;;  %v3541_v8 = vld [vmem:[%s3680_s22 + $0x1f8] sm:$0xff]  ;;  %v3574_v9 = vld [vmem:[%s3680_s22 + $0x300] sm:$0xff]  ;;  %v3480_v10 = vld [vmem:[%s3680_s22 + $0x10] sm:$0xff] }
  0x14   : > { %3402 = vmatmul.msk.bf16.vlgmr.msra.gmra.mxu2 %vm1086_vm0, %v3540_v4  ;;  %3435 = vmatmul.msk.bf16.vlgmr.msra.gmra.mxu3 %vm1086_vm0, %v3573_v5  ;;  %v3513_v11 = vld [vmem:[%s3680_s22 + $0x118] sm:$0xff]  ;;  %v3542_v12 = vld [vmem:[%s3680_s22 + $0x200] sm:$0xff]  ;;  %v3575_v13 = vld [vmem:[%s3680_s22 + $0x308] sm:$0xff] }
  0x15   : > { %v3481_v14 = vld [vmem:[%s3680_s22 + $0x18] sm:$0xff]  ;;  %v3514_v15 = vld [vmem:[%s3680_s22 + $0x120] sm:$0xff]  ;;  %v3543_v16 = vld [vmem:[%s3680_s22 + $0x208] sm:$0xff] }
  0x16   : > { %v3576_v17 = vld [vmem:[%s3680_s22 + $0x310] sm:$0xff]  ;;  %v3482_v18 = vld [vmem:[%s3680_s22 + $0x20] sm:$0xff]  ;;  %v3515_v19 = vld [vmem:[%s3680_s22 + $0x128] sm:$0xff] }
  0x17   : > { %v3544_v20 = vld [vmem:[%s3680_s22 + $0x210] sm:$0xff]  ;;  %v3577_v21 = vld [vmem:[%s3680_s22 + $0x318] sm:$0xff]  ;;  %v3483_v22 = vld [vmem:[%s3680_s22 + $0x28] sm:$0xff] }
  0x18   : > { %v3516_v23 = vld [vmem:[%s3680_s22 + $0x130] sm:$0xff]  ;;  %v3545_v24 = vld [vmem:[%s3680_s22 + $0x218] sm:$0xff]  ;;  %v3578_v25 = vld [vmem:[%s3680_s22 + $0x320] sm:$0xff] }
  0x19   : > { %v3484_v26 = vld [vmem:[%s3680_s22 + $0x30] sm:$0xff]  ;;  %v3517_v27 = vld [vmem:[%s3680_s22 + $0x138] sm:$0xff]  ;;  %v3546_v28 = vld [vmem:[%s3680_s22 + $0x220] sm:$0xff] }
  0x1a   : > { %v3579_v29 = vld [vmem:[%s3680_s22 + $0x328] sm:$0xff]  ;;  %v3485_v30 = vld [vmem:[%s3680_s22 + $0x38] sm:$0xff]  ;;  %v3518_v31 = vld [vmem:[%s3680_s22 + $0x140] sm:$0xff] }
  0x1b   : > { %v3547_v32 = vld [vmem:[%s3680_s22 + $0x228] sm:$0xff]  ;;  %v3580_v33 = vld [vmem:[%s3680_s22 + $0x330] sm:$0xff]  ;;  %v3486_v34 = vld [vmem:[%s3680_s22 + $0x40] sm:$0xff] }
  0x1c   : > { %v3519_v35 = vld [vmem:[%s3680_s22 + $0x148] sm:$0xff]  ;;  %v3548_v38 = vld [vmem:[%s3680_s22 + $0x230] sm:$0xff]  ;;  %v3581_v39 = vld [vmem:[%s3680_s22 + $0x338] sm:$0xff] }
  0x1d   : > { %v3487_v52 = vld [vmem:[%s3680_s22 + $0x48] sm:$0xff]  ;;  %v3520_v53 = vld [vmem:[%s3680_s22 + $0x150] sm:$0xff]  ;;  %v3549_v56 = vld [vmem:[%s3680_s22 + $0x238] sm:$0xff] }
  0x1e   : > { %v3582_v57 = vld [vmem:[%s3680_s22 + $0x340] sm:$0xff] }
  0x23   : > { %3341 = vmatmul.msk.bf16.gmra.mxu0 %vm1086_vm0, %v3479_v6  ;;  %3374 = vmatmul.msk.bf16.gmra.mxu1 %vm1086_vm0, %v3512_v7  ;;  %v3488_v7 = vld [vmem:[%s3680_s22 + $0x50] sm:$0xff] }
  0x24   : > { %3403 = vmatmul.msk.bf16.gmra.mxu2 %vm1086_vm0, %v3541_v8  ;;  %3436 = vmatmul.msk.bf16.gmra.mxu3 %vm1086_vm0, %v3574_v9  ;;  %v3521_v8 = vld [vmem:[%s3680_s22 + $0x158] sm:$0xff] }
  0x33   : > { %3342 = vmatmul.msk.bf16.gmra.mxu0 %vm1086_vm0, %v3480_v10  ;;  %3375 = vmatmul.msk.bf16.gmra.mxu1 %vm1086_vm0, %v3513_v11 }
  0x34   : > { %3404 = vmatmul.msk.bf16.gmra.mxu2 %vm1086_vm0, %v3542_v12  ;;  %3437 = vmatmul.msk.bf16.gmra.mxu3 %vm1086_vm0, %v3575_v13  ;;  %v3550_v13 = vld [vmem:[%s3680_s22 + $0x240] sm:$0xff] }
  0x43   : > { %3343 = vmatmul.msk.bf16.gmra.mxu0 %vm1086_vm0, %v3481_v14  ;;  %3376 = vmatmul.msk.bf16.gmra.mxu1 %vm1086_vm0, %v3514_v15  ;;  %v3583_v14 = vld [vmem:[%s3680_s22 + $0x348] sm:$0xff] }
  0x44   : > { %3405 = vmatmul.msk.bf16.gmra.mxu2 %vm1086_vm0, %v3543_v16  ;;  %3438 = vmatmul.msk.bf16.gmra.mxu3 %vm1086_vm0, %v3576_v17 }
  0x53   : > { %3344 = vmatmul.msk.bf16.gmra.mxu0 %vm1086_vm0, %v3482_v18  ;;  %3377 = vmatmul.msk.bf16.gmra.mxu1 %vm1086_vm0, %v3515_v19 }
  0x54   : > { %3406 = vmatmul.msk.bf16.gmra.mxu2 %vm1086_vm0, %v3544_v20  ;;  %3439 = vmatmul.msk.bf16.gmra.mxu3 %vm1086_vm0, %v3577_v21 }
  0x63   : > { %3345 = vmatmul.msk.bf16.gmra.mxu0 %vm1086_vm0, %v3483_v22  ;;  %3378 = vmatmul.msk.bf16.gmra.mxu1 %vm1086_vm0, %v3516_v23 }
  0x64   : > { %3407 = vmatmul.msk.bf16.gmra.mxu2 %vm1086_vm0, %v3545_v24  ;;  %3440 = vmatmul.msk.bf16.gmra.mxu3 %vm1086_vm0, %v3578_v25 }
  0x73   : > { %3346 = vmatmul.msk.bf16.gmra.mxu0 %vm1086_vm0, %v3484_v26  ;;  %3379 = vmatmul.msk.bf16.gmra.mxu1 %vm1086_vm0, %v3517_v27 }
  0x74   : > { %3408 = vmatmul.msk.bf16.gmra.mxu2 %vm1086_vm0, %v3546_v28  ;;  %3441 = vmatmul.msk.bf16.gmra.mxu3 %vm1086_vm0, %v3579_v29 }
  0x83   : > { %3347 = vmatmul.msk.bf16.gmra.mxu0 %vm1086_vm0, %v3485_v30  ;;  %3380 = vmatmul.msk.bf16.gmra.mxu1 %vm1086_vm0, %v3518_v31 }
  0x84   : > { %3409 = vmatmul.msk.bf16.gmra.mxu2 %vm1086_vm0, %v3547_v32  ;;  %3442 = vmatmul.msk.bf16.gmra.mxu3 %vm1086_vm0, %v3580_v33  ;;  %v3489_v33 = vld [vmem:[%s3680_s22 + $0x58] sm:$0xff] }
  0x90   : > { %v1480_v36 = vpop.f32.mrf.mxu0  ;;  %v3748_v37 = vpop.f32.mrf.mxu1 }
  0x91   : > { %v1481_v41 = vadd.f32 %v3755_v40, %v1480_v36 }
  0x93   : > { %3348 = vmatmul.msk.bf16.gmra.mxu0 %vm1086_vm0, %v3486_v34  ;;  %3381 = vmatmul.msk.bf16.gmra.mxu1 %vm1086_vm0, %v3519_v35  ;;  %v2120_v47 = vmax.f32 %v1481_v41, 0.0  ;;  %v3522_v34 = vld [vmem:[%s3680_s22 + $0x160] sm:$0xff] }
  0x94   : > { %3410 = vmatmul.msk.bf16.gmra.mxu2 %vm1086_vm0, %v3548_v38  ;;  %3443 = vmatmul.msk.bf16.gmra.mxu3 %vm1086_vm0, %v3581_v39 }
  0x97   : > { %v3762_v42 = vpop.f32.mrf.mxu2  ;;  %v3764_v43 = vpop.f32.mrf.mxu3 }
  0x98   : > { %v1482_v44 = vpop.f32.mrf.mxu0  ;;  %v3766_v45 = vpop.f32.mrf.mxu1 }
  0x99   : > { %v1483_v46 = vadd.f32 %v3755_v40, %v1482_v44  ;;  %v3551_v44 = vld [vmem:[%s3680_s22 + $0x248] sm:$0xff] }
  0x9b   : > { %v2121_v48 = vmax.f32 %v1483_v46, 0.0  ;;  %v3584_v46 = vld [vmem:[%s3680_s22 + $0x350] sm:$0xff] }
  0x9d   : > { %v2376_v49 = vadd.f32 %v2121_v48, %v2120_v47 }
  0x9f   : > { %v3769_v50 = vpop.f32.mrf.mxu2  ;;  %v3771_v51 = vpop.f32.mrf.mxu3 }
  0xa0   : > { %v1485_v54 = vpop.f32.mrf.mxu0  ;;  %v3775_v55 = vpop.f32.mrf.mxu1 }
  0xa1   : > { %v1486_v58 = vadd.f32 %v3755_v40, %v1485_v54 }
  0xa3   : > { %v2122_v59 = vmax.f32 %v1486_v58, 0.0  ;;  %3349 = vmatmul.msk.bf16.gmra.mxu0 %vm1086_vm0, %v3487_v52  ;;  %3382 = vmatmul.msk.bf16.gmra.mxu1 %vm1086_vm0, %v3520_v53 }
  0xa4   : > { %3411 = vmatmul.msk.bf16.gmra.mxu2 %vm1086_vm0, %v3549_v56  ;;  %3444 = vmatmul.msk.bf16.gmra.mxu3 %vm1086_vm0, %v3582_v57 }
  0xa5   : > { %v2377_v60 = vadd.f32 %v2376_v49, %v2122_v59 }
  0xa7   : > { %v3784_v61 = vpop.f32.mrf.mxu2  ;;  %v1960_v62 = vpop.f32.mrf.mxu3 }
  0xa8   : > { %v1487_v63 = vpop.f32.mrf.mxu0  ;;  %v3786_v0 = vpop.f32.mrf.mxu1  ;;  %v1961_v3 = vadd.f32 %v3755_v40, %v1960_v62 }
  0xa9   : > { %v1488_v1 = vadd.f32 %v3755_v40, %v1487_v63 }
  0xaa   : > { %v2312_v9 = vmax.f32 %v1961_v3, 0.0 }
  0xab   : > { %v2123_v2 = vmax.f32 %v1488_v1, 0.0 }
  0xad   : > { %v2378_v4 = vadd.f32 %v2377_v60, %v2123_v2 }
  0xaf   : > { %v3790_v5 = vpop.f32.mrf.mxu2  ;;  %v1962_v6 = vpop.f32.mrf.mxu3 }
  0xb0   : > { %v1963_v10 = vadd.f32 %v3755_v40, %v1962_v6  ;;  %v1490_v11 = vpop.f32.mrf.mxu0  ;;  %v3795_v12 = vpop.f32.mrf.mxu1 }
  0xb1   : > { %v1491_v15 = vadd.f32 %v3755_v40, %v1490_v11  ;;  %v3490_v11 = vld [vmem:[%s3680_s22 + $0x60] sm:$0xff] }
  0xb2   : > { %v2313_v16 = vmax.f32 %v1963_v10, 0.0 }
  0xb3   : > { %v2124_v17 = vmax.f32 %v1491_v15, 0.0  ;;  %3350 = vmatmul.msk.bf16.gmra.mxu0 %vm1086_vm0, %v3488_v7  ;;  %3383 = vmatmul.msk.bf16.gmra.mxu1 %vm1086_vm0, %v3521_v8 }
  0xb4   : > { %v2598_v18 = vadd.f32 %v2313_v16, %v2312_v9  ;;  %3412 = vmatmul.msk.bf16.gmra.mxu2 %vm1086_vm0, %v3550_v13  ;;  %3445 = vmatmul.msk.bf16.gmra.mxu3 %vm1086_vm0, %v3583_v14  ;;  %v3523_v13 = vld [vmem:[%s3680_s22 + $0x168] sm:$0xff] }
  0xb5   : > { %v2379_v19 = vadd.f32 %v2378_v4, %v2124_v17 }
  0xb7   : > { %v1800_v20 = vpop.f32.mrf.mxu2  ;;  %v1965_v21 = vpop.f32.mrf.mxu3 }
  0xb8   : > { %v1966_v22 = vadd.f32 %v3755_v40, %v1965_v21  ;;  %v1492_v23 = vpop.f32.mrf.mxu0  ;;  %v3805_v24 = vpop.f32.mrf.mxu1  ;;  %v1801_v28 = vadd.f32 %v3755_v40, %v1800_v20 }
  0xb9   : > { %v1493_v25 = vadd.f32 %v3755_v40, %v1492_v23 }
  0xba   : > { %v2314_v26 = vmax.f32 %v1966_v22, 0.0  ;;  %v2248_v35 = vmax.f32 %v1801_v28, 0.0 }
  0xbb   : > { %v2125_v27 = vmax.f32 %v1493_v25, 0.0 }
  0xbc   : > { %v2599_v29 = vadd.f32 %v2598_v18, %v2314_v26  ;;  %v3552_v18 = vld [vmem:[%s3680_s22 + $0x250] sm:$0xff] }
  0xbd   : > { %v2380_v30 = vadd.f32 %v2379_v19, %v2125_v27  ;;  %v3585_v19 = vld [vmem:[%s3680_s22 + $0x358] sm:$0xff] }
  0xbf   : > { %v1802_v31 = vpop.f32.mrf.mxu2  ;;  %v1967_v32 = vpop.f32.mrf.mxu3 }
  0xc0   : > { %v1803_v36 = vadd.f32 %v3755_v40, %v1802_v31  ;;  %v1968_v38 = vadd.f32 %v3755_v40, %v1967_v32  ;;  %v1495_v39 = vpop.f32.mrf.mxu0  ;;  %v3813_v41 = vpop.f32.mrf.mxu1 }
  0xc1   : > { %v1496_v47 = vadd.f32 %v3755_v40, %v1495_v39 }
  0xc2   : > { %v2249_v48 = vmax.f32 %v1803_v36, 0.0  ;;  %v2315_v49 = vmax.f32 %v1968_v38, 0.0 }
  0xc3   : > { %v2126_v52 = vmax.f32 %v1496_v47, 0.0  ;;  %3351 = vmatmul.msk.bf16.gmra.mxu0 %vm1086_vm0, %v3489_v33  ;;  %3384 = vmatmul.msk.bf16.gmra.mxu1 %vm1086_vm0, %v3522_v34 }
  0xc4   : > { %v2524_v53 = vadd.f32 %v2249_v48, %v2248_v35  ;;  %v2600_v54 = vadd.f32 %v2599_v29, %v2315_v49  ;;  %3413 = vmatmul.msk.bf16.gmra.mxu2 %vm1086_vm0, %v3551_v44  ;;  %3446 = vmatmul.msk.bf16.gmra.mxu3 %vm1086_vm0, %v3584_v46  ;;  %v3491_v49 = vld [vmem:[%s3680_s22 + $0x68] sm:$0xff] }
  0xc5   : > { %v2381_v56 = vadd.f32 %v2380_v30, %v2126_v52  ;;  %v3524_v52 = vld [vmem:[%s3680_s22 + $0x170] sm:$0xff] }
  0xc7   : > { %v1805_v57 = vpop.f32.mrf.mxu2  ;;  %v1970_v58 = vpop.f32.mrf.mxu3 }
  0xc8   : > { %v1806_v59 = vadd.f32 %v3755_v40, %v1805_v57  ;;  %v1971_v60 = vadd.f32 %v3755_v40, %v1970_v58  ;;  %v1497_v62 = vpop.f32.mrf.mxu0  ;;  %v3824_v63 = vpop.f32.mrf.mxu1  ;;  %v3553_v58 = vld [vmem:[%s3680_s22 + $0x258] sm:$0xff] }
  0xc9   : > { %v1498_v1 = vadd.f32 %v3755_v40, %v1497_v62 }
  0xca   : > { %v2250_v2 = vmax.f32 %v1806_v59, 0.0  ;;  %v2316_v3 = vmax.f32 %v1971_v60, 0.0  ;;  %v3586_v59 = vld [vmem:[%s3680_s22 + $0x360] sm:$0xff] }
  0xcb   : > { %v2127_v4 = vmax.f32 %v1498_v1, 0.0 }
  0xcc   : > { %v2525_v6 = vadd.f32 %v2524_v53, %v2250_v2  ;;  %v2601_v7 = vadd.f32 %v2600_v54, %v2316_v3 }
  0xcd   : > { %v2382_v8 = vadd.f32 %v2381_v56, %v2127_v4 }
  0xcf   : > { %v1807_v9 = vpop.f32.mrf.mxu2  ;;  %v1972_v10 = vpop.f32.mrf.mxu3 }
  0xd0   : > { %v1808_v14 = vadd.f32 %v3755_v40, %v1807_v9  ;;  %v1973_v15 = vadd.f32 %v3755_v40, %v1972_v10  ;;  %v1500_v16 = vpop.f32.mrf.mxu0  ;;  %v3831_v17 = vpop.f32.mrf.mxu1 }
  0xd1   : > { %v1501_v20 = vadd.f32 %v3755_v40, %v1500_v16 }
  0xd2   : > { %v2251_v21 = vmax.f32 %v1808_v14, 0.0  ;;  %v2317_v22 = vmax.f32 %v1973_v15, 0.0 }
  0xd3   : > { %v2128_v23 = vmax.f32 %v1501_v20, 0.0  ;;  %3352 = vmatmul.msk.bf16.gmra.mxu0 %vm1086_vm0, %v3490_v11  ;;  %3385 = vmatmul.msk.bf16.gmra.mxu1 %vm1086_vm0, %v3523_v13 }
  0xd4   : > { %v2526_v25 = vadd.f32 %v2525_v6, %v2251_v21  ;;  %v2602_v26 = vadd.f32 %v2601_v7, %v2317_v22  ;;  %3414 = vmatmul.msk.bf16.gmra.mxu2 %vm1086_vm0, %v3552_v18  ;;  %3447 = vmatmul.msk.bf16.gmra.mxu3 %vm1086_vm0, %v3585_v19 }
  0xd5   : > { %v2383_v27 = vadd.f32 %v2382_v8, %v2128_v23 }
  0xd7   : > { %v1810_v28 = vpop.f32.mrf.mxu2  ;;  %v1975_v29 = vpop.f32.mrf.mxu3 }
  0xd8   : > { %v1811_v30 = vadd.f32 %v3755_v40, %v1810_v28  ;;  %v1976_v31 = vadd.f32 %v3755_v40, %v1975_v29  ;;  %v1502_v32 = vpop.f32.mrf.mxu0  ;;  %v3842_v33 = vpop.f32.mrf.mxu1 }
  0xd9   : > { %v1503_v34 = vadd.f32 %v3755_v40, %v1502_v32  ;;  %v3587_v32 = vld [vmem:[%s3680_s22 + $0x368] sm:$0xff] }
  0xda   : > { %v2252_v35 = vmax.f32 %v1811_v30, 0.0  ;;  %v2318_v36 = vmax.f32 %v1976_v31, 0.0  ;;  %v3554_v31 = vld [vmem:[%s3680_s22 + $0x260] sm:$0xff] }
  0xdb   : > { %v2129_v38 = vmax.f32 %v1503_v34, 0.0 }
  0xdc   : > { %v2527_v39 = vadd.f32 %v2526_v25, %v2252_v35  ;;  %v2603_v44 = vadd.f32 %v2602_v26, %v2318_v36  ;;  %v3492_v25 = vld [vmem:[%s3680_s22 + $0x70] sm:$0xff]  ;;  %v3525_v26 = vld [vmem:[%s3680_s22 + $0x178] sm:$0xff] }
  0xdd   : > { %v2384_v46 = vadd.f32 %v2383_v27, %v2129_v38 }
  0xdf   : > { %v1812_v47 = vpop.f32.mrf.mxu2  ;;  %v1977_v48 = vpop.f32.mrf.mxu3 }
  0xe0   : > { %v1813_v53 = vadd.f32 %v3755_v40, %v1812_v47  ;;  %v1978_v54 = vadd.f32 %v3755_v40, %v1977_v48  ;;  %v1505_v56 = vpop.f32.mrf.mxu0  ;;  %v3849_v57 = vpop.f32.mrf.mxu1 }
  0xe1   : > { %v1506_v60 = vadd.f32 %v3755_v40, %v1505_v56 }
  0xe2   : > { %v2253_v62 = vmax.f32 %v1813_v53, 0.0  ;;  %v2319_v1 = vmax.f32 %v1978_v54, 0.0 }
  0xe3   : > { %v2130_v2 = vmax.f32 %v1506_v60, 0.0  ;;  %3353 = vmatmul.msk.bf16.gmra.mxu0 %vm1086_vm0, %v3491_v49  ;;  %3386 = vmatmul.msk.bf16.gmra.mxu1 %vm1086_vm0, %v3524_v52 }
  0xe4   : > { %v2528_v3 = vadd.f32 %v2527_v39, %v2253_v62  ;;  %v2604_v4 = vadd.f32 %v2603_v44, %v2319_v1  ;;  %3415 = vmatmul.msk.bf16.gmra.mxu2 %vm1086_vm0, %v3553_v58  ;;  %3448 = vmatmul.msk.bf16.gmra.mxu3 %vm1086_vm0, %v3586_v59 }
  0xe5   : > { %v2385_v6 = vadd.f32 %v2384_v46, %v2130_v2 }
  0xe7   : > { %v1815_v7 = vpop.f32.mrf.mxu2  ;;  %v1980_v8 = vpop.f32.mrf.mxu3 }
  0xe8   : > { %v1816_v9 = vadd.f32 %v3755_v40, %v1815_v7  ;;  %v1981_v10 = vadd.f32 %v3755_v40, %v1980_v8  ;;  %v1507_v11 = vpop.f32.mrf.mxu0  ;;  %v3860_v13 = vpop.f32.mrf.mxu1  ;;  %v3526_v7 = vld [vmem:[%s3680_s22 + $0x180] sm:$0xff] }
  0xe9   : > { %v1508_v14 = vadd.f32 %v3755_v40, %v1507_v11 }
  0xea   : > { %v2254_v15 = vmax.f32 %v1816_v9, 0.0  ;;  %v2320_v16 = vmax.f32 %v1981_v10, 0.0 }
  0xeb   : > { %v2131_v18 = vmax.f32 %v1508_v14, 0.0  ;;  %v3555_v14 = vld [vmem:[%s3680_s22 + $0x268] sm:$0xff] }
  0xec   : > { %v2529_v19 = vadd.f32 %v2528_v3, %v2254_v15  ;;  %v2605_v20 = vadd.f32 %v2604_v4, %v2320_v16  ;;  %v3588_v15 = vld [vmem:[%s3680_s22 + $0x370] sm:$0xff] }
  0xed   : > { %v2386_v21 = vadd.f32 %v2385_v6, %v2131_v18  ;;  %v3493_v6 = vld [vmem:[%s3680_s22 + $0x78] sm:$0xff] }
  0xef   : > { %v1817_v22 = vpop.f32.mrf.mxu2  ;;  %v1982_v23 = vpop.f32.mrf.mxu3 }
  0xf0   : > { %v1818_v27 = vadd.f32 %v3755_v40, %v1817_v22  ;;  %v1983_v28 = vadd.f32 %v3755_v40, %v1982_v23  ;;  %v1510_v29 = vpop.f32.mrf.mxu0  ;;  %v3867_v30 = vpop.f32.mrf.mxu1 }
  0xf1   : > { %v1511_v34 = vadd.f32 %v3755_v40, %v1510_v29 }
  0xf2   : > { %v2255_v35 = vmax.f32 %v1818_v27, 0.0  ;;  %v2321_v36 = vmax.f32 %v1983_v28, 0.0 }
  0xf3   : > { %v2132_v38 = vmax.f32 %v1511_v34, 0.0  ;;  %3354 = vmatmul.msk.bf16.gmra.mxu0 %vm1086_vm0, %v3492_v25  ;;  %3387 = vmatmul.msk.bf16.gmra.mxu1 %vm1086_vm0, %v3525_v26  ;;  %v3609_v25 = vld [vmem:[%s4420_s1 + $0x18] sm:$0xff] }
  0xf4   : > { %v2530_v39 = vadd.f32 %v2529_v19, %v2255_v35  ;;  %v2606_v44 = vadd.f32 %v2605_v20, %v2321_v36  ;;  %3416 = vmatmul.msk.bf16.gmra.mxu2 %vm1086_vm0, %v3554_v31  ;;  %3449 = vmatmul.msk.bf16.gmra.mxu3 %vm1086_vm0, %v3587_v32 }
  0xf5   : > { %v2387_v46 = vadd.f32 %v2386_v21, %v2132_v38  ;;  %2751 = vmatpush.bf16.xpose.msrb.mxu1 %v3609_v25 }
  0xf7   : > { %v1820_v47 = vpop.f32.mrf.mxu2  ;;  %v1985_v48 = vpop.f32.mrf.mxu3 }
  0xf8   : > { %v1821_v49 = vadd.f32 %v3755_v40, %v1820_v47  ;;  %v1986_v52 = vadd.f32 %v3755_v40, %v1985_v48  ;;  %v1512_v53 = vpop.f32.mrf.mxu0  ;;  %v3878_v54 = vpop.f32.mrf.mxu1 }
  0xf9   : > { %v1513_v56 = vadd.f32 %v3755_v40, %v1512_v53 }
  0xfa   : > { %v2256_v58 = vmax.f32 %v1821_v49, 0.0  ;;  %v2322_v59 = vmax.f32 %v1986_v52, 0.0  ;;  %v3494_v49 = vld [vmem:[%s3680_s22 + $0x80] sm:$0xff]  ;;  %v3527_v52 = vld [vmem:[%s3680_s22 + $0x188] sm:$0xff] }
  0xfb   : > { %v2133_v60 = vmax.f32 %v1513_v56, 0.0 }
  0xfc   : > { %v2531_v62 = vadd.f32 %v2530_v39, %v2256_v58  ;;  %v2607_v1 = vadd.f32 %v2606_v44, %v2322_v59 }
  0xfd   : > { %v2388_v2 = vadd.f32 %v2387_v46, %v2133_v60  ;;  %v3556_v60 = vld [vmem:[%s3680_s22 + $0x270] sm:$0xff] }
  0xff   : > { %v1822_v3 = vpop.f32.mrf.mxu2  ;;  %v1987_v4 = vpop.f32.mrf.mxu3 }
 0x100   : > { %v1823_v8 = vadd.f32 %v3755_v40, %v1822_v3  ;;  %v1988_v9 = vadd.f32 %v3755_v40, %v1987_v4  ;;  %v1515_v10 = vpop.f32.mrf.mxu0  ;;  %v3885_v11 = vpop.f32.mrf.mxu1 }
 0x101   : > { %v1516_v16 = vadd.f32 %v3755_v40, %v1515_v10 }
 0x102   : > { %v2257_v18 = vmax.f32 %v1823_v8, 0.0  ;;  %v2323_v19 = vmax.f32 %v1988_v9, 0.0 }
 0x103   : > { %v2134_v20 = vmax.f32 %v1516_v16, 0.0  ;;  %3355 = vmatmul.msk.bf16.gmra.mxu0 %vm1086_vm0, %v3493_v6  ;;  %3388 = vmatmul.msk.bf16.gmra.mxu1 %vm1086_vm0, %v3526_v7 }
 0x104   : > { %v2532_v21 = vadd.f32 %v2531_v62, %v2257_v18  ;;  %v2608_v22 = vadd.f32 %v2607_v1, %v2323_v19  ;;  %3417 = vmatmul.msk.bf16.gmra.mxu2 %vm1086_vm0, %v3555_v14  ;;  %3450 = vmatmul.msk.bf16.gmra.mxu3 %vm1086_vm0, %v3588_v15  ;;  %v3589_v62 = vld [vmem:[%s3680_s22 + $0x378] sm:$0xff] }
 0x105   : > { %v2389_v23 = vadd.f32 %v2388_v2, %v2134_v20 }
 0x107   : > { %v1825_v26 = vpop.f32.mrf.mxu2  ;;  %v1990_v27 = vpop.f32.mrf.mxu3 }
 0x108   : > { %v1826_v28 = vadd.f32 %v3755_v40, %v1825_v26  ;;  %v1991_v29 = vadd.f32 %v3755_v40, %v1990_v27  ;;  %v1517_v31 = vpop.f32.mrf.mxu0  ;;  %v3899_v32 = vpop.f32.mrf.mxu1 }
 0x109   : > { %v1518_v34 = vadd.f32 %v3755_v40, %v1517_v31  ;;  %v3528_v31 = vld [vmem:[%s3680_s22 + $0x190] sm:$0xff] }
 0x10a   : > { %v2258_v35 = vmax.f32 %v1826_v28, 0.0  ;;  %v2324_v36 = vmax.f32 %v1991_v29, 0.0  ;;  %v3495_v29 = vld [vmem:[%s3680_s22 + $0x88] sm:$0xff] }
 0x10b   : > { %v2135_v38 = vmax.f32 %v1518_v34, 0.0 }
 0x10c   : > { %v2533_v39 = vadd.f32 %v2532_v21, %v2258_v35  ;;  %v2609_v44 = vadd.f32 %v2608_v22, %v2324_v36 }
 0x10d   : > { %v2390_v46 = vadd.f32 %v2389_v23, %v2135_v38 }
 0x10f   : > { %v1827_v47 = vpop.f32.mrf.mxu2  ;;  %v1992_v48 = vpop.f32.mrf.mxu3 }
 0x110   : > { %v1828_v53 = vadd.f32 %v3755_v40, %v1827_v47  ;;  %v1993_v56 = vadd.f32 %v3755_v40, %v1992_v48  ;;  %v1520_v58 = vpop.f32.mrf.mxu0  ;;  %v3906_v59 = vpop.f32.mrf.mxu1 }
 0x111   : > { %v1521_v1 = vadd.f32 %v3755_v40, %v1520_v58 }
 0x112   : > { %v2259_v2 = vmax.f32 %v1828_v53, 0.0  ;;  %v2325_v3 = vmax.f32 %v1993_v56, 0.0 }
 0x113   : > { %v2136_v4 = vmax.f32 %v1521_v1, 0.0  ;;  %3356 = vmatmul.msk.bf16.gmra.mxu0 %vm1086_vm0, %v3494_v49  ;;  %3389 = vmatmul.msk.bf16.gmra.mxu1 %vm1086_vm0, %v3527_v52 }
 0x114   : > { %v2534_v6 = vadd.f32 %v2533_v39, %v2259_v2  ;;  %v2610_v7 = vadd.f32 %v2609_v44, %v2325_v3  ;;  %3418 = vmatmul.msk.bf16.gmra.mxu2 %vm1086_vm0, %v3556_v60  ;;  %3451 = vmatmul.msk.bf16.gmra.mxu3 %vm1086_vm0, %v3589_v62  ;;  %v3557_v39 = vld [vmem:[%s3680_s22 + $0x278] sm:$0xff]  ;;  %v3590_v44 = vld [vmem:[%s3680_s22 + $0x380] sm:$0xff] }
 0x115   : > { %v2391_v8 = vadd.f32 %v2390_v46, %v2136_v4 }
 0x117   : > { %v1830_v9 = vpop.f32.mrf.mxu2  ;;  %v1995_v10 = vpop.f32.mrf.mxu3 }
 0x118   : > { %v1831_v14 = vadd.f32 %v3755_v40, %v1830_v9  ;;  %v1996_v15 = vadd.f32 %v3755_v40, %v1995_v10  ;;  %v1522_v16 = vpop.f32.mrf.mxu0  ;;  %v3917_v18 = vpop.f32.mrf.mxu1 }
 0x119   : > { %v1523_v19 = vadd.f32 %v3755_v40, %v1522_v16 }
 0x11a   : > { %v2260_v20 = vmax.f32 %v1831_v14, 0.0  ;;  %v2326_v21 = vmax.f32 %v1996_v15, 0.0 }
 0x11b   : > { %v2137_v22 = vmax.f32 %v1523_v19, 0.0  ;;  %v3496_v19 = vld [vmem:[%s3680_s22 + $0x90] sm:$0xff] }
 0x11c   : > { %v2535_v23 = vadd.f32 %v2534_v6, %v2260_v20  ;;  %v2611_v25 = vadd.f32 %v2610_v7, %v2326_v21  ;;  %v3529_v20 = vld [vmem:[%s3680_s22 + $0x198] sm:$0xff] }
 0x11d   : > { %v2392_v26 = vadd.f32 %v2391_v8, %v2137_v22 }
 0x11f   : > { %v1832_v27 = vpop.f32.mrf.mxu2  ;;  %v1997_v28 = vpop.f32.mrf.mxu3 }
 0x120   : > { %v1833_v34 = vadd.f32 %v3755_v40, %v1832_v27  ;;  %v1998_v35 = vadd.f32 %v3755_v40, %v1997_v28  ;;  %v1525_v36 = vpop.f32.mrf.mxu0  ;;  %v3924_v38 = vpop.f32.mrf.mxu1  ;;  %v3591_v27 = vld [vmem:[%s3680_s22 + $0x388] sm:$0xff] }
 0x121   : > { %v1526_v46 = vadd.f32 %v3755_v40, %v1525_v36 }
 0x122   : > { %v2261_v47 = vmax.f32 %v1833_v34, 0.0  ;;  %v2327_v48 = vmax.f32 %v1998_v35, 0.0 }
 0x123   : > { %v2138_v49 = vmax.f32 %v1526_v46, 0.0  ;;  %3357 = vmatmul.msk.bf16.gmra.mxu0 %vm1086_vm0, %v3495_v29  ;;  %3390 = vmatmul.msk.bf16.gmra.mxu1 %vm1086_vm0, %v3528_v31 }
 0x124   : > { %v2536_v52 = vadd.f32 %v2535_v23, %v2261_v47  ;;  %v2612_v53 = vadd.f32 %v2611_v25, %v2327_v48  ;;  %3419 = vmatmul.msk.bf16.gmra.mxu2 %vm1086_vm0, %v3557_v39  ;;  %3452 = vmatmul.msk.bf16.gmra.mxu3 %vm1086_vm0, %v3590_v44 }
 0x125   : > { %v2393_v56 = vadd.f32 %v2392_v26, %v2138_v49  ;;  %v3558_v26 = vld [vmem:[%s3680_s22 + $0x280] sm:$0xff] }
 0x127   : > { %v1835_v58 = vpop.f32.mrf.mxu2  ;;  %v2000_v60 = vpop.f32.mrf.mxu3 }
 0x128   : > { %v1836_v62 = vadd.f32 %v3755_v40, %v1835_v58  ;;  %v2001_v1 = vadd.f32 %v3755_v40, %v2000_v60  ;;  %v1527_v2 = vpop.f32.mrf.mxu0  ;;  %v3935_v3 = vpop.f32.mrf.mxu1 }
 0x129   : > { %v1528_v4 = vadd.f32 %v3755_v40, %v1527_v2 }
 0x12a   : > { %v2262_v6 = vmax.f32 %v1836_v62, 0.0  ;;  %v2328_v7 = vmax.f32 %v2001_v1, 0.0 }
 0x12b   : > { %v2139_v8 = vmax.f32 %v1528_v4, 0.0 }
 0x12c   : > { %v2537_v9 = vadd.f32 %v2536_v52, %v2262_v6  ;;  %v2613_v10 = vadd.f32 %v2612_v53, %v2328_v7  ;;  %v3497_v7 = vld [vmem:[%s3680_s22 + $0x98] sm:$0xff] }
 0x12d   : > { %v2394_v14 = vadd.f32 %v2393_v56, %v2139_v8  ;;  %v3530_v8 = vld [vmem:[%s3680_s22 + $0x1a0] sm:$0xff] }
 0x12f   : > { %v1837_v15 = vpop.f32.mrf.mxu2  ;;  %v2002_v16 = vpop.f32.mrf.mxu3 }
 0x130   : > { %v1838_v21 = vadd.f32 %v3755_v40, %v1837_v15  ;;  %v2003_v22 = vadd.f32 %v3755_v40, %v2002_v16  ;;  %v1530_v23 = vpop.f32.mrf.mxu0  ;;  %v3942_v25 = vpop.f32.mrf.mxu1  ;;  %v3559_v16 = vld [vmem:[%s3680_s22 + $0x288] sm:$0xff] }
 0x131   : > { %v1531_v28 = vadd.f32 %v3755_v40, %v1530_v23 }
 0x132   : > { %v2263_v29 = vmax.f32 %v1838_v21, 0.0  ;;  %v2329_v31 = vmax.f32 %v2003_v22, 0.0 }
 0x133   : > { %v2140_v34 = vmax.f32 %v1531_v28, 0.0  ;;  %3358 = vmatmul.msk.bf16.gmra.mxu0 %vm1086_vm0, %v3496_v19  ;;  %3391 = vmatmul.msk.bf16.gmra.mxu1 %vm1086_vm0, %v3529_v20  ;;  %v3592_v19 = vld [vmem:[%s3680_s22 + $0x390] sm:$0xff] }
 0x134   : > { %v2538_v35 = vadd.f32 %v2537_v9, %v2263_v29  ;;  %v2614_v36 = vadd.f32 %v2613_v10, %v2329_v31  ;;  %3420 = vmatmul.msk.bf16.gmra.mxu2 %vm1086_vm0, %v3558_v26  ;;  %3453 = vmatmul.msk.bf16.gmra.mxu3 %vm1086_vm0, %v3591_v27 }
 0x135   : > { %v2395_v39 = vadd.f32 %v2394_v14, %v2140_v34 }
 0x137   : > { %v1840_v44 = vpop.f32.mrf.mxu2  ;;  %v2005_v46 = vpop.f32.mrf.mxu3 }
 0x138   : > { %v1841_v47 = vadd.f32 %v3755_v40, %v1840_v44  ;;  %v2006_v48 = vadd.f32 %v3755_v40, %v2005_v46  ;;  %v1532_v49 = vpop.f32.mrf.mxu0  ;;  %v3953_v52 = vpop.f32.mrf.mxu1 }
 0x139   : > { %v1533_v53 = vadd.f32 %v3755_v40, %v1532_v49 }
 0x13a   : > { %v2264_v56 = vmax.f32 %v1841_v47, 0.0  ;;  %v2330_v58 = vmax.f32 %v2006_v48, 0.0 }
 0x13b   : > { %v2141_v60 = vmax.f32 %v1533_v53, 0.0 }
 0x13c   : > { %v2539_v62 = vadd.f32 %v2538_v35, %v2264_v56  ;;  %v2615_v1 = vadd.f32 %v2614_v36, %v2330_v58 }
 0x13d   : > { %v2396_v2 = vadd.f32 %v2395_v39, %v2141_v60 }
 0x13f   : > { %v1842_v4 = vpop.f32.mrf.mxu2  ;;  %v2007_v6 = vpop.f32.mrf.mxu3 }
 0x140   : > { %v1843_v9 = vadd.f32 %v3755_v40, %v1842_v4  ;;  %v2008_v10 = vadd.f32 %v3755_v40, %v2007_v6  ;;  %v1535_v14 = vpop.f32.mrf.mxu0  ;;  %v3960_v15 = vpop.f32.mrf.mxu1 }
 0x141   : > { %v1536_v20 = vadd.f32 %v3755_v40, %v1535_v14 }
 0x142   : > { %v2265_v21 = vmax.f32 %v1843_v9, 0.0  ;;  %v2331_v22 = vmax.f32 %v2008_v10, 0.0  ;;  %v3593_v9 = vld [vmem:[%s3680_s22 + $0x398] sm:$0xff] }
 0x143   : > { %v2142_v23 = vmax.f32 %v1536_v20, 0.0  ;;  %3359 = vmatmul.msk.bf16.gmra.mxu0 %vm1086_vm0, %v3497_v7  ;;  %3392 = vmatmul.msk.bf16.gmra.mxu1 %vm1086_vm0, %v3530_v8  ;;  %v3560_v8 = vld [vmem:[%s3680_s22 + $0x290] sm:$0xff] }
 0x144   : > { %v2540_v26 = vadd.f32 %v2539_v62, %v2265_v21  ;;  %v2616_v27 = vadd.f32 %v2615_v1, %v2331_v22  ;;  %3421 = vmatmul.msk.bf16.gmra.mxu2 %vm1086_vm0, %v3559_v16  ;;  %3454 = vmatmul.msk.bf16.gmra.mxu3 %vm1086_vm0, %v3592_v19  ;;  %v3498_v62 = vld [vmem:[%s3680_s22 + $0xa0] sm:$0xff]  ;;  %v3531_v1 = vld [vmem:[%s3680_s22 + $0x1a8] sm:$0xff] }
 0x145   : > { %v2397_v28 = vadd.f32 %v2396_v2, %v2142_v23 }
 0x147   : > { %v1845_v29 = vpop.f32.mrf.mxu2  ;;  %v2010_v31 = vpop.f32.mrf.mxu3 }
 0x148   : > { %v1846_v34 = vadd.f32 %v3755_v40, %v1845_v29  ;;  %v2011_v35 = vadd.f32 %v3755_v40, %v2010_v31  ;;  %v1537_v36 = vpop.f32.mrf.mxu0  ;;  %v3971_v39 = vpop.f32.mrf.mxu1 }
 0x149   : > { %4426 = vst [vmem:[#allocation2_spill] sm:$0xff] %v3971_v39  ;;  %v1538_v44 = vadd.f32 %v3755_v40, %v1537_v36 }
 0x14a   : > { %v2266_v46 = vmax.f32 %v1846_v34, 0.0  ;;  %v2332_v47 = vmax.f32 %v2011_v35, 0.0 }
 0x14b   : > { %v2143_v48 = vmax.f32 %v1538_v44, 0.0 }
 0x14c   : > { %v2541_v49 = vadd.f32 %v2540_v26, %v2266_v46  ;;  %v2617_v53 = vadd.f32 %v2616_v27, %v2332_v47 }
 0x14d   : > { %v2398_v56 = vadd.f32 %v2397_v28, %v2143_v48 }
 0x14f   : > { %v1847_v58 = vpop.f32.mrf.mxu2  ;;  %v2012_v60 = vpop.f32.mrf.mxu3 }
 0x150   : > { %v1848_v2 = vadd.f32 %v3755_v40, %v1847_v58  ;;  %v2013_v4 = vadd.f32 %v3755_v40, %v2012_v60  ;;  %v1540_v6 = vpop.f32.mrf.mxu0  ;;  %v3978_v7 = vpop.f32.mrf.mxu1  ;;  %v3532_v58 = vld [vmem:[%s3680_s22 + $0x1b0] sm:$0xff] }
 0x151   : > { %4427 = vst [vmem:[#allocation3_spill] sm:$0xff] %v3978_v7  ;;  %v1541_v10 = vadd.f32 %v3755_v40, %v1540_v6  ;;  %v3594_v6 = vld [vmem:[%s3680_s22 + $0x3a0] sm:$0xff] }
 0x152   : > { %v2267_v14 = vmax.f32 %v1848_v2, 0.0  ;;  %v2333_v16 = vmax.f32 %v2013_v4, 0.0  ;;  %v3561_v4 = vld [vmem:[%s3680_s22 + $0x298] sm:$0xff] }
 0x153   : > { %v2144_v19 = vmax.f32 %v1541_v10, 0.0  ;;  %3360 = vmatmul.msk.bf16.gmra.mxu0 %vm1086_vm0, %v3498_v62  ;;  %3393 = vmatmul.msk.bf16.gmra.mxu1 %vm1086_vm0, %v3531_v1 }
 0x154   : > { %v2542_v20 = vadd.f32 %v2541_v49, %v2267_v14  ;;  %v2618_v21 = vadd.f32 %v2617_v53, %v2333_v16  ;;  %3422 = vmatmul.msk.bf16.gmra.mxu2 %vm1086_vm0, %v3560_v8  ;;  %3455 = vmatmul.msk.bf16.gmra.mxu3 %vm1086_vm0, %v3593_v9 }
 0x155   : > { %v2399_v22 = vadd.f32 %v2398_v56, %v2144_v19  ;;  %v3499_v56 = vld [vmem:[%s3680_s22 + $0xa8] sm:$0xff] }
 0x157   : > { %v1850_v23 = vpop.f32.mrf.mxu2  ;;  %v2015_v26 = vpop.f32.mrf.mxu3 }
 0x158   : > { %v1851_v27 = vadd.f32 %v3755_v40, %v1850_v23  ;;  %v2016_v28 = vadd.f32 %v3755_v40, %v2015_v26  ;;  %v1542_v29 = vpop.f32.mrf.mxu0  ;;  %v3989_v31 = vpop.f32.mrf.mxu1 }
 0x159   : > { %4428 = vst [vmem:[#allocation4_spill] sm:$0xff] %v3989_v31  ;;  %v1543_v34 = vadd.f32 %v3755_v40, %v1542_v29 }
 0x15a   : > { %v2268_v35 = vmax.f32 %v1851_v27, 0.0  ;;  %v2334_v36 = vmax.f32 %v2016_v28, 0.0 }
 0x15b   : > { %v2145_v44 = vmax.f32 %v1543_v34, 0.0 }
 0x15c   : > { %v2543_v46 = vadd.f32 %v2542_v20, %v2268_v35  ;;  %v2619_v47 = vadd.f32 %v2618_v21, %v2334_v36 }
 0x15d   : > { %v2400_v48 = vadd.f32 %v2399_v22, %v2145_v44 }
 0x15f   : > { %v1852_v49 = vpop.f32.mrf.mxu2  ;;  %v2017_v53 = vpop.f32.mrf.mxu3 }
 0x160   : > { %v1853_v60 = vadd.f32 %v3755_v40, %v1852_v49  ;;  %v2018_v62 = vadd.f32 %v3755_v40, %v2017_v53  ;;  %v1545_v1 = vpop.f32.mrf.mxu0  ;;  %v3996_v2 = vpop.f32.mrf.mxu1  ;;  %v3500_v53 = vld [vmem:[%s3680_s22 + $0xb0] sm:$0xff] }
 0x161   : > { %4429 = vst [vmem:[#allocation5_spill] sm:$0xff] %v3996_v2  ;;  %v1546_v8 = vadd.f32 %v3755_v40, %v1545_v1 }
 0x162   : > { %v2269_v9 = vmax.f32 %v1853_v60, 0.0  ;;  %v2335_v10 = vmax.f32 %v2018_v62, 0.0 }
 0x163   : > { %v2146_v14 = vmax.f32 %v1546_v8, 0.0  ;;  %3361 = vmatmul.msk.bf16.gmra.mxu0 %vm1086_vm0, %v3499_v56  ;;  %3394 = vmatmul.msk.bf16.gmra.mxu1 %vm1086_vm0, %v3532_v58  ;;  %v3533_v56 = vld [vmem:[%s3680_s22 + $0x1b8] sm:$0xff] }
 0x164   : > { %v2544_v16 = vadd.f32 %v2543_v46, %v2269_v9  ;;  %v2620_v19 = vadd.f32 %v2619_v47, %v2335_v10  ;;  %3423 = vmatmul.msk.bf16.gmra.mxu2 %vm1086_vm0, %v3561_v4  ;;  %3456 = vmatmul.msk.bf16.gmra.mxu3 %vm1086_vm0, %v3594_v6  ;;  %v3562_v4 = vld [vmem:[%s3680_s22 + $0x2a0] sm:$0xff]  ;;  %v3595_v6 = vld [vmem:[%s3680_s22 + $0x3a8] sm:$0xff] }
 0x165   : > { %v2401_v20 = vadd.f32 %v2400_v48, %v2146_v14 }
 0x167   : > { %v1855_v21 = vpop.f32.mrf.mxu2  ;;  %v2020_v22 = vpop.f32.mrf.mxu3 }
 0x168   : > { %v1856_v23 = vadd.f32 %v3755_v40, %v1855_v21  ;;  %v2021_v26 = vadd.f32 %v3755_v40, %v2020_v22  ;;  %v1547_v27 = vpop.f32.mrf.mxu0  ;;  %v4007_v28 = vpop.f32.mrf.mxu1 }
 0x169   : > { %4430 = vst [vmem:[#allocation6_spill] sm:$0xff] %v4007_v28  ;;  %v1548_v29 = vadd.f32 %v3755_v40, %v1547_v27 }
 0x16a   : > { %v2270_v34 = vmax.f32 %v1856_v23, 0.0  ;;  %v2336_v35 = vmax.f32 %v2021_v26, 0.0 }
 0x16b   : > { %v2147_v36 = vmax.f32 %v1548_v29, 0.0 }
 0x16c   : > { %v2545_v44 = vadd.f32 %v2544_v16, %v2270_v34  ;;  %v2621_v46 = vadd.f32 %v2620_v19, %v2336_v35 }
 0x16d   : > { %v2402_v47 = vadd.f32 %v2401_v20, %v2147_v36 }
 0x16f   : > { %v1857_v48 = vpop.f32.mrf.mxu2  ;;  %v2022_v49 = vpop.f32.mrf.mxu3 }
 0x170   : > { %v1858_v58 = vadd.f32 %v3755_v40, %v1857_v48  ;;  %v2023_v60 = vadd.f32 %v3755_v40, %v2022_v49  ;;  %v1550_v62 = vpop.f32.mrf.mxu0  ;;  %v4014_v1 = vpop.f32.mrf.mxu1 }
 0x171   : > { %4431 = vst [vmem:[#allocation7_spill] sm:$0xff] %v4014_v1  ;;  %v1551_v8 = vadd.f32 %v3755_v40, %v1550_v62 }
 0x172   : > { %v2271_v9 = vmax.f32 %v1858_v58, 0.0  ;;  %v2337_v10 = vmax.f32 %v2023_v60, 0.0  ;;  %v3534_v58 = vld [vmem:[%s3680_s22 + $0x1c0] sm:$0xff] }
 0x173   : > { %v2148_v14 = vmax.f32 %v1551_v8, 0.0  ;;  %3362 = vmatmul.msk.bf16.gmra.mxu0 %vm1086_vm0, %v3500_v53  ;;  %3395 = vmatmul.msk.bf16.gmra.mxu1 %vm1086_vm0, %v3533_v56  ;;  %v3501_v56 = vld [vmem:[%s3680_s22 + $0xb8] sm:$0xff]  ;;  %v3563_v8 = vld [vmem:[%s3680_s22 + $0x2a8] sm:$0xff] }
 0x174   : > { %v2546_v16 = vadd.f32 %v2545_v44, %v2271_v9  ;;  %v2622_v19 = vadd.f32 %v2621_v46, %v2337_v10  ;;  %3424 = vmatmul.msk.bf16.gmra.mxu2 %vm1086_vm0, %v3562_v4  ;;  %3457 = vmatmul.msk.bf16.gmra.mxu3 %vm1086_vm0, %v3595_v6  ;;  %v3596_v9 = vld [vmem:[%s3680_s22 + $0x3b0] sm:$0xff] }
 0x175   : > { %v2403_v20 = vadd.f32 %v2402_v47, %v2148_v14 }
 0x177   : > { %v1860_v21 = vpop.f32.mrf.mxu2  ;;  %v2025_v22 = vpop.f32.mrf.mxu3 }
 0x178   : > { %v1861_v23 = vadd.f32 %v3755_v40, %v1860_v21  ;;  %v2026_v26 = vadd.f32 %v3755_v40, %v2025_v22  ;;  %v1552_v27 = vpop.f32.mrf.mxu0  ;;  %v4025_v29 = vpop.f32.mrf.mxu1 }
 0x179   : > { %4432 = vst [vmem:[#allocation8_spill] sm:$0xff] %v4025_v29  ;;  %v1553_v34 = vadd.f32 %v3755_v40, %v1552_v27  ;;  %v3601_v29 = vld [vmem:[%s3680_s22 + $0x3d8] sm:$0xff] }
 0x17a   : > { %v2272_v35 = vmax.f32 %v1861_v23, 0.0  ;;  %v2338_v36 = vmax.f32 %v2026_v26, 0.0 }
 0x17b   : > { %v2149_v44 = vmax.f32 %v1553_v34, 0.0 }
 0x17c   : > { %v2547_v46 = vadd.f32 %v2546_v16, %v2272_v35  ;;  %v2623_v47 = vadd.f32 %v2622_v19, %v2338_v36 }
 0x17d   : > { %v2404_v48 = vadd.f32 %v2403_v20, %v2149_v44 }
 0x17f   : > { %v1862_v49 = vpop.f32.mrf.mxu2  ;;  %v2027_v53 = vpop.f32.mrf.mxu3 }
 0x180   : > { %v1863_v60 = vadd.f32 %v3755_v40, %v1862_v49  ;;  %v2028_v62 = vadd.f32 %v3755_v40, %v2027_v53  ;;  %v1555_v4 = vpop.f32.mrf.mxu0  ;;  %v1720_v6 = vpop.f32.mrf.mxu1 }
 0x181   : > { %v1556_v10 = vadd.f32 %v3755_v40, %v1555_v4  ;;  %v1721_v23 = vadd.f32 %v3755_v40, %v1720_v6 }
 0x182   : > { %v2273_v14 = vmax.f32 %v1863_v60, 0.0  ;;  %v2339_v21 = vmax.f32 %v2028_v62, 0.0 }
 0x183   : > { %v2150_v22 = vmax.f32 %v1556_v10, 0.0  ;;  %3363 = vmatmul.msk.bf16.gmra.mxu0 %vm1086_vm0, %v3501_v56  ;;  %3396 = vmatmul.msk.bf16.gmra.mxu1 %vm1086_vm0, %v3534_v58  ;;  %v2216_v49 = vmax.f32 %v1721_v23, 0.0  ;;  %v3502_v10 = vld [vmem:[%s3680_s22 + $0xc0] sm:$0xff] }
 0x184   : > { %v2548_v16 = vadd.f32 %v2547_v46, %v2273_v14  ;;  %v2624_v19 = vadd.f32 %v2623_v47, %v2339_v21  ;;  %3425 = vmatmul.msk.bf16.gmra.mxu2 %vm1086_vm0, %v3563_v8  ;;  %3458 = vmatmul.msk.bf16.gmra.mxu3 %vm1086_vm0, %v3596_v9  ;;  %v3535_v14 = vld [vmem:[%s3680_s22 + $0x1c8] sm:$0xff]  ;;  %v4051_v21 = vld [vmem:[%s4421_s2] ss:$0 sm:$0xff] }
 0x185   : > { %v2405_v20 = vadd.f32 %v2404_v48, %v2150_v22 }
 0x187   : > { %v1865_v26 = vpop.f32.mrf.mxu2  ;;  %v2030_v27 = vpop.f32.mrf.mxu3 }
 0x188   : > { %v1866_v34 = vadd.f32 %v3755_v40, %v1865_v26  ;;  %v2031_v35 = vadd.f32 %v3755_v40, %v2030_v27  ;;  %v1557_v36 = vpop.f32.mrf.mxu0  ;;  %v1722_v44 = vpop.f32.mrf.mxu1 }
 0x189   : > { %v1558_v46 = vadd.f32 %v3755_v40, %v1557_v36  ;;  %v1723_v47 = vadd.f32 %v3755_v40, %v1722_v44 }
 0x18a   : > { %v2274_v53 = vmax.f32 %v1866_v34, 0.0  ;;  %v2340_v56 = vmax.f32 %v2031_v35, 0.0 }
 0x18b   : > { %v2151_v48 = vmax.f32 %v1558_v46, 0.0  ;;  %v2217_v58 = vmax.f32 %v1723_v47, 0.0 }
 0x18c   : > { %v2549_v60 = vadd.f32 %v2548_v16, %v2274_v53  ;;  %v2625_v62 = vadd.f32 %v2624_v19, %v2340_v56  ;;  %v3564_v16 = vld [vmem:[%s3680_s22 + $0x2b0] sm:$0xff]  ;;  %v3597_v19 = vld [vmem:[%s3680_s22 + $0x3b8] sm:$0xff] }
 0x18d   : > { %v4044_v4 = vadd.f32 %v2405_v20, %v2151_v48  ;;  %v2487_v6 = vadd.f32 %v2217_v58, %v2216_v49 }
 0x18f   : > { %v1867_v8 = vpop.f32.mrf.mxu2  ;;  %v2032_v9 = vpop.f32.mrf.mxu3 }
 0x190   : > { %v1868_v40 = vadd.f32 %v4051_v21, %v1867_v8  ;;  %v2033_v22 = vadd.f32 %v4051_v21, %v2032_v9  ;;  %v1560_v23 = vpop.f32.mrf.mxu0  ;;  %v1725_v26 = vpop.f32.mrf.mxu1 }
 0x191   : > { %v1726_v20 = vadd.f32 %v4051_v21, %v1725_v26  ;;  %v1561_v46 = vadd.f32 %v4051_v21, %v1560_v23 }
 0x192   : > { %v2275_v27 = vmax.f32 %v1868_v40, 0.0  ;;  %v2341_v34 = vmax.f32 %v2033_v22, 0.0 }
 0x193   : > { %v2218_v35 = vmax.f32 %v1726_v20, 0.0  ;;  %3364 = vmatmul.msk.bf16.gmra.mxu0 %vm1086_vm0, %v3502_v10  ;;  %3397 = vmatmul.msk.bf16.gmra.mxu1 %vm1086_vm0, %v3535_v14 }
 0x194   : > { %v2550_v36 = vadd.f32 %v2549_v60, %v2275_v27  ;;  %v2626_v44 = vadd.f32 %v2625_v62, %v2341_v34  ;;  %3426 = vmatmul.msk.bf16.gmra.mxu2 %vm1086_vm0, %v3564_v16  ;;  %3459 = vmatmul.msk.bf16.gmra.mxu3 %vm1086_vm0, %v3597_v19  ;;  %v3503_v27 = vld [vmem:[%s3680_s22 + $0xc8] sm:$0xff]  ;;  %v3536_v34 = vld [vmem:[%s3680_s22 + $0x1d0] sm:$0xff] }
 0x195   : > { %v2488_v49 = vadd.f32 %v2487_v6, %v2218_v35  ;;  %v2152_v6 = vmax.f32 %v1561_v46, 0.0 }
 0x197   : > { %v1870_v47 = vpop.f32.mrf.mxu2  ;;  %v2035_v53 = vpop.f32.mrf.mxu3 }
 0x198   : > { %v1871_v56 = vadd.f32 %v4051_v21, %v1870_v47  ;;  %v2036_v48 = vadd.f32 %v4051_v21, %v2035_v53  ;;  %v1562_v58 = vpop.f32.mrf.mxu0  ;;  %v1727_v8 = vpop.f32.mrf.mxu1 }
 0x199   : > { %v1563_v60 = vadd.f32 %v4051_v21, %v1562_v58  ;;  %v1728_v62 = vadd.f32 %v4051_v21, %v1727_v8  ;;  %v3598_v58 = vld [vmem:[%s3680_s22 + $0x3c0] sm:$0xff] }
 0x19a   : > { %v2276_v9 = vmax.f32 %v1871_v56, 0.0  ;;  %v2342_v10 = vmax.f32 %v2036_v48, 0.0  ;;  %v3565_v48 = vld [vmem:[%s3680_s22 + $0x2b8] sm:$0xff] }
 0x19b   : > { %v2153_v14 = vmax.f32 %v1563_v60, 0.0  ;;  %v2219_v40 = vmax.f32 %v1728_v62, 0.0 }
 0x19c   : > { %v2551_v22 = vadd.f32 %v2550_v36, %v2276_v9  ;;  %v2627_v23 = vadd.f32 %v2626_v44, %v2342_v10 }
 0x19d   : > { %v2413_v26 = vadd.f32 %v2153_v14, %v2152_v6  ;;  %v2489_v16 = vadd.f32 %v2488_v49, %v2219_v40 }
 0x19f   : > { %v1872_v19 = vpop.f32.mrf.mxu2  ;;  %v2037_v20 = vpop.f32.mrf.mxu3 }
 0x1a0   : > { %v1873_v35 = vadd.f32 %v4051_v21, %v1872_v19  ;;  %v2038_v47 = vadd.f32 %v4051_v21, %v2037_v20  ;;  %v1565_v53 = vpop.f32.mrf.mxu0  ;;  %v1730_v56 = vpop.f32.mrf.mxu1 }
 0x1a1   : > { %v1566_v46 = vadd.f32 %v4051_v21, %v1565_v53  ;;  %v1731_v8 = vadd.f32 %v4051_v21, %v1730_v56 }
 0x1a2   : > { %v2277_v36 = vmax.f32 %v1873_v35, 0.0  ;;  %v2343_v44 = vmax.f32 %v2038_v47, 0.0 }
 0x1a3   : > { %v2154_v60 = vmax.f32 %v1566_v46, 0.0  ;;  %v2220_v49 = vmax.f32 %v1731_v8, 0.0  ;;  %3365 = vmatmul.msk.bf16.gmra.mxu0 %vm1086_vm0, %v3503_v27  ;;  %3398 = vmatmul.msk.bf16.gmra.mxu1 %vm1086_vm0, %v3536_v34  ;;  %v3537_v46 = vld [vmem:[%s3680_s22 + $0x1d8] sm:$0xff] }
 0x1a4   : > { %v2552_v62 = vadd.f32 %v2551_v22, %v2277_v36  ;;  %v4077_v9 = vadd.f32 %v2627_v23, %v2343_v44  ;;  %3427 = vmatmul.msk.bf16.gmra.mxu2 %vm1086_vm0, %v3565_v48  ;;  %3460 = vmatmul.msk.bf16.gmra.mxu3 %vm1086_vm0, %v3598_v58  ;;  %v3504_v58 = vld [vmem:[%s3680_s22 + $0xd0] sm:$0xff] }
 0x1a5   : > { %v2414_v10 = vadd.f32 %v2413_v26, %v2154_v60  ;;  %v2490_v6 = vadd.f32 %v2489_v16, %v2220_v49 }
 0x1a6   : > { %4433 = vst [vmem:[#allocation9_spill] sm:$0xff] %v4077_v9 }
 0x1a7   : > { %v1875_v14 = vpop.f32.mrf.mxu2  ;;  %v2040_v40 = vpop.f32.mrf.mxu3 }
 0x1a8   : > { %v1876_v19 = vadd.f32 %v4051_v21, %v1875_v14  ;;  %v1567_v20 = vpop.f32.mrf.mxu0  ;;  %v1732_v35 = vpop.f32.mrf.mxu1  ;;  %v2041_v26 = vadd.f32 %v4051_v21, %v2040_v40  ;;  %v3566_v14 = vld [vmem:[%s3680_s22 + $0x2c0] sm:$0xff] }
 0x1a9   : > { %v1568_v27 = vadd.f32 %v4051_v21, %v1567_v20  ;;  %v1733_v22 = vadd.f32 %v4051_v21, %v1732_v35 }
 0x1aa   : > { %v2278_v23 = vmax.f32 %v1876_v19, 0.0  ;;  %v2344_v8 = vmax.f32 %v2041_v26, 0.0  ;;  %v3599_v19 = vld [vmem:[%s3680_s22 + $0x3c8] sm:$0xff] }
 0x1ab   : > { %v2155_v34 = vmax.f32 %v1568_v27, 0.0  ;;  %v2221_v53 = vmax.f32 %v1733_v22, 0.0 }
 0x1ac   : > { %v2553_v47 = vadd.f32 %v2552_v62, %v2278_v23 }
 0x1ad   : > { %v2415_v16 = vadd.f32 %v2414_v10, %v2155_v34  ;;  %v2491_v20 = vadd.f32 %v2490_v6, %v2221_v53 }
 0x1af   : > { %v1877_v56 = vpop.f32.mrf.mxu2  ;;  %v2042_v48 = vpop.f32.mrf.mxu3 }
 0x1b0   : > { %v1878_v36 = vadd.f32 %v4051_v21, %v1877_v56  ;;  %v2043_v44 = vadd.f32 %v4051_v21, %v2042_v48  ;;  %v1570_v60 = vpop.f32.mrf.mxu0  ;;  %v1735_v49 = vpop.f32.mrf.mxu1 }
 0x1b1   : > { %v1571_v62 = vadd.f32 %v4051_v21, %v1570_v60  ;;  %v1736_v40 = vadd.f32 %v4051_v21, %v1735_v49 }
 0x1b2   : > { %v2279_v10 = vmax.f32 %v1878_v36, 0.0  ;;  %v2345_v35 = vmax.f32 %v2043_v44, 0.0 }
 0x1b3   : > { %v2156_v27 = vmax.f32 %v1571_v62, 0.0  ;;  %v2222_v22 = vmax.f32 %v1736_v40, 0.0  ;;  %3366 = vmatmul.msk.bf16.gmra.mxu0 %vm1086_vm0, %v3504_v58  ;;  %3399 = vmatmul.msk.bf16.gmra.mxu1 %vm1086_vm0, %v3537_v46  ;;  %v3505_v40 = vld [vmem:[%s3680_s22 + $0xd8] sm:$0xff] }
 0x1b4   : > { %v4095_v23 = vadd.f32 %v2553_v47, %v2279_v10  ;;  %v2635_v34 = vadd.f32 %v2345_v35, %v2344_v8  ;;  %3428 = vmatmul.msk.bf16.gmra.mxu2 %vm1086_vm0, %v3566_v14  ;;  %3461 = vmatmul.msk.bf16.gmra.mxu3 %vm1086_vm0, %v3599_v19  ;;  %v3538_v10 = vld [vmem:[%s3680_s22 + $0x1e0] sm:$0xff] }
 0x1b5   : > { %v2416_v6 = vadd.f32 %v2415_v16, %v2156_v27  ;;  %v2492_v26 = vadd.f32 %v2491_v20, %v2222_v22 }
 0x1b6   : > { %4434 = vst [vmem:[#allocation10_spill] sm:$0xff] %v4095_v23 }
 0x1b7   : > { %v1880_v53 = vpop.f32.mrf.mxu2  ;;  %v2045_v56 = vpop.f32.mrf.mxu3 }
 0x1b8   : > { %v2046_v48 = vadd.f32 %v4051_v21, %v2045_v56  ;;  %v1572_v36 = vpop.f32.mrf.mxu0  ;;  %v1737_v44 = vpop.f32.mrf.mxu1  ;;  %v1881_v16 = vadd.f32 %v4051_v21, %v1880_v53 }
 0x1b9   : > { %v1573_v58 = vadd.f32 %v4051_v21, %v1572_v36  ;;  %v1738_v47 = vadd.f32 %v4051_v21, %v1737_v44  ;;  %v3567_v36 = vld [vmem:[%s3680_s22 + $0x2c8] sm:$0xff]  ;;  %v3600_v44 = vld [vmem:[%s3680_s22 + $0x3d0] sm:$0xff] }
 0x1ba   : > { %v2346_v46 = vmax.f32 %v2046_v48, 0.0  ;;  %v2280_v35 = vmax.f32 %v1881_v16, 0.0 }
 0x1bb   : > { %v2157_v8 = vmax.f32 %v1573_v58, 0.0  ;;  %v2223_v60 = vmax.f32 %v1738_v47, 0.0 }
 0x1bc   : > { %v2636_v49 = vadd.f32 %v2635_v34, %v2346_v46 }
 0x1bd   : > { %v2417_v14 = vadd.f32 %v2416_v6, %v2157_v8  ;;  %v2493_v19 = vadd.f32 %v2492_v26, %v2223_v60 }
 0x1bf   : > { %v1882_v20 = vpop.f32.mrf.mxu2  ;;  %v2047_v62 = vpop.f32.mrf.mxu3 }
 0x1c0   : > { %v1883_v27 = vadd.f32 %v4051_v21, %v1882_v20  ;;  %v2048_v22 = vadd.f32 %v4051_v21, %v2047_v62  ;;  %v1575_v56 = vpop.f32.mrf.mxu0  ;;  %v1740_v48 = vpop.f32.mrf.mxu1 }
 0x1c1   : > { %v1576_v58 = vadd.f32 %v4051_v21, %v1575_v56  ;;  %v1741_v53 = vadd.f32 %v4051_v21, %v1740_v48 }
 0x1c2   : > { %v2281_v34 = vmax.f32 %v1883_v27, 0.0  ;;  %v2347_v6 = vmax.f32 %v2048_v22, 0.0 }
 0x1c3   : > { %v2158_v26 = vmax.f32 %v1576_v58, 0.0  ;;  %v2224_v47 = vmax.f32 %v1741_v53, 0.0  ;;  %3367 = vmatmul.msk.bf16.gmra.mxu0 %vm1086_vm0, %v3505_v40  ;;  %3400 = vmatmul.msk.bf16.gmra.mxu1 %vm1086_vm0, %v3538_v10 }
 0x1c4   : > { %v2561_v46 = vadd.f32 %v2281_v34, %v2280_v35  ;;  %v2637_v8 = vadd.f32 %v2636_v49, %v2347_v6  ;;  %3429 = vmatmul.msk.bf16.gmra.mxu2 %vm1086_vm0, %v3567_v36  ;;  %3462 = vmatmul.msk.bf16.gmra.mxu3 %vm1086_vm0, %v3600_v44 }
 0x1c5   : > { %v2418_v60 = vadd.f32 %v2417_v14, %v2158_v26  ;;  %v2494_v16 = vadd.f32 %v2493_v19, %v2224_v47  ;;  %v3506_v26 = vld [vmem:[%s3680_s22 + $0xe0] sm:$0xff]  ;;  %v3539_v47 = vld [vmem:[%s3680_s22 + $0x1e8] sm:$0xff] }
 0x1c7   : > { %v1885_v20 = vpop.f32.mrf.mxu2  ;;  %v2050_v62 = vpop.f32.mrf.mxu3 }
 0x1c8   : > { %v1886_v56 = vadd.f32 %v4051_v21, %v1885_v20  ;;  %v2051_v27 = vadd.f32 %v4051_v21, %v2050_v62  ;;  %v1577_v22 = vpop.f32.mrf.mxu0  ;;  %v1742_v40 = vpop.f32.mrf.mxu1 }
 0x1c9   : > { %v1578_v10 = vadd.f32 %v4051_v21, %v1577_v22  ;;  %v1743_v49 = vadd.f32 %v4051_v21, %v1742_v40 }
 0x1ca   : > { %v2282_v35 = vmax.f32 %v1886_v56, 0.0  ;;  %v2348_v48 = vmax.f32 %v2051_v27, 0.0  ;;  %v3568_v56 = vld [vmem:[%s3680_s22 + $0x2d0] sm:$0xff] }
 0x1cb   : > { %v2159_v14 = vmax.f32 %v1578_v10, 0.0  ;;  %v2225_v19 = vmax.f32 %v1743_v49, 0.0 }
 0x1cc   : > { %v2562_v36 = vadd.f32 %v2561_v46, %v2282_v35  ;;  %v2638_v44 = vadd.f32 %v2637_v8, %v2348_v48 }
 0x1cd   : > { %v2419_v58 = vadd.f32 %v2418_v60, %v2159_v14  ;;  %v2495_v53 = vadd.f32 %v2494_v16, %v2225_v19 }
 0x1cf   : > { %v1887_v34 = vpop.f32.mrf.mxu2  ;;  %v2052_v6 = vpop.f32.mrf.mxu3 }
 0x1d0   : > { %v1888_v20 = vadd.f32 %v4051_v21, %v1887_v34  ;;  %v2053_v62 = vadd.f32 %v4051_v21, %v2052_v6  ;;  %v1580_v22 = vpop.f32.mrf.mxu0  ;;  %v1745_v40 = vpop.f32.mrf.mxu1 }
 0x1d1   : > { %v1581_v27 = vadd.f32 %v4051_v21, %v1580_v22  ;;  %v1746_v10 = vadd.f32 %v4051_v21, %v1745_v40 }
 0x1d2   : > { %v2283_v46 = vmax.f32 %v1888_v20, 0.0  ;;  %v2349_v8 = vmax.f32 %v2053_v62, 0.0 }
 0x1d3   : > { %v2160_v60 = vmax.f32 %v1581_v27, 0.0  ;;  %v2226_v16 = vmax.f32 %v1746_v10, 0.0  ;;  %3368 = vmatmul.msk.bf16.gmra.mxu0 %vm1086_vm0, %v3506_v26  ;;  %3401 = vmatmul.msk.bf16.gmra.mxu1 %vm1086_vm0, %v3539_v47 }
 0x1d4   : > { %v2563_v49 = vadd.f32 %v2562_v36, %v2283_v46  ;;  %v2639_v35 = vadd.f32 %v2638_v44, %v2349_v8  ;;  %3430 = vmatmul.msk.bf16.gmra.mxu2 %vm1086_vm0, %v3568_v56  ;;  %3463 = vmatmul.msk.bf16.gmra.mxu3 %vm1086_vm0, %v3601_v29  ;;  %v3507_v8 = vld [vmem:[%s3680_s22 + $0xe8] sm:$0xff] }
 0x1d5   : > { %v2420_v48 = vadd.f32 %v2419_v58, %v2160_v60  ;;  %v2496_v14 = vadd.f32 %v2495_v53, %v2226_v16 }
 0x1d7   : > { %v1890_v19 = vpop.f32.mrf.mxu2  ;;  %v2055_v34 = vpop.f32.mrf.mxu3 }
 0x1d8   : > { %v1891_v6 = vadd.f32 %v4051_v21, %v1890_v19  ;;  %v2056_v20 = vadd.f32 %v4051_v21, %v2055_v34  ;;  %v1582_v62 = vpop.f32.mrf.mxu0  ;;  %v1747_v22 = vpop.f32.mrf.mxu1 }
 0x1d9   : > { %v1583_v26 = vadd.f32 %v4051_v21, %v1582_v62  ;;  %v1748_v36 = vadd.f32 %v4051_v21, %v1747_v22  ;;  %v3569_v62 = vld [vmem:[%s3680_s22 + $0x2d8] sm:$0xff]  ;;  %v3602_v22 = vld [vmem:[%s3680_s22 + $0x3e0] sm:$0xff] }
 0x1da   : > { %v2284_v44 = vmax.f32 %v1891_v6, 0.0  ;;  %v2350_v47 = vmax.f32 %v2056_v20, 0.0 }
 0x1db   : > { %v2161_v29 = vmax.f32 %v1583_v26, 0.0  ;;  %v2227_v58 = vmax.f32 %v1748_v36, 0.0 }
 0x1dc   : > { %v2564_v53 = vadd.f32 %v2563_v49, %v2284_v44  ;;  %v2640_v40 = vadd.f32 %v2639_v35, %v2350_v47 }
 0x1dd   : > { %v2421_v56 = vadd.f32 %v2420_v48, %v2161_v29  ;;  %v2497_v27 = vadd.f32 %v2496_v14, %v2227_v58 }
 0x1df   : > { %v1892_v10 = vpop.f32.mrf.mxu2  ;;  %v2057_v46 = vpop.f32.mrf.mxu3 }
 0x1e0   : > { %v1893_v60 = vadd.f32 %v4051_v21, %v1892_v10  ;;  %v2058_v16 = vadd.f32 %v4051_v21, %v2057_v46  ;;  %v1585_v19 = vpop.f32.mrf.mxu0  ;;  %v1750_v34 = vpop.f32.mrf.mxu1 }
 0x1e1   : > { %v1586_v6 = vadd.f32 %v4051_v21, %v1585_v19  ;;  %v1751_v20 = vadd.f32 %v4051_v21, %v1750_v34 }
 0x1e2   : > { %v2285_v26 = vmax.f32 %v1893_v60, 0.0  ;;  %v2351_v49 = vmax.f32 %v2058_v16, 0.0 }
 0x1e3   : > { %v2162_v35 = vmax.f32 %v1586_v6, 0.0  ;;  %v2228_v48 = vmax.f32 %v1751_v20, 0.0  ;;  %3369 = vmatmul.msk.bf16.gmra.mxu0 %vm1086_vm0, %v3507_v8  ;;  %v3608_v20 = vld [vmem:[%s4420_s1 + $0x10] sm:$0xff] }
 0x1e4   : > { %v2565_v14 = vadd.f32 %v2564_v53, %v2285_v26  ;;  %v2641_v36 = vadd.f32 %v2640_v40, %v2351_v49  ;;  %3431 = vmatmul.msk.bf16.gmra.mxu2 %vm1086_vm0, %v3569_v62  ;;  %3464 = vmatmul.msk.bf16.gmra.mxu3 %vm1086_vm0, %v3602_v22 }
 0x1e5   : > { %v2422_v44 = vadd.f32 %v2421_v56, %v2162_v35  ;;  %v2498_v47 = vadd.f32 %v2497_v27, %v2228_v48  ;;  %v3508_v35 = vld [vmem:[%s3680_s22 + $0xf0] sm:$0xff]  ;;  %2752 = vmatpush.bf16.xpose.msrb.mxu1 %v3608_v20 }
 0x1e7   : > { %v1895_v29 = vpop.f32.mrf.mxu2  ;;  %v2060_v58 = vpop.f32.mrf.mxu3 }
 0x1e8   : > { %v1896_v10 = vadd.f32 %v4051_v21, %v1895_v29  ;;  %v2061_v46 = vadd.f32 %v4051_v21, %v2060_v58  ;;  %v1587_v60 = vpop.f32.mrf.mxu0  ;;  %v1752_v16 = vpop.f32.mrf.mxu1 }
 0x1e9   : > { %v1588_v19 = vadd.f32 %v4051_v21, %v1587_v60  ;;  %v1753_v53 = vadd.f32 %v4051_v21, %v1752_v16  ;;  %v3603_v60 = vld [vmem:[%s3680_s22 + $0x3e8] sm:$0xff] }
 0x1ea   : > { %v2286_v40 = vmax.f32 %v1896_v10, 0.0  ;;  %v2352_v8 = vmax.f32 %v2061_v46, 0.0  ;;  %v3570_v46 = vld [vmem:[%s3680_s22 + $0x2e0] sm:$0xff] }
 0x1eb   : > { %v2163_v34 = vmax.f32 %v1588_v19, 0.0  ;;  %v2229_v56 = vmax.f32 %v1753_v53, 0.0 }
 0x1ec   : > { %v2566_v27 = vadd.f32 %v2565_v14, %v2286_v40  ;;  %v2642_v62 = vadd.f32 %v2641_v36, %v2352_v8 }
 0x1ed   : > { %v2423_v22 = vadd.f32 %v2422_v44, %v2163_v34  ;;  %v2499_v6 = vadd.f32 %v2498_v47, %v2229_v56 }
 0x1ef   : > { %v1897_v26 = vpop.f32.mrf.mxu2  ;;  %v2062_v49 = vpop.f32.mrf.mxu3 }
 0x1f0   : > { %v1898_v48 = vadd.f32 %v4051_v21, %v1897_v26  ;;  %v2063_v29 = vadd.f32 %v4051_v21, %v2062_v49  ;;  %v1590_v58 = vpop.f32.mrf.mxu0  ;;  %v1755_v10 = vpop.f32.mrf.mxu1 }
 0x1f1   : > { %v1591_v14 = vadd.f32 %v4051_v21, %v1590_v58  ;;  %v1756_v36 = vadd.f32 %v4051_v21, %v1755_v10 }
 0x1f2   : > { %v2287_v44 = vmax.f32 %v1898_v48, 0.0  ;;  %v2353_v47 = vmax.f32 %v2063_v29, 0.0 }
 0x1f3   : > { %v2164_v16 = vmax.f32 %v1591_v14, 0.0  ;;  %v2230_v19 = vmax.f32 %v1756_v36, 0.0  ;;  %3370 = vmatmul.msk.bf16.gmra.mxu0 %vm1086_vm0, %v3508_v35 }
 0x1f4   : > { %v2567_v53 = vadd.f32 %v2566_v27, %v2287_v44  ;;  %v2643_v40 = vadd.f32 %v2642_v62, %v2353_v47  ;;  %3432 = vmatmul.msk.bf16.gmra.mxu2 %vm1086_vm0, %v3570_v46  ;;  %3465 = vmatmul.msk.bf16.gmra.mxu3 %vm1086_vm0, %v3603_v60  ;;  %v3509_v47 = vld [vmem:[%s3680_s22 + $0xf8] sm:$0xff] }
 0x1f5   : > { %v2424_v8 = vadd.f32 %v2423_v22, %v2164_v16  ;;  %v2500_v34 = vadd.f32 %v2499_v6, %v2230_v19 }
 0x1f7   : > { %v1900_v56 = vpop.f32.mrf.mxu2  ;;  %v2065_v20 = vpop.f32.mrf.mxu3 }
 0x1f8   : > { %v1901_v26 = vadd.f32 %v4051_v21, %v1900_v56  ;;  %v2066_v49 = vadd.f32 %v4051_v21, %v2065_v20  ;;  %v1592_v48 = vpop.f32.mrf.mxu0  ;;  %v1757_v29 = vpop.f32.mrf.mxu1 }
 0x1f9   : > { %v1593_v58 = vadd.f32 %v4051_v21, %v1592_v48  ;;  %v1758_v27 = vadd.f32 %v4051_v21, %v1757_v29  ;;  %v3571_v48 = vld [vmem:[%s3680_s22 + $0x2e8] sm:$0xff]  ;;  %v3604_v29 = vld [vmem:[%s3680_s22 + $0x3f0] sm:$0xff] }
 0x1fa   : > { %v2288_v62 = vmax.f32 %v1901_v26, 0.0  ;;  %v2354_v35 = vmax.f32 %v2066_v49, 0.0 }
 0x1fb   : > { %v2165_v10 = vmax.f32 %v1593_v58, 0.0  ;;  %v2231_v22 = vmax.f32 %v1758_v27, 0.0 }
 0x1fc   : > { %v2568_v6 = vadd.f32 %v2567_v53, %v2288_v62  ;;  %v2644_v46 = vadd.f32 %v2643_v40, %v2354_v35 }
 0x1fd   : > { %v2425_v60 = vadd.f32 %v2424_v8, %v2165_v10  ;;  %v2501_v14 = vadd.f32 %v2500_v34, %v2231_v22 }
 0x1ff   : > { %v1902_v36 = vpop.f32.mrf.mxu2  ;;  %v2067_v44 = vpop.f32.mrf.mxu3 }
 0x200   : > { %v1903_v16 = vadd.f32 %v4051_v21, %v1902_v36  ;;  %v2068_v19 = vadd.f32 %v4051_v21, %v2067_v44  ;;  %v1595_v56 = vpop.f32.mrf.mxu0  ;;  %v1760_v20 = vpop.f32.mrf.mxu1 }
 0x201   : > { %v1596_v26 = vadd.f32 %v4051_v21, %v1595_v56  ;;  %v1761_v49 = vadd.f32 %v4051_v21, %v1760_v20 }
 0x202   : > { %v2289_v58 = vmax.f32 %v1903_v16, 0.0  ;;  %v2355_v53 = vmax.f32 %v2068_v19, 0.0 }
 0x203   : > { %v2166_v40 = vmax.f32 %v1596_v26, 0.0  ;;  %v2232_v8 = vmax.f32 %v1761_v49, 0.0  ;;  %3371 = vmatmul.msk.bf16.gmra.mxu0 %vm1086_vm0, %v3509_v47  ;;  %v3510_v26 = vld [vmem:[%s3680_s22 + $0x100] sm:$0xff] }
 0x204   : > { %v2569_v34 = vadd.f32 %v2568_v6, %v2289_v58  ;;  %v2645_v27 = vadd.f32 %v2644_v46, %v2355_v53  ;;  %3433 = vmatmul.msk.bf16.gmra.mxu2 %vm1086_vm0, %v3571_v48  ;;  %3466 = vmatmul.msk.bf16.gmra.mxu3 %vm1086_vm0, %v3604_v29 }
 0x205   : > { %v2426_v62 = vadd.f32 %v2425_v60, %v2166_v40  ;;  %v4176_v35 = vadd.f32 %v2501_v14, %v2232_v8  ;;  %v3572_v8 = vld [vmem:[%s3680_s22 + $0x2f0] sm:$0xff] }
 0x207   : > { %v1905_v10 = vpop.f32.mrf.mxu2  ;;  %v2070_v22 = vpop.f32.mrf.mxu3 }
 0x208   : > { %v1906_v36 = vadd.f32 %v4051_v21, %v1905_v10  ;;  %v2071_v44 = vadd.f32 %v4051_v21, %v2070_v22  ;;  %v1597_v16 = vpop.f32.mrf.mxu0  ;;  %v4180_v19 = vpop.f32.mrf.mxu1  ;;  %v3605_v10 = vld [vmem:[%s3680_s22 + $0x3f8] sm:$0xff] }
 0x209   : > { %v1598_v6 = vadd.f32 %v4051_v21, %v1597_v16 }
 0x20a   : > { %v2290_v46 = vmax.f32 %v1906_v36, 0.0  ;;  %v2356_v47 = vmax.f32 %v2071_v44, 0.0 }
 0x20b   : > { %v2167_v56 = vmax.f32 %v1598_v6, 0.0 }
 0x20c   : > { %v2570_v60 = vadd.f32 %v2569_v34, %v2290_v46  ;;  %v2646_v14 = vadd.f32 %v2645_v27, %v2356_v47 }
 0x20d   : > { %v2427_v20 = vadd.f32 %v2426_v62, %v2167_v56 }
 0x20f   : > { %v1907_v48 = vpop.f32.mrf.mxu2  ;;  %v2072_v29 = vpop.f32.mrf.mxu3 }
 0x210   : > { %v1908_v49 = vadd.f32 %v4051_v21, %v1907_v48  ;;  %v2073_v58 = vadd.f32 %v4051_v21, %v2072_v29  ;;  %v1600_v53 = vpop.f32.mrf.mxu0  ;;  %v4186_v40 = vpop.f32.mrf.mxu1 }
 0x211   : > { %v1601_v22 = vadd.f32 %v4051_v21, %v1600_v53 }
 0x212   : > { %v2291_v36 = vmax.f32 %v1908_v49, 0.0  ;;  %v2357_v44 = vmax.f32 %v2073_v58, 0.0 }
 0x213   : > { %v2168_v16 = vmax.f32 %v1601_v22, 0.0  ;;  %3372 = vmatmul.msk.bf16.gmra.mxu0 %vm1086_vm0, %v3510_v26 }
 0x214   : > { %v2571_v34 = vadd.f32 %v2570_v60, %v2291_v36  ;;  %v2647_v27 = vadd.f32 %v2646_v14, %v2357_v44  ;;  %3434 = vmatmul.msk.bf16.gmra.mxu2 %vm1086_vm0, %v3572_v8  ;;  %3467 = vmatmul.msk.bf16.gmra.mxu3 %vm1086_vm0, %v3605_v10 }
 0x215   : > { %v2428_v62 = vadd.f32 %v2427_v20, %v2168_v16 }
 0x217   : > { %v1910_v6 = vpop.f32.mrf.mxu2  ;;  %v2075_v46 = vpop.f32.mrf.mxu3 }
 0x218   : > { %v1911_v47 = vadd.f32 %v4051_v21, %v1910_v6  ;;  %v2076_v56 = vadd.f32 %v4051_v21, %v2075_v46  ;;  %v1602_v48 = vpop.f32.mrf.mxu0  ;;  %v4196_v29 = vpop.f32.mrf.mxu1 }
 0x219   : > { %v1603_v49 = vadd.f32 %v4051_v21, %v1602_v48 }
 0x21a   : > { %v2292_v58 = vmax.f32 %v1911_v47, 0.0  ;;  %v2358_v26 = vmax.f32 %v2076_v56, 0.0 }
 0x21b   : > { %v2169_v60 = vmax.f32 %v1603_v49, 0.0 }
 0x21c   : > { %v2572_v14 = vadd.f32 %v2571_v34, %v2292_v58  ;;  %v2648_v53 = vadd.f32 %v2647_v27, %v2358_v26 }
 0x21d   : > { %v2429_v8 = vadd.f32 %v2428_v62, %v2169_v60 }
 0x21f   : > { %v1912_v22 = vpop.f32.mrf.mxu2  ;;  %v2077_v10 = vpop.f32.mrf.mxu3 }
 0x220   : > { %v1913_v20 = vadd.f32 %v4051_v21, %v1912_v22  ;;  %v2078_v36 = vadd.f32 %v4051_v21, %v2077_v10  ;;  %v1605_v44 = vpop.f32.mrf.mxu0  ;;  %v4201_v16 = vpop.f32.mrf.mxu1 }
 0x221   : > { %v1606_v6 = vadd.f32 %v4051_v21, %v1605_v44 }
 0x222   : > { %v2293_v46 = vmax.f32 %v1913_v20, 0.0  ;;  %v2359_v1 = vmax.f32 %v2078_v36, 0.0 }
 0x223   : > { %v2170_v48 = vmax.f32 %v1606_v6, 0.0 }
 0x224   : > { %v2573_v47 = vadd.f32 %v2572_v14, %v2293_v46  ;;  %v2649_v56 = vadd.f32 %v2648_v53, %v2359_v1 }
 0x225   : > { %v2430_v49 = vadd.f32 %v2429_v8, %v2170_v48 }
 0x227   : > { %v1915_v34 = vpop.f32.mrf.mxu2  ;;  %v2080_v27 = vpop.f32.mrf.mxu3 }
 0x228   : > { %v1916_v62 = vadd.f32 %v4051_v21, %v1915_v34  ;;  %v2081_v58 = vadd.f32 %v4051_v21, %v2080_v27  ;;  %v1607_v26 = vpop.f32.mrf.mxu0  ;;  %v1772_v60 = vpop.f32.mrf.mxu1 }
 0x229   : > { %v1608_v22 = vadd.f32 %v4051_v21, %v1607_v26 }
 0x22a   : > { %v2294_v10 = vmax.f32 %v1916_v62, 0.0  ;;  %v2360_v9 = vmax.f32 %v2081_v58, 0.0 }
 0x22b   : > { %v2171_v28 = vmax.f32 %v1608_v22, 0.0 }
 0x22c   : > { %v2574_v44 = vadd.f32 %v2573_v47, %v2294_v10  ;;  %v2650_v20 = vadd.f32 %v2649_v56, %v2360_v9 }
 0x22d   : > { %v2431_v36 = vadd.f32 %v2430_v49, %v2171_v28 }
 0x22f   : > { %v1917_v6 = vpop.f32.mrf.mxu2  ;;  %v2082_v14 = vpop.f32.mrf.mxu3 }
 0x230   : > { %v1918_v1 = vadd.f32 %v4051_v21, %v1917_v6  ;;  %v2083_v53 = vadd.f32 %v4051_v21, %v2082_v14  ;;  %v1610_v8 = vpop.f32.mrf.mxu0  ;;  %v1775_v46 = vpop.f32.mrf.mxu1 }
 0x231   : > { %v1611_v48 = vadd.f32 %v4051_v21, %v1610_v8 }
 0x232   : > { %v2295_v34 = vmax.f32 %v1918_v1, 0.0  ;;  %v2361_v27 = vmax.f32 %v2083_v53, 0.0 }
 0x233   : > { %v2172_v23 = vmax.f32 %v1611_v48, 0.0 }
 0x234   : > { %v2575_v26 = vadd.f32 %v2574_v44, %v2295_v34  ;;  %v2651_v62 = vadd.f32 %v2650_v20, %v2361_v27  ;;  %v1763_v44 = vadd.f32 %v4051_v21, %v4180_v19 }
 0x235   : > { %v2432_v58 = vadd.f32 %v2431_v36, %v2172_v23 }
 0x237   : > { %v1920_v22 = vpop.f32.mrf.mxu2  ;;  %v2085_v47 = vpop.f32.mrf.mxu3 }
 0x238   : > { %v1921_v28 = vadd.f32 %v4051_v21, %v1920_v22  ;;  %v2086_v9 = vadd.f32 %v4051_v21, %v2085_v47  ;;  %v1612_v56 = vpop.f32.mrf.mxu0  ;;  %v1777_v49 = vpop.f32.mrf.mxu1  ;;  %v2233_v22 = vmax.f32 %v1763_v44, 0.0  ;;  %v1766_v47 = vadd.f32 %v4051_v21, %v4186_v40 }
 0x239   : > { %v1613_v10 = vadd.f32 %v4051_v21, %v1612_v56 }
 0x23a   : > { %v2296_v6 = vmax.f32 %v1921_v28, 0.0  ;;  %v2362_v14 = vmax.f32 %v2086_v9, 0.0 }
 0x23b   : > { %v2173_v2 = vmax.f32 %v1613_v10, 0.0  ;;  %v1768_v10 = vadd.f32 %v4051_v21, %v4196_v29 }
 0x23c   : > { %v2576_v8 = vadd.f32 %v2575_v26, %v2296_v6  ;;  %v2652_v1 = vadd.f32 %v2651_v62, %v2362_v14  ;;  %v1771_v14 = vadd.f32 %v4051_v21, %v4201_v16 }
 0x23d   : > { %v2433_v20 = vadd.f32 %v2432_v58, %v2173_v2  ;;  %v2503_v2 = vadd.f32 %v4176_v35, %v2233_v22  ;;  %v2234_v58 = vmax.f32 %v1766_v47, 0.0  ;;  %v1773_v35 = vadd.f32 %v4051_v21, %v1772_v60 }
 0x23e   : > { %v1776_v47 = vadd.f32 %v4051_v21, %v1775_v46 }
 0x23f   : > { %v1922_v23 = vpop.f32.mrf.mxu2  ;;  %v2087_v36 = vpop.f32.mrf.mxu3 }
 0x240   : > { %v1923_v53 = vadd.f32 %v4051_v21, %v1922_v23  ;;  %v2088_v48 = vadd.f32 %v4051_v21, %v2087_v36  ;;  %v1615_v34 = vpop.f32.mrf.mxu0  ;;  %v1780_v27 = vpop.f32.mrf.mxu1 }
 0x241   : > { %v1616_v28 = vadd.f32 %v4051_v21, %v1615_v34  ;;  %v1781_v60 = vadd.f32 %v4051_v21, %v1780_v27 }
 0x242   : > { %v2297_v26 = vmax.f32 %v1923_v53, 0.0  ;;  %v2363_v62 = vmax.f32 %v2088_v48, 0.0 }
 0x243   : > { %v2174_v9 = vmax.f32 %v1616_v28, 0.0 }
 0x244   : > { %v2577_v56 = vadd.f32 %v2576_v8, %v2297_v26  ;;  %v2653_v19 = vadd.f32 %v2652_v1, %v2363_v62  ;;  %v2504_v8 = vadd.f32 %v2503_v2, %v2234_v58  ;;  %v2235_v1 = vmax.f32 %v1768_v10, 0.0 }
 0x245   : > { %v2434_v6 = vadd.f32 %v2433_v20, %v2174_v9  ;;  %v2236_v20 = vmax.f32 %v1771_v14, 0.0  ;;  %v2237_v9 = vmax.f32 %v1773_v35, 0.0  ;;  %v2238_v10 = vmax.f32 %v1776_v47, 0.0 }
 0x246   : > { %v2505_v62 = vadd.f32 %v2504_v8, %v2235_v1  ;;  %v2240_v8 = vmax.f32 %v1781_v60, 0.0 }
 0x247   : > { %v1925_v44 = vpop.f32.mrf.mxu2  ;;  %v2090_v23 = vpop.f32.mrf.mxu3 }
 0x248   : > { %v1926_v40 = vadd.f32 %v4051_v21, %v1925_v44  ;;  %v2091_v36 = vadd.f32 %v4051_v21, %v2090_v23  ;;  %v1617_v53 = vpop.f32.mrf.mxu0  ;;  %v1782_v48 = vpop.f32.mrf.mxu1  ;;  %v1778_v44 = vadd.f32 %v4051_v21, %v1777_v49  ;;  %v2506_v58 = vadd.f32 %v2505_v62, %v2236_v20 }
 0x249   : > { %v1618_v34 = vadd.f32 %v4051_v21, %v1617_v53 }
 0x24a   : > { %v2298_v22 = vmax.f32 %v1926_v40, 0.0  ;;  %v2364_v29 = vmax.f32 %v2091_v36, 0.0  ;;  %v2507_v36 = vadd.f32 %v2506_v58, %v2237_v9  ;;  %v2239_v46 = vmax.f32 %v1778_v44, 0.0 }
 0x24b   : > { %v2175_v16 = vmax.f32 %v1618_v34, 0.0  ;;  %v1793_v44 = vadd.f32 %v4051_v21, %v3769_v50 }
 0x24c   : > { %v4230_v28 = vadd.f32 %v2577_v56, %v2298_v22  ;;  %v4232_v26 = vadd.f32 %v2653_v19, %v2364_v29  ;;  %v1783_v56 = vadd.f32 %v4051_v21, %v1782_v48  ;;  %v2508_v53 = vadd.f32 %v2507_v36, %v2238_v10 }
 0x24d   : > { %v2435_v2 = vadd.f32 %v2434_v6, %v2175_v16  ;;  %v1791_v16 = vadd.f32 %v4051_v21, %v3762_v42  ;;  %v2245_v42 = vmax.f32 %v1793_v44, 0.0 }
 0x24e   : > { %v2509_v6 = vadd.f32 %v2508_v53, %v2239_v46  ;;  %v2241_v35 = vmax.f32 %v1783_v56, 0.0  ;;  %v1798_v56 = vadd.f32 %v4051_v21, %v3790_v5 }
 0x24f   : > { %v4236_v23 = vpop.f32.mrf.mxu2  ;;  %v2244_v60 = vmax.f32 %v1791_v16, 0.0 }
 0x250   : > { %v1620_v40 = vpop.f32.mrf.mxu0  ;;  %v1785_v14 = vpop.f32.mrf.mxu1  ;;  %v2510_v22 = vadd.f32 %v2509_v6, %v2240_v8  ;;  %v2247_v6 = vmax.f32 %v1798_v56, 0.0 }
 0x251   : > { %v1621_v19 = vadd.f32 %v4051_v21, %v1620_v40  ;;  %v1786_v49 = vadd.f32 %v4051_v21, %v1785_v14  ;;  %v1796_v40 = vadd.f32 %v4051_v21, %v3784_v61  ;;  %v4251_v14 = vpop.f32.mrf.mxu3 }
 0x252   : > { %v2511_v48 = vadd.f32 %v2510_v22, %v2241_v35 }
 0x253   : > { %v2176_v1 = vmax.f32 %v1621_v19, 0.0  ;;  %v2242_v27 = vmax.f32 %v1786_v49, 0.0 }
 0x255   : > { %v2436_v34 = vadd.f32 %v2435_v2, %v2176_v1  ;;  %v2512_v58 = vadd.f32 %v2511_v48, %v2242_v27  ;;  %v2246_v1 = vmax.f32 %v1796_v40, 0.0 }
 0x257   : > { %v4241_v29 = vpop.f32.mrf.mxu2 }
 0x258   : > { %v1622_v20 = vpop.f32.mrf.mxu0  ;;  %v1787_v47 = vpop.f32.mrf.mxu1 }
 0x259   : > { %v1623_v62 = vadd.f32 %v4051_v21, %v1622_v20  ;;  %v1788_v9 = vadd.f32 %v4051_v21, %v1787_v47  ;;  %v4258_v20 = vpop.f32.mrf.mxu3 }
 0x25b   : > { %v2177_v10 = vmax.f32 %v1623_v62, 0.0  ;;  %v2243_v2 = vmax.f32 %v1788_v9, 0.0 }
 0x25d   : > { %v2437_v36 = vadd.f32 %v2436_v34, %v2177_v10  ;;  %v2513_v46 = vadd.f32 %v2512_v58, %v2243_v2 }
 0x25f   : > { %v2514_v19 = vadd.f32 %v2513_v46, %v2244_v60  ;;  %v1932_v53 = vpop.f32.mrf.mxu2  ;;  %v3639_v46 = vmov 256.0  }
 0x260   : > { %v1625_v8 = vpop.f32.mrf.mxu0  ;;  %3627 = vrcp.f32 %v3639_v46 }
 0x261   : > { %v2515_v50 = vadd.f32 %v2514_v19, %v2245_v42  ;;  %v1626_v49 = vadd.f32 %v4051_v21, %v1625_v8  ;;  %v4261_v44 = vpop.f32.mrf.mxu3  ;;  %v2407_v8 = vrot.slane %v4044_v4, 4 }
 0x263   : > { %v2516_v35 = vadd.f32 %v2515_v50, %v2246_v1  ;;  %v2178_v22 = vmax.f32 %v1626_v49, 0.0 }
 0x265   : > { %v4256_v27 = vadd.f32 %v2516_v35, %v2247_v6  ;;  %v2438_v61 = vadd.f32 %v2437_v36, %v2178_v22  ;;  %v2408_v35 = vadd.f32 %v2407_v8, %v4044_v4 }
 0x266   : > { %v3628_v49 = vpop.eup %3627 }
 0x267   : > { %4435 = vst [vmem:[#allocation11_spill] sm:$0xff] %v4256_v27  ;;  %v1935_v34 = vpop.f32.mrf.mxu2  ;;  %vm2677_vm1 = vweird.f32 %v3628_v49 }
 0x268   : > { %v1627_v47 = vpop.f32.mrf.mxu0 }
 0x269   : > { %v1628_v16 = vadd.f32 %v4051_v21, %v1627_v47  ;;  %v4265_v42 = vpop.f32.mrf.mxu3 }
 0x26b   : > { %v2179_v5 = vmax.f32 %v1628_v16, 0.0 }
 0x26d   : > { %v2439_v48 = vadd.f32 %v2438_v61, %v2179_v5  ;;  %v2673_v61 = vmul.f32 256.0, %v3628_v49  ;;  %v2409_v5 = vrot.slane %v2408_v35, 2 }
 0x26f   : > { %v1937_v62 = vpop.f32.mrf.mxu2 }
 0x270   : > { %v1630_v9 = vpop.f32.mrf.mxu0 }
 0x271   : > { %v1631_v58 = vadd.f32 %v4051_v21, %v1630_v9  ;;  %v4270_v47 = vpop.f32.mrf.mxu3  ;;  %v2674_v9 = vsub.f32 1.0, %v2673_v61 }
 0x273   : > { %v2180_v10 = vmax.f32 %v1631_v58, 0.0  ;;  %v4275_v58 = vld [vmem:[%s4421_s2] ss:$0 sm:$0xff]  ;;  %v2675_v46 = vmul.f32 %v3628_v49, %v2674_v9 }
 0x274   : > { %v1931_v4 = vadd.f32 %v4275_v58, %v4241_v29  ;;  %v1938_v29 = vadd.f32 %v4275_v58, %v1937_v62 }
 0x275   : > { %v2440_v2 = vadd.f32 %v2439_v48, %v2180_v10  ;;  %v1928_v10 = vadd.f32 %v4275_v58, %v4236_v23  ;;  %v2676_v31 = vadd.f32 %v3628_v49, %v2675_v46 }
 0x277   : > { %v1940_v60 = vpop.f32.mrf.mxu2 }
 0x278   : > { %v1632_v40 = vpop.f32.mrf.mxu0 }
 0x279   : > { %v1633_v36 = vadd.f32 %v4051_v21, %v1632_v40  ;;  %v2410_v40 = vadd.f32 %v2409_v5, %v2408_v35  ;;  %v4284_v61 = vpop.f32.mrf.mxu3 }
 0x27b   : > { %v2181_v56 = vmax.f32 %v1633_v36, 0.0 }
 0x27d   : > { %v2441_v19 = vadd.f32 %v2440_v2, %v2181_v56  ;;  %v2299_v56 = vmax.f32 %v1928_v10, 0.0 }
 0x27f   : > { %v1942_v1 = vpop.f32.mrf.mxu2 }
 0x280   : > { %v1635_v50 = vpop.f32.mrf.mxu0  ;;  %v1943_v46 = vadd.f32 %v4275_v58, %v1942_v1 }
 0x281   : > { %v1636_v6 = vadd.f32 %v4051_v21, %v1635_v50  ;;  %v2300_v50 = vmax.f32 %v1931_v4, 0.0  ;;  %v4298_v1 = vpop.f32.mrf.mxu3 }
 0x283   : > { %v2182_v22 = vmax.f32 %v1636_v6, 0.0  ;;  %v1936_v6 = vadd.f32 %v4275_v58, %v1935_v34 }
 0x285   : > { %v2442_v16 = vadd.f32 %v2441_v19, %v2182_v22  ;;  %v1933_v19 = vadd.f32 %v4275_v58, %v1932_v53  ;;  %v2411_v22 = vrot.slane %v2410_v40, 1  ;;  %v2302_v53 = vmax.f32 %v1936_v6, 0.0 }
 0x287   : > { %v1945_v48 = vpop.f32.mrf.mxu2  ;;  %v2301_v7 = vmax.f32 %v1933_v19, 0.0  ;;  %v2412_v10 = vadd.f32 %v2411_v22, %v2410_v40  ;;  %v2305_v40 = vmax.f32 %v1943_v46, 0.0 }
 0x288   : > { %v1637_v2 = vpop.f32.mrf.mxu0  ;;  %v1946_v62 = vadd.f32 %v4275_v58, %v1945_v48  ;;  %v1648_v48 = vadd.f32 %v4275_v58, %v3766_v45 }
 0x289   : > { %v1638_v21 = vadd.f32 %v4275_v58, %v1637_v2  ;;  %v2579_v2 = vadd.f32 %v4230_v28, %v2299_v56 }
 0x28b   : > { %v2183_v36 = vmax.f32 %v1638_v21, 0.0  ;;  %v2580_v9 = vadd.f32 %v2579_v2, %v2300_v50  ;;  %v4289_v21 = vsel %vm2677_vm1, %v3628_v49, %v2676_v31 }
 0x28c   : > { %v2679_v19 = vmul.f32 %v4289_v21, %v2412_v10 }
 0x28d   : > { %v2443_v8 = vadd.f32 %v2442_v16, %v2183_v36  ;;  %v1941_v16 = vadd.f32 %v4275_v58, %v1940_v60  ;;  %v2581_v4 = vadd.f32 %v2580_v9, %v2301_v7  ;;  %v2303_v36 = vmax.f32 %v1938_v29, 0.0 }
 0x28e   : > { %v1646_v7 = vadd.f32 %v4275_v58, %v3748_v37  ;;  %v2306_v29 = vmax.f32 %v1946_v62, 0.0 }
 0x28f   : > { %v2444_v23 = vrot.slane %v2443_v8, 4  ;;  %v1947_v27 = vpop.f32.mrf.mxu2  ;;  %v2582_v28 = vadd.f32 %v2581_v4, %v2302_v53  ;;  %v2304_v56 = vmax.f32 %v1941_v16, 0.0 }
 0x290   : > { %v1640_v35 = vpop.f32.mrf.mxu0  ;;  %v1948_v31 = vadd.f32 %v4275_v58, %v1947_v27  ;;  %v2186_v37 = vmax.f32 %v1646_v7, 0.0 }
 0x291   : > { %v2445_v5 = vadd.f32 %v2444_v23, %v2443_v8  ;;  %v1641_v50 = vadd.f32 %v4275_v58, %v1640_v35  ;;  %v2583_v60 = vadd.f32 %v2582_v28, %v2303_v36  ;;  %v2187_v36 = vmax.f32 %v1648_v48, 0.0 }
 0x292   : > { %v2307_v10 = vmax.f32 %v1948_v31, 0.0  ;;  %v1653_v28 = vadd.f32 %v4275_v58, %v3786_v0  ;;  %v1958_v0 = vadd.f32 %v4275_v58, %v3771_v51  ;;  %v1658_v48 = vadd.f32 %v4275_v58, %v3805_v24 }
 0x293   : > { %v2446_v34 = vrot.slane %v2445_v5, 2  ;;  %v2584_v2 = vadd.f32 %v2583_v60, %v2304_v56  ;;  %v2184_v27 = vmax.f32 %v1641_v50, 0.0  ;;  %v1956_v50 = vadd.f32 %v4275_v58, %v3764_v43  ;;  %v4320_v43 = vpop.f32.mrf.mxu3 }
 0x294   : > { %v1663_v51 = vadd.f32 %v4275_v58, %v3824_v63 }
 0x295   : > { %v2447_v39 = vadd.f32 %v2446_v34, %v2445_v5  ;;  %v2687_v5 = vpack.c.bf16 %v2679_v19, %v2679_v19  ;;  %v2585_v16 = vadd.f32 %v2584_v2, %v2305_v40  ;;  %v1656_v40 = vadd.f32 %v4275_v58, %v3795_v12 }
 0x296   : > { %v1661_v12 = vadd.f32 %v4275_v58, %v3813_v41 }
 0x297   : > { %v2448_v8 = vrot.slane %v2447_v39, 1  ;;  %v1950_v6 = vpop.f32.mrf.mxu2  ;;  %v2586_v46 = vadd.f32 %v2585_v16, %v2306_v29  ;;  %v2709_v56 = vunpack.c.l.b16 %v2687_v5  ;;  %v2310_v29 = vmax.f32 %v1956_v50, 0.0 }
 0x298   : > { %v1642_v49 = vpop.f32.mrf.mxu0  ;;  %v1951_v35 = vadd.f32 %v4275_v58, %v1950_v6  ;;  %v2190_v5 = vmax.f32 %v1656_v40, 0.0  ;;  %v2191_v16 = vmax.f32 %v1658_v48, 0.0  ;;  %v2192_v24 = vmax.f32 %v1661_v12, 0.0 }
 0x299   : > { %v2449_v22 = vadd.f32 %v2448_v8, %v2447_v39  ;;  %v1643_v23 = vadd.f32 %v4275_v58, %v1642_v49  ;;  %v1651_v39 = vadd.f32 %v4275_v58, %v3775_v55  ;;  %v2587_v6 = vadd.f32 %v2586_v46, %v2307_v10 }
 0x29a   : > { %v2308_v45 = vmax.f32 %v1951_v35, 0.0  ;;  %v1676_v50 = vadd.f32 %v4275_v58, %v3867_v30  ;;  %v2101_v30 = vadd.f32 %v4275_v58, %v4265_v42  ;;  %v2106_v42 = vadd.f32 %v4275_v58, %v4284_v61 }
 0x29b   : > { %v2680_v9 = vmul.f32 %v4289_v21, %v2449_v22  ;;  %v2185_v53 = vmax.f32 %v1643_v23, 0.0  ;;  %v2188_v55 = vmax.f32 %v1651_v39, 0.0  ;;  %v2189_v23 = vmax.f32 %v1653_v28, 0.0  ;;  %v2112_v28 = vpop.f32.mrf.mxu3 }
 0x29c   : > { %v2588_v7 = vadd.f32 %v2587_v6, %v2308_v45  ;;  %v1666_v39 = vadd.f32 %v4275_v58, %v3831_v17  ;;  %v1671_v45 = vadd.f32 %v4275_v58, %v3849_v57  ;;  %v2093_v17 = vadd.f32 %v4275_v58, %v4251_v14 }
 0x29d   : > { %v2688_v34 = vpack.c.bf16 %v2680_v9, %v2680_v9  ;;  %v2450_v4 = vadd.f32 %v2185_v53, %v2184_v27  ;;  %v2311_v27 = vmax.f32 %v1958_v0, 0.0  ;;  %v2096_v6 = vadd.f32 %v4275_v58, %v4258_v20 }
 0x29e   : > { %v2194_v46 = vmax.f32 %v1666_v39, 0.0  ;;  %v1678_v57 = vadd.f32 %v4275_v58, %v3878_v54  ;;  %v2365_v40 = vmax.f32 %v2093_v17, 0.0  ;;  %v1681_v14 = vadd.f32 %v4275_v58, %v3885_v11 }
 0x29f   : > { %v2710_v62 = vunpack.c.l.b16 %v2688_v34  ;;  %v2451_v19 = vadd.f32 %v2450_v4, %v2186_v37  ;;  %v1952_v8 = vpop.f32.mrf.mxu2  ;;  %v2193_v4 = vmax.f32 %v1663_v51, 0.0  ;;  %v1683_v20 = vadd.f32 %v4275_v58, %v3899_v32 }
 0x2a0   : > { %v1953_v60 = vadd.f32 %v4275_v58, %v1952_v8  ;;  %v2196_v8 = vmax.f32 %v1671_v45, 0.0  ;;  %v2655_v48 = vadd.f32 %v4232_v26, %v2365_v40  ;;  %v1686_v11 = vadd.f32 %v4275_v58, %v3906_v59 }
 0x2a1   : > { %v4314_v31 = vsel %vm2717_vm2, %v2710_v62, %v2709_v56  ;;  %v2452_v49 = vadd.f32 %v2451_v19, %v2187_v36  ;;  %v1668_v36 = vadd.f32 %v4275_v58, %v3842_v33  ;;  %v1673_v62 = vadd.f32 %v4275_v58, %v3860_v13 }
 0x2a2   : > { %v2309_v22 = vmax.f32 %v1953_v60, 0.0  ;;  %v2098_v13 = vadd.f32 %v4275_v58, %v4261_v44  ;;  %v2103_v44 = vadd.f32 %v4275_v58, %v4270_v47  ;;  %v2368_v12 = vmax.f32 %v2101_v30, 0.0 }
 0x2a3   : > { %v2453_v2 = vadd.f32 %v2452_v49, %v2188_v55  ;;  %v2195_v63 = vmax.f32 %v1668_v36, 0.0  ;;  %v2197_v60 = vmax.f32 %v1673_v62, 0.0  ;;  %v2198_v49 = vmax.f32 %v1676_v50, 0.0 }
 0x2a4   : > { %v2589_v35 = vadd.f32 %v2588_v7, %v2309_v22  ;;  %v2366_v7 = vmax.f32 %v2096_v6, 0.0  ;;  %v2199_v22 = vmax.f32 %v1678_v57, 0.0  ;;  %v1688_v32 = vadd.f32 %v4275_v58, %v3917_v18 }
 0x2a5   : > { %v2454_v9 = vadd.f32 %v2453_v2, %v2189_v23  ;;  %v2115_v23 = vpop.f32.mrf.mxu3  ;;  %v2367_v2 = vmax.f32 %v2098_v13, 0.0  ;;  %v2108_v47 = vadd.f32 %v4275_v58, %v4298_v1  ;;  %v1691_v59 = vadd.f32 %v4275_v58, %v3924_v38 }
 0x2a6   : > { %v2590_v53 = vadd.f32 %v2589_v35, %v2310_v29  ;;  %v2200_v29 = vmax.f32 %v1681_v14, 0.0  ;;  %v2111_v61 = vadd.f32 %v4275_v58, %v4320_v43  ;;  %v2203_v39 = vmax.f32 %v1688_v32, 0.0 }
 0x2a7   : > { %v2455_v10 = vadd.f32 %v2454_v9, %v2190_v5  ;;  %v2656_v5 = vadd.f32 %v2655_v48, %v2366_v7  ;;  %v2201_v9 = vmax.f32 %v1683_v20, 0.0  ;;  %v1693_v18 = vadd.f32 %v4275_v58, %v3935_v3  ;;  %v4439_v48 = vld [vmem:[#allocation11_spill] sm:$0xff] }
 0x2a8   : > { %v4326_v37 = vadd.f32 %v2590_v53, %v2311_v27  ;;  %v2369_v53 = vmax.f32 %v2103_v44, 0.0  ;;  %v2371_v36 = vmax.f32 %v2108_v47, 0.0  ;;  %v2204_v1 = vmax.f32 %v1691_v59, 0.0 }
 0x2a9   : > { %v2456_v34 = vadd.f32 %v2455_v10, %v2191_v16  ;;  %v2657_v26 = vadd.f32 %v2656_v5, %v2367_v2  ;;  %v2202_v16 = vmax.f32 %v1686_v11, 0.0  ;;  %v2116_v62 = vadd.f32 %v4275_v58, %v2115_v23  ;;  %v4438_v23 = vld [vmem:[#allocation4_spill] sm:$0xff]  ;;  %v4440_v11 = vld [vmem:[#allocation5_spill] sm:$0xff]  ;;  %v4441_v5 = vld [vmem:[#allocation10_spill] sm:$0xff] }
 0x2aa   : > { %v2205_v43 = vmax.f32 %v1693_v18, 0.0  ;;  %v2518_v2 = vrot.slane %v4439_v48, 4 }
 0x2ab   : > { %v2457_v41 = vadd.f32 %v2456_v34, %v2192_v24  ;;  %v2658_v10 = vadd.f32 %v2657_v26, %v2368_v12  ;;  %v2370_v24 = vmax.f32 %v2106_v42, 0.0  ;;  %v2555_v12 = vrot.slane %v4441_v5, 4 }
 0x2ac   : > { %v2519_v59 = vadd.f32 %v2518_v2, %v4439_v48 }
 0x2ad   : > { %v2458_v56 = vadd.f32 %v2457_v41, %v2193_v4  ;;  %v2659_v4 = vadd.f32 %v2658_v10, %v2369_v53  ;;  %v2113_v41 = vadd.f32 %v4275_v58, %v2112_v28  ;;  %v2117_v45 = vpop.f32.mrf.mxu3  ;;  %v4443_v53 = vld [vmem:[#allocation9_spill] sm:$0xff] }
 0x2ae   : > { %v2118_v50 = vadd.f32 %v4275_v58, %v2117_v45  ;;  %v2629_v47 = vrot.slane %v4443_v53, 4 }
 0x2af   : > { %v2459_v19 = vadd.f32 %v2458_v56, %v2194_v46  ;;  %v1696_v46 = vadd.f32 %v4275_v58, %v3942_v25  ;;  %v2660_v56 = vadd.f32 %v2659_v4, %v2370_v24  ;;  %v4444_v24 = vld [vmem:[#allocation7_spill] sm:$0xff] }
 0x2b0   : > { %v2375_v14 = vmax.f32 %v2118_v50, 0.0 }
 0x2b1   : > { %v2460_v33 = vadd.f32 %v2459_v19, %v2195_v63  ;;  %v2372_v63 = vmax.f32 %v2111_v61, 0.0  ;;  %v1698_v19 = vadd.f32 %v4275_v58, %v3953_v52  ;;  %v2661_v17 = vadd.f32 %v2660_v56, %v2371_v36  ;;  %v4445_v36 = vld [vmem:[#allocation8_spill] sm:$0xff] }
 0x2b2   : > { %v2206_v28 = vmax.f32 %v1696_v46, 0.0  ;;  %v1716_v61 = vadd.f32 %v4275_v58, %v4444_v24 }
 0x2b3   : > { %v2461_v55 = vadd.f32 %v2460_v33, %v2196_v8  ;;  %v2373_v8 = vmax.f32 %v2113_v41, 0.0  ;;  %v1701_v33 = vadd.f32 %v4275_v58, %v3960_v15  ;;  %v2662_v6 = vadd.f32 %v2661_v17, %v2372_v63 }
 0x2b4   : > { %v2207_v57 = vmax.f32 %v1698_v19, 0.0  ;;  %v1708_v15 = vadd.f32 %v4275_v58, %v4438_v23  ;;  %v1718_v41 = vadd.f32 %v4275_v58, %v4445_v36  ;;  %v2214_v56 = vmax.f32 %v1716_v61, 0.0 }
 0x2b5   : > { %v2462_v0 = vadd.f32 %v2461_v55, %v2197_v60  ;;  %v2374_v60 = vmax.f32 %v2116_v62, 0.0  ;;  %v4436_v55 = vld [vmem:[#allocation2_spill] sm:$0xff]  ;;  %v2208_v52 = vmax.f32 %v1701_v33, 0.0 }
 0x2b6   : > { %v1703_v40 = vadd.f32 %v4275_v58, %v4436_v55  ;;  %v2211_v32 = vmax.f32 %v1708_v15, 0.0  ;;  %v2215_v19 = vmax.f32 %v1718_v41, 0.0 }
 0x2b7   : > { %v2463_v54 = vadd.f32 %v2462_v0, %v2198_v49  ;;  %v2663_v49 = vadd.f32 %v2662_v6, %v2373_v8  ;;  %v4437_v0 = vld [vmem:[#allocation3_spill] sm:$0xff] }
 0x2b8   : > { %v1706_v7 = vadd.f32 %v4275_v58, %v4437_v0  ;;  %v2209_v20 = vmax.f32 %v1703_v40, 0.0 }
 0x2b9   : > { %v2464_v35 = vadd.f32 %v2463_v54, %v2199_v22  ;;  %v2664_v22 = vadd.f32 %v2663_v49, %v2374_v60 }
 0x2bb   : > { %v2465_v27 = vadd.f32 %v2464_v35, %v2200_v29  ;;  %v2665_v44 = vadd.f32 %v2664_v22, %v2375_v14  ;;  %v2210_v29 = vmax.f32 %v1706_v7, 0.0  ;;  %v1711_v35 = vadd.f32 %v4275_v58, %v4440_v11 }
 0x2bd   : > { %v2466_v51 = vadd.f32 %v2465_v27, %v2201_v9  ;;  %v2592_v9 = vrot.slane %v4326_v37, 4  ;;  %v4442_v27 = vld [vmem:[#allocation6_spill] sm:$0xff]  ;;  %v2212_v10 = vmax.f32 %v1711_v35, 0.0 }
 0x2be   : > { %v1713_v26 = vadd.f32 %v4275_v58, %v4442_v27 }
 0x2bf   : > { %v2467_v34 = vadd.f32 %v2466_v51, %v2202_v16  ;;  %v2666_v51 = vrot.slane %v2665_v44, 4 }
 0x2c0   : > { %v2213_v4 = vmax.f32 %v1713_v26, 0.0 }
 0x2c1   : > { %v2468_v38 = vadd.f32 %v2467_v34, %v2203_v39  ;;  %v2556_v39 = vadd.f32 %v2555_v12, %v4441_v5  ;;  %v2593_v34 = vadd.f32 %v2592_v9, %v4326_v37  ;;  %v2667_v45 = vadd.f32 %v2666_v51, %v2665_v44 }
 0x2c3   : > { %v2469_v3 = vadd.f32 %v2468_v38, %v2204_v1  ;;  %v2630_v1 = vadd.f32 %v2629_v47, %v4443_v53  ;;  %v2520_v38 = vrot.slane %v2519_v59, 2  ;;  %v2557_v63 = vrot.slane %v2556_v39, 2 }
 0x2c4   : > { %v2668_v50 = vrot.slane %v2667_v45, 2 }
 0x2c5   : > { %v2470_v25 = vadd.f32 %v2469_v3, %v2205_v43  ;;  %v2594_v43 = vrot.slane %v2593_v34, 2  ;;  %v2631_v3 = vrot.slane %v2630_v1, 2  ;;  %v2521_v8 = vadd.f32 %v2520_v38, %v2519_v59 }
 0x2c6   : > { %v2669_v60 = vadd.f32 %v2668_v50, %v2667_v45 }
 0x2c7   : > { %v2471_v13 = vadd.f32 %v2470_v25, %v2206_v28  ;;  %v2558_v28 = vadd.f32 %v2557_v63, %v2556_v39  ;;  %v2595_v33 = vadd.f32 %v2594_v43, %v2593_v34  ;;  %v2632_v25 = vadd.f32 %v2631_v3, %v2630_v1 }
 0x2c8   : > { %v2522_v58 = vrot.slane %v2521_v8, 1 }
 0x2c9   : > { %v2472_v30 = vadd.f32 %v2471_v13, %v2207_v57  ;;  %v2559_v57 = vrot.slane %v2558_v28, 1  ;;  %v2596_v40 = vrot.slane %v2595_v33, 1  ;;  %v2633_v13 = vrot.slane %v2632_v25, 1 }
 0x2ca   : > { %v2523_v14 = vadd.f32 %v2522_v58, %v2521_v8 }
 0x2cb   : > { %v2473_v54 = vadd.f32 %v2472_v30, %v2208_v52  ;;  %v2670_v52 = vrot.slane %v2669_v60, 1  ;;  %v2560_v0 = vadd.f32 %v2559_v57, %v2558_v28  ;;  %v2597_v30 = vadd.f32 %v2596_v40, %v2595_v33 }
 0x2cc   : > { %v2634_v22 = vadd.f32 %v2633_v13, %v2632_v25  ;;  %v2682_v23 = vmul.f32 %v4289_v21, %v2523_v14 }
 0x2cd   : > { %v2474_v42 = vadd.f32 %v2473_v54, %v2209_v20  ;;  %v2671_v15 = vadd.f32 %v2670_v52, %v2669_v60  ;;  %v2683_v54 = vmul.f32 %v4289_v21, %v2560_v0  ;;  %v2684_v2 = vmul.f32 %v4289_v21, %v2597_v30 }
 0x2ce   : > { %v2685_v44 = vmul.f32 %v4289_v21, %v2634_v22  ;;  %v2690_v11 = vpack.c.bf16 %v2682_v23, %v2682_v23 }
 0x2cf   : > { %v2475_v16 = vadd.f32 %v2474_v42, %v2210_v29  ;;  %v2686_v35 = vmul.f32 %v4289_v21, %v2671_v15  ;;  %v2691_v5 = vpack.c.bf16 %v2683_v54, %v2683_v54  ;;  %v2692_v42 = vpack.c.bf16 %v2684_v2, %v2684_v2 }
 0x2d0   : > { %v2693_v9 = vpack.c.bf16 %v2685_v44, %v2685_v44  ;;  %v2712_v27 = vunpack.c.l.b16 %v2690_v11 }
 0x2d1   : > { %v2476_v18 = vadd.f32 %v2475_v16, %v2211_v32  ;;  %v2694_v26 = vpack.c.bf16 %v2686_v35, %v2686_v35  ;;  %v2713_v53 = vunpack.c.l.b16 %v2691_v5  ;;  %v2714_v16 = vunpack.c.l.b16 %v2692_v42 }
 0x2d3   : > { %v2477_v46 = vadd.f32 %v2476_v18, %v2212_v10  ;;  %v2716_v10 = vunpack.c.l.b16 %v2694_v26 }
 0x2d5   : > { %v2478_v62 = vadd.f32 %v2477_v46, %v2213_v4 }
 0x2d7   : > { %v2479_v17 = vadd.f32 %v2478_v62, %v2214_v56 }
 0x2d9   : > { %v2480_v37 = vadd.f32 %v2479_v17, %v2215_v19 }
 0x2db   : > { %v2481_v6 = vrot.slane %v2480_v37, 4 }
 0x2dd   : > { %v2482_v55 = vadd.f32 %v2481_v6, %v2480_v37 }
 0x2df   : > { %v2483_v49 = vrot.slane %v2482_v55, 2 }
 0x2e1   : > { %v2484_v7 = vadd.f32 %v2483_v49, %v2482_v55 }
 0x2e3   : > { %v2485_v20 = vrot.slane %v2484_v7, 1 }
 0x2e5   : > { %v2486_v48 = vadd.f32 %v2485_v20, %v2484_v7 }
 0x2e7   : > { %v2681_v29 = vmul.f32 %v4289_v21, %v2486_v48  ;;  %v2715_v21 = vunpack.c.l.b16 %v2693_v9 }
 0x2e9   : > { %v2689_v12 = vpack.c.bf16 %v2681_v29, %v2681_v29 }
 0x2eb   : > { %v2711_v32 = vunpack.c.l.b16 %v2689_v12 }
 0x2ed   : > { %v2720_v47 = vsel %vm2719_vm3, %v2711_v32, %v4314_v31  ;;  %v3626_v31 = vld [vmem:[%s4421_s2 + $0x1] ss:$0 sm:$0xff] }
 0x2ee   : > { %v2722_v59 = vsel %vm2721_vm4, %v2712_v27, %v2720_v47 }
 0x2ef   : > { %v2724_v51 = vsel %vm2723_vm5, %v2713_v53, %v2722_v59 }
 0x2f0   : > { %v2726_v24 = vsel %vm2725_vm6, %v2714_v16, %v2724_v51 }
 0x2f1   : > { %v2728_v61 = vsel %vm2727_vm7, %v2715_v21, %v2726_v24 }
 0x2f2   : > { %v2730_v39 = vsel %vm2729_vm8, %v2716_v10, %v2728_v61 }
 0x2f3   : > { %v2731_v18 = vpack.c.b16 %v2730_v39, %v2730_v39 }
 0x2f5   : > { %2753 = vmatmul.bf16.vlgmr.msrb.gmra.mxu1 %v2731_v18 }
 0x372   : > { %v2754_v34 = vpop.f32.mrf.mxu1 }
 0x373   : > { %v2755_v4 = vadd.f32 %v3626_v31, %v2754_v34 }
 0x375   : > { %2758 = vst.msk [vmem:[%s170_s11] sm:$0xff] %vm1086_vm0, %v2755_v4 }
 0x37a   : > { %v2756_v36 = vpop.f32.mrf.mxu1 }
 0x37b PF: > { %s13_s12 = sadd.s32 1, %s3637_s12  }
 0x37c   : > { %p10_p5 = scmp.ge.s32.totalorder %s13_s12, 4  }
 0x37e   :  { %12 = sbr.rel (!%p10_p5) target bundleno = 1 (0x1), region = 62 }

// kernel: deepseqslam_forward.3
= control target key start
LH: loop header
LB: loop body
LE: loop exit
PB: predicated region body
PF: predicated region fallthrough
CT: control target
= control target key end

     0   :  { %vm38_vm0 = vcmask 1043456   ;;  %vm34_vm1 = vcmask 64512   ;;  %s890_s0 = inlined_call_operand.vmem [shape: f32[16,32], index: 0, kind: input, shape index: {}]   ;;  %s891_s1 = inlined_call_operand.vmem [shape: bf16[16,8], index: 1, kind: input, shape index: {}]   ;;  %s892_s2 = inlined_call_operand.vmem [shape: bf16[104,128], index: 2, kind: input, shape index: {}]   ;;  %s893_s3 = inlined_call_operand.vmem [shape: f32[2,128], index: 3, kind: input, shape index: {}]   ;;  %s894_s4 = inlined_call_operand.hbm [shape: f32[2,10], index: 4, kind: output, shape index: {}]  }
   0x1   :  { %v28_v0 = vld [vmem:[%s892_s2 + $0x10] sm:$0xf]  ;;  %v679_v1 = vld [vmem:[%s892_s2 + $0x8] sm:$0xff]  ;;  %v682_v2 = vld [vmem:[%s892_s2 + $0x1c] sm:$0xff] }
   0x2   :  { %v40_v3 = vsel %vm38_vm0, %v28_v0, 0  ;;  %v680_v4 = vld [vmem:[%s891_s1] sm:$0xff]  ;;  %78 = vmatpush.bf16.msra.mxu1 %v679_v1  ;;  %v20_v7 = vld [vmem:[%s890_s0 + $0x8] sm:$0xff]  ;;  %118 = vmatpush.bf16.msra.mxu2 %v682_v2  ;;  %v681_v8 = vld [vmem:[%s892_s2 + $0x14] sm:$0xff] }
   0x3   :  { %v678_v5 = vld [vmem:[%s892_s2] sm:$0xff]  ;;  %49 = vmatpush.bf16.msra.mxu0 %v40_v3  ;;  %177 = vmatpush.bf16.msra.mxu3 %v682_v2 }
   0x4   :  { %v19_v6 = vld [vmem:[%s890_s0] sm:$0xff] }
   0x5   :  { %9 = vsyncpa [#allocation4], 0  ;;  %v21_v9 = vpack.c.bf16 %v20_v7, %v19_v6  ;;  %vm68_vm2 = vcmask 261120   ;;  %v781_v10 = vmov 0   ;;  %v689_v12 = vld [vmem:[%s893_s3] ss:$0 sm:$0xff] }
   0x6   :  { %636 = vmatmul.msk.bf16.vlgmr.msra.gmra.mxu0 %vm34_vm1, %v680_v4  ;;  %79 = vmatpush.bf16.msra.mxu1 %v678_v5  ;;  %s782_s5 = smov 64   ;;  %s783_s6 = smov 32  }
   0x7   :  { %236 = vmatpush.bf16.msrb.mxu0 %v682_v2  ;;  %119 = vmatpush.bf16.msra.mxu2 %v681_v8  ;;  %s784_s13 = smov [#allocation3]   ;;  %s623_s17 = sshll.u32 %s894_s4, 4  ;;  %s624_s17 = int_to_ptr.hbm [resolvable:$true] %s623_s17 }
   0x8   :  { %178 = vmatpush.bf16.msra.mxu3 %v681_v8  ;;  %s621_s14 = sshll.u32 %s784_s13, 4  ;;  %s622_s14 = int_to_ptr.vmem [resolvable:$true] %s621_s14 }
   0x9   :  { %645 = vmatmul.msk.bf16.vlgmr.msra.gmra.mxu1 %vm68_vm2, %v21_v9 }
   0xa   :  { %295 = vmatpush.bf16.msrb.mxu1 %v682_v2  ;;  %120 = vmatmul.bf16.vlgmr.msra.gmra.mxu2 %v781_v10 }
   0xb   :  { %237 = vmatpush.bf16.msrb.mxu0 %v681_v8  ;;  %354 = vmatpush.bf16.msrb.mxu2 %v682_v2 }
   0xc   :  { %413 = vmatpush.bf16.msrb.mxu3 %v682_v2 }
   0xe   :  { %296 = vmatpush.bf16.msrb.mxu1 %v681_v8 }
   0xf   :  { %472 = vmatpush.bf16.msra.mxu0 %v682_v2  ;;  %355 = vmatpush.bf16.msrb.mxu2 %v681_v8 }
  0x10   :  { %414 = vmatpush.bf16.msrb.mxu3 %v681_v8 }
  0x12   :  { %531 = vmatpush.bf16.msra.mxu1 %v682_v2 }
  0x13   :  { %473 = vmatpush.bf16.msra.mxu0 %v681_v8 }
  0x16   :  { %532 = vmatpush.bf16.msra.mxu1 %v681_v8 }
  0x83   :  { %v51_v11 = vpop.f32.mrf.mxu0 }
  0x86   :  { %v81_v13 = vpop.f32.mrf.mxu1 }
  0x87   :  { %v82_v14 = vadd.f32 %v81_v13, %v51_v11 }
  0x89   :  { %v88_v15 = vadd.f32 %v689_v12, %v82_v14 }
  0x8b   :  { %90 = vst [vmem:[#allocation2] sm:$0xff] %v88_v15  ;;  %v53_v17 = vpop.f32.mrf.mxu0 }
  0x8d   :  { %v121_v16 = vpop.f32.mrf.mxu2 }
  0x8e   :  { %v83_v18 = vpop.f32.mrf.mxu1 }
  0x8f   :  { %v84_v19 = vadd.f32 %v83_v18, %v53_v17 }
  0x91   :  { %v89_v20 = vadd.f32 %v689_v12, %v84_v19 }
  0x92   :  { %v96_v21 = vld [vmem:[#allocation2] sm:$0x3]  ;;  %v163_v48 = vld [vmem:[#allocation2 + $0x2] sm:$0x3]  ;;  %v222_v12 = vld [vmem:[#allocation2 + $0x4] sm:$0x3] }
  0x93   :  { %v125_v22 = vadd.f32 %v121_v16, %v96_v21  ;;  %91 = vst [vmem:[#allocation2 + $0x8] sm:$0xff] %v89_v20 }
  0x95   :  { %691 = vtanh.f32 %v125_v22  ;;  %v123_v23 = vpop.f32.mrf.mxu2  ;;  %v654_v25 = vmul.f32 -1.442695, %v125_v22 }
  0x97   :  { %693 = vpow2.f32 %v654_v25 }
  0x9b   :  { %v692_v24 = vpop.eup %691 }
  0x9c   :  { %148 = vrot.lane.b32.xlu0 %v692_v24, %s782_s5 }
  0x9d   :  { %v694_v26 = vpop.eup %693 }
  0x9e   :  { %v129_v27 = vadd.f32 1.0, %v694_v26 }
  0xa0   :  { %695 = vrcp.f32 %v129_v27  ;;  %v141_v33 = vand.u32 2147483648, %v129_v27  ;;  %vm135_vm4 = vweird.f32 %v129_v27  ;;  %v139_v34 = vand.u32 2147483647, %v129_v27 }
  0xa2   :  { %v142_v36 = vor.u32 1.1754944e-38, %v141_v33  ;;  %vm140_vm6 = vcmp.eq.f32.partialorder %v139_v34, 8.507059e+37 }
  0xa6   :  { %v696_v28 = vpop.eup %695 }
  0xa7   :  { %v131_v29 = vmul.f32 %v696_v28, %v129_v27  ;;  %vm136_vm3 = vweird.f32 %v696_v28 }
  0xa8   :  { %vm137_vm5 = vmor %vm135_vm4, %vm136_vm3 }
  0xa9   :  { %v132_v30 = vsub.f32 1.0, %v131_v29 }
  0xab   :  { %v133_v31 = vmul.f32 %v696_v28, %v132_v30 }
  0xad   :  { %v134_v32 = vadd.f32 %v696_v28, %v133_v31 }
  0xaf   :  { %v138_v35 = vsel %vm137_vm5, %v696_v28, %v134_v32 }
  0xb0   :  { %v143_v38 = vsel %vm140_vm6, %v142_v36, %v138_v35 }
  0xb1   :  { %v146_v40 = vmul.f32 0.0, %v143_v38 }
 0x10e   :  { %v149_v37 = vpop.permute.xlu0 %148 }
 0x10f   :  { %v151_v39 = vmul.f32 %v149_v37, %v143_v38 }
 0x111   :  { %153 = vrot.lane.b32.xlu0 %v151_v39, %s783_s6 }
 0x183   :  { %v154_v41 = vpop.permute.xlu0 %153 }
 0x184   :  { %v156_v42 = vadd.f32 %v154_v41, %v146_v40  ;;  %v281_v40 = vld [vmem:[#allocation2 + $0x6] sm:$0x3] }
 0x186   :  { %697 = vtanh.f32 %v156_v42 }
 0x18c   :  { %v698_v43 = vpop.eup %697 }
 0x18d   :  { %159 = vrot.lane.b32.xlu1 %v698_v43, %s782_s5 }
 0x1ff   :  { %v160_v44 = vpop.permute.xlu1 %159 }
 0x200   :  { %v162_v45 = vmul.f32 %v160_v44, %v143_v38 }
 0x202   :  { %v164_v46 = vpack.c.bf16 %v162_v45, %v162_v45 }
 0x204   :  { %166 = vrot.lane.b32.xlu1 %v164_v46, %s783_s6 }
 0x276   :  { %v167_v47 = vpop.permute.xlu1 %166 }
 0x277   :  { %655 = vmatmul.msk.bf16.vlgmr.msra.gmra.mxu3 %vm68_vm2, %v167_v47 }
 0x2fa   :  { %v180_v49 = vpop.f32.mrf.mxu3 }
 0x2fb   :  { %v184_v50 = vadd.f32 %v180_v49, %v163_v48 }
 0x2fd   :  { %699 = vtanh.f32 %v184_v50  ;;  %v656_v53 = vmul.f32 -1.442695, %v184_v50 }
 0x2ff   :  { %701 = vpow2.f32 %v656_v53 }
 0x302   :  { %v182_v51 = vpop.f32.mrf.mxu3 }
 0x303   :  { %v700_v52 = vpop.eup %699 }
 0x304   :  { %207 = vrot.lane.b32.xlu2 %v700_v52, %s782_s5 }
 0x305   :  { %v702_v54 = vpop.eup %701 }
 0x306   :  { %v188_v55 = vadd.f32 1.0, %v702_v54 }
 0x308   :  { %703 = vrcp.f32 %v188_v55  ;;  %v200_v61 = vand.u32 2147483648, %v188_v55  ;;  %vm194_vm8 = vweird.f32 %v188_v55  ;;  %v198_v62 = vand.u32 2147483647, %v188_v55 }
 0x30a   :  { %v201_v0 = vor.u32 1.1754944e-38, %v200_v61  ;;  %vm199_vm10 = vcmp.eq.f32.partialorder %v198_v62, 8.507059e+37 }
 0x30e   :  { %v704_v56 = vpop.eup %703 }
 0x30f   :  { %v190_v57 = vmul.f32 %v704_v56, %v188_v55  ;;  %vm195_vm7 = vweird.f32 %v704_v56 }
 0x310   :  { %vm196_vm9 = vmor %vm194_vm8, %vm195_vm7 }
 0x311   :  { %v191_v58 = vsub.f32 1.0, %v190_v57 }
 0x313   :  { %v192_v59 = vmul.f32 %v704_v56, %v191_v58 }
 0x315   :  { %v193_v60 = vadd.f32 %v704_v56, %v192_v59 }
 0x317   :  { %v197_v63 = vsel %vm196_vm9, %v704_v56, %v193_v60 }
 0x318   :  { %v202_v2 = vsel %vm199_vm10, %v201_v0, %v197_v63 }
 0x319   :  { %v205_v4 = vmul.f32 %v202_v2, %v156_v42 }
 0x35e   :  { %v208_v1 = vpop.permute.xlu2 %207 }
 0x35f   :  { %v210_v3 = vmul.f32 %v208_v1, %v202_v2 }
 0x361   :  { %212 = vrot.lane.b32.xlu2 %v210_v3, %s783_s6 }
 0x3bb   :  { %v213_v5 = vpop.permute.xlu2 %212 }
 0x3bc   :  { %v215_v6 = vadd.f32 %v213_v5, %v205_v4  ;;  %v340_v4 = vld [vmem:[#allocation2 + $0x8] sm:$0x3] }
 0x3be   :  { %705 = vtanh.f32 %v215_v6 }
 0x3c4   :  { %v706_v7 = vpop.eup %705 }
 0x3c5   :  { %218 = vrot.lane.b32.xlu0 %v706_v7, %s782_s5 }
 0x437   :  { %v219_v8 = vpop.permute.xlu0 %218 }
 0x438   :  { %v221_v9 = vmul.f32 %v219_v8, %v202_v2 }
 0x43a   :  { %v223_v10 = vpack.c.bf16 %v221_v9, %v221_v9 }
 0x43c   :  { %225 = vrot.lane.b32.xlu1 %v223_v10, %s783_s6 }
 0x4ae   :  { %v226_v11 = vpop.permute.xlu1 %225 }
 0x4af   :  { %657 = vmatmul.msk.bf16.vlgmr.msrb.gmra.mxu0 %vm68_vm2, %v226_v11 }
 0x52c   :  { %v239_v13 = vpop.f32.mrf.mxu0 }
 0x52d   :  { %v243_v14 = vadd.f32 %v239_v13, %v222_v12 }
 0x52f   :  { %707 = vtanh.f32 %v243_v14  ;;  %v658_v17 = vmul.f32 -1.442695, %v243_v14 }
 0x531   :  { %709 = vpow2.f32 %v658_v17 }
 0x534   :  { %v241_v15 = vpop.f32.mrf.mxu0 }
 0x535   :  { %v708_v16 = vpop.eup %707 }
 0x536   :  { %266 = vrot.lane.b32.xlu2 %v708_v16, %s782_s5 }
 0x537   :  { %v710_v18 = vpop.eup %709 }
 0x538   :  { %v247_v19 = vadd.f32 1.0, %v710_v18 }
 0x53a   :  { %711 = vrcp.f32 %v247_v19  ;;  %v259_v25 = vand.u32 2147483648, %v247_v19  ;;  %vm253_vm12 = vweird.f32 %v247_v19  ;;  %v257_v26 = vand.u32 2147483647, %v247_v19 }
 0x53c   :  { %v260_v28 = vor.u32 1.1754944e-38, %v259_v25  ;;  %vm258_vm14 = vcmp.eq.f32.partialorder %v257_v26, 8.507059e+37 }
 0x540   :  { %v712_v20 = vpop.eup %711 }
 0x541   :  { %v249_v21 = vmul.f32 %v712_v20, %v247_v19  ;;  %vm254_vm11 = vweird.f32 %v712_v20 }
 0x542   :  { %vm255_vm13 = vmor %vm253_vm12, %vm254_vm11 }
 0x543   :  { %v250_v22 = vsub.f32 1.0, %v249_v21 }
 0x545   :  { %v251_v23 = vmul.f32 %v712_v20, %v250_v22 }
 0x547   :  { %v252_v24 = vadd.f32 %v712_v20, %v251_v23 }
 0x549   :  { %v256_v27 = vsel %vm255_vm13, %v712_v20, %v252_v24 }
 0x54a   :  { %v261_v30 = vsel %vm258_vm14, %v260_v28, %v256_v27 }
 0x54b   :  { %v264_v32 = vmul.f32 %v261_v30, %v215_v6 }
 0x590   :  { %v267_v29 = vpop.permute.xlu2 %266 }
 0x591   :  { %v269_v31 = vmul.f32 %v267_v29, %v261_v30 }
 0x593   :  { %271 = vrot.lane.b32.xlu0 %v269_v31, %s783_s6 }
 0x605   :  { %v272_v33 = vpop.permute.xlu0 %271 }
 0x606   :  { %v274_v34 = vadd.f32 %v272_v33, %v264_v32  ;;  %v399_v32 = vld [vmem:[#allocation2 + $0xa] sm:$0x3] }
 0x608   :  { %713 = vtanh.f32 %v274_v34 }
 0x60e   :  { %v714_v35 = vpop.eup %713 }
 0x60f   :  { %277 = vrot.lane.b32.xlu1 %v714_v35, %s782_s5 }
 0x681   :  { %v278_v36 = vpop.permute.xlu1 %277 }
 0x682   :  { %v280_v37 = vmul.f32 %v278_v36, %v261_v30 }
 0x684   :  { %v282_v38 = vpack.c.bf16 %v280_v37, %v280_v37 }
 0x686   :  { %284 = vrot.lane.b32.xlu2 %v282_v38, %s783_s6 }
 0x6e0   :  { %v285_v39 = vpop.permute.xlu2 %284 }
 0x6e1   :  { %659 = vmatmul.msk.bf16.vlgmr.msrb.gmra.mxu1 %vm68_vm2, %v285_v39 }
 0x75e   :  { %v298_v41 = vpop.f32.mrf.mxu1 }
 0x75f   :  { %v302_v42 = vadd.f32 %v298_v41, %v281_v40 }
 0x761   :  { %715 = vtanh.f32 %v302_v42  ;;  %v660_v45 = vmul.f32 -1.442695, %v302_v42 }
 0x763   :  { %717 = vpow2.f32 %v660_v45 }
 0x766   :  { %v300_v43 = vpop.f32.mrf.mxu1 }
 0x767   :  { %v716_v44 = vpop.eup %715 }
 0x768   :  { %325 = vrot.lane.b32.xlu0 %v716_v44, %s782_s5 }
 0x769   :  { %v718_v46 = vpop.eup %717 }
 0x76a   :  { %v306_v47 = vadd.f32 1.0, %v718_v46 }
 0x76c   :  { %719 = vrcp.f32 %v306_v47  ;;  %v318_v53 = vand.u32 2147483648, %v306_v47  ;;  %vm312_vm0 = vweird.f32 %v306_v47  ;;  %v316_v54 = vand.u32 2147483647, %v306_v47 }
 0x76e   :  { %v319_v56 = vor.u32 1.1754944e-38, %v318_v53  ;;  %vm317_vm3 = vcmp.eq.f32.partialorder %v316_v54, 8.507059e+37 }
 0x772   :  { %v720_v48 = vpop.eup %719 }
 0x773   :  { %v308_v49 = vmul.f32 %v720_v48, %v306_v47  ;;  %vm313_vm15 = vweird.f32 %v720_v48 }
 0x774   :  { %vm314_vm1 = vmor %vm312_vm0, %vm313_vm15 }
 0x775   :  { %v309_v50 = vsub.f32 1.0, %v308_v49 }
 0x777   :  { %v310_v51 = vmul.f32 %v720_v48, %v309_v50 }
 0x779   :  { %v311_v52 = vadd.f32 %v720_v48, %v310_v51 }
 0x77b   :  { %v315_v55 = vsel %vm314_vm1, %v720_v48, %v311_v52 }
 0x77c   :  { %v320_v58 = vsel %vm317_vm3, %v319_v56, %v315_v55 }
 0x77d   :  { %v323_v60 = vmul.f32 %v320_v58, %v274_v34 }
 0x7da   :  { %v326_v57 = vpop.permute.xlu0 %325 }
 0x7db   :  { %v328_v59 = vmul.f32 %v326_v57, %v320_v58 }
 0x7dd   :  { %330 = vrot.lane.b32.xlu1 %v328_v59, %s783_s6 }
 0x84f   :  { %v331_v61 = vpop.permute.xlu1 %330 }
 0x850   :  { %v333_v62 = vadd.f32 %v331_v61, %v323_v60  ;;  %v458_v60 = vld [vmem:[#allocation2 + $0xc] sm:$0x3] }
 0x852   :  { %721 = vtanh.f32 %v333_v62 }
 0x858   :  { %v722_v63 = vpop.eup %721 }
 0x859   :  { %336 = vrot.lane.b32.xlu2 %v722_v63, %s782_s5 }
 0x8b3   :  { %v337_v0 = vpop.permute.xlu2 %336 }
 0x8b4   :  { %v339_v1 = vmul.f32 %v337_v0, %v320_v58 }
 0x8b6   :  { %v341_v2 = vpack.c.bf16 %v339_v1, %v339_v1 }
 0x8b8   :  { %343 = vrot.lane.b32.xlu0 %v341_v2, %s783_s6 }
 0x92a   :  { %v344_v3 = vpop.permute.xlu0 %343 }
 0x92b   :  { %661 = vmatmul.msk.bf16.vlgmr.msrb.gmra.mxu2 %vm68_vm2, %v344_v3 }
 0x9ae   :  { %v357_v5 = vpop.f32.mrf.mxu2 }
 0x9af   :  { %v361_v6 = vadd.f32 %v357_v5, %v340_v4 }
 0x9b1   :  { %723 = vtanh.f32 %v361_v6  ;;  %v662_v9 = vmul.f32 -1.442695, %v361_v6 }
 0x9b3   :  { %725 = vpow2.f32 %v662_v9 }
 0x9b6   :  { %v359_v7 = vpop.f32.mrf.mxu2 }
 0x9b7   :  { %v724_v8 = vpop.eup %723 }
 0x9b8   :  { %384 = vrot.lane.b32.xlu1 %v724_v8, %s782_s5 }
 0x9b9   :  { %v726_v10 = vpop.eup %725 }
 0x9ba   :  { %v365_v11 = vadd.f32 1.0, %v726_v10 }
 0x9bc   :  { %727 = vrcp.f32 %v365_v11  ;;  %v377_v17 = vand.u32 2147483648, %v365_v11  ;;  %vm371_vm5 = vweird.f32 %v365_v11  ;;  %v375_v18 = vand.u32 2147483647, %v365_v11 }
 0x9be   :  { %v378_v20 = vor.u32 1.1754944e-38, %v377_v17  ;;  %vm376_vm7 = vcmp.eq.f32.partialorder %v375_v18, 8.507059e+37 }
 0x9c2   :  { %v728_v12 = vpop.eup %727 }
 0x9c3   :  { %v367_v13 = vmul.f32 %v728_v12, %v365_v11  ;;  %vm372_vm4 = vweird.f32 %v728_v12 }
 0x9c4   :  { %vm373_vm6 = vmor %vm371_vm5, %vm372_vm4  ;;  %vm614_vm5 = vcmask 74752  }
 0x9c5   :  { %v368_v14 = vsub.f32 1.0, %v367_v13 }
 0x9c7   :  { %v369_v15 = vmul.f32 %v728_v12, %v368_v14 }
 0x9c9   :  { %v370_v16 = vadd.f32 %v728_v12, %v369_v15 }
 0x9cb   :  { %v374_v19 = vsel %vm373_vm6, %v728_v12, %v370_v16 }
 0x9cc   :  { %v379_v22 = vsel %vm376_vm7, %v378_v20, %v374_v19 }
 0x9cd   :  { %v382_v24 = vmul.f32 %v379_v22, %v333_v62 }
 0xa2a   :  { %v385_v21 = vpop.permute.xlu1 %384 }
 0xa2b   :  { %v387_v23 = vmul.f32 %v385_v21, %v379_v22 }
 0xa2d   :  { %389 = vrot.lane.b32.xlu2 %v387_v23, %s783_s6 }
 0xa87   :  { %v390_v25 = vpop.permute.xlu2 %389 }
 0xa88   :  { %v392_v26 = vadd.f32 %v390_v25, %v382_v24  ;;  %v517_v24 = vld [vmem:[#allocation2 + $0xe] sm:$0x3] }
 0xa8a   :  { %729 = vtanh.f32 %v392_v26 }
 0xa90   :  { %v730_v27 = vpop.eup %729 }
 0xa91   :  { %395 = vrot.lane.b32.xlu0 %v730_v27, %s782_s5 }
 0xb03   :  { %v396_v28 = vpop.permute.xlu0 %395 }
 0xb04   :  { %v398_v29 = vmul.f32 %v396_v28, %v379_v22 }
 0xb06   :  { %v400_v30 = vpack.c.bf16 %v398_v29, %v398_v29 }
 0xb08   :  { %402 = vrot.lane.b32.xlu1 %v400_v30, %s783_s6 }
 0xb7a   :  { %v403_v31 = vpop.permute.xlu1 %402 }
 0xb7b   :  { %663 = vmatmul.msk.bf16.vlgmr.msrb.gmra.mxu3 %vm68_vm2, %v403_v31 }
 0xbfe   :  { %v416_v33 = vpop.f32.mrf.mxu3 }
 0xbff   :  { %v420_v34 = vadd.f32 %v416_v33, %v399_v32 }
 0xc01   :  { %731 = vtanh.f32 %v420_v34  ;;  %v664_v37 = vmul.f32 -1.442695, %v420_v34 }
 0xc03   :  { %733 = vpow2.f32 %v664_v37 }
 0xc06   :  { %v418_v35 = vpop.f32.mrf.mxu3 }
 0xc07   :  { %v732_v36 = vpop.eup %731 }
 0xc08   :  { %443 = vrot.lane.b32.xlu2 %v732_v36, %s782_s5 }
 0xc09   :  { %v734_v38 = vpop.eup %733 }
 0xc0a   :  { %v424_v39 = vadd.f32 1.0, %v734_v38 }
 0xc0c   :  { %735 = vrcp.f32 %v424_v39  ;;  %v436_v45 = vand.u32 2147483648, %v424_v39  ;;  %vm430_vm9 = vweird.f32 %v424_v39  ;;  %v434_v46 = vand.u32 2147483647, %v424_v39 }
 0xc0e   :  { %v437_v48 = vor.u32 1.1754944e-38, %v436_v45  ;;  %vm435_vm11 = vcmp.eq.f32.partialorder %v434_v46, 8.507059e+37 }
 0xc12   :  { %v736_v40 = vpop.eup %735 }
 0xc13   :  { %v426_v41 = vmul.f32 %v736_v40, %v424_v39  ;;  %vm431_vm8 = vweird.f32 %v736_v40 }
 0xc14   :  { %vm432_vm10 = vmor %vm430_vm9, %vm431_vm8 }
 0xc15   :  { %v427_v42 = vsub.f32 1.0, %v426_v41 }
 0xc17   :  { %v428_v43 = vmul.f32 %v736_v40, %v427_v42 }
 0xc19   :  { %v429_v44 = vadd.f32 %v736_v40, %v428_v43 }
 0xc1b   :  { %v433_v47 = vsel %vm432_vm10, %v736_v40, %v429_v44 }
 0xc1c   :  { %v438_v50 = vsel %vm435_vm11, %v437_v48, %v433_v47  ;;  %v684_v48 = vld [vmem:[%s892_s2 + $0x2c] sm:$0xff] }
 0xc1d   :  { %v441_v52 = vmul.f32 %v438_v50, %v392_v26  ;;  %607 = vmatpush.bf16.msra.mxu2 %v684_v48 }
 0xc62   :  { %v444_v49 = vpop.permute.xlu2 %443 }
 0xc63   :  { %v446_v51 = vmul.f32 %v444_v49, %v438_v50  ;;  %v683_v49 = vld [vmem:[%s892_s2 + $0x24] sm:$0xff] }
 0xc64   :  { %608 = vmatpush.bf16.msra.mxu2 %v683_v49 }
 0xc65   :  { %448 = vrot.lane.b32.xlu0 %v446_v51, %s783_s6 }
 0xcd7   :  { %v449_v53 = vpop.permute.xlu0 %448 }
 0xcd8   :  { %v451_v54 = vadd.f32 %v449_v53, %v441_v52 }
 0xcda   :  { %737 = vtanh.f32 %v451_v54 }
 0xce0   :  { %v738_v55 = vpop.eup %737 }
 0xce1   :  { %454 = vrot.lane.b32.xlu1 %v738_v55, %s782_s5 }
 0xd53   :  { %v455_v56 = vpop.permute.xlu1 %454 }
 0xd54   :  { %v457_v57 = vmul.f32 %v455_v56, %v438_v50 }
 0xd56   :  { %v459_v58 = vpack.c.bf16 %v457_v57, %v457_v57 }
 0xd58   :  { %461 = vrot.lane.b32.xlu2 %v459_v58, %s783_s6 }
 0xdb2   :  { %v462_v59 = vpop.permute.xlu2 %461 }
 0xdb3   :  { %665 = vmatmul.msk.bf16.vlgmr.msra.gmra.mxu0 %vm68_vm2, %v462_v59 }
 0xe30   :  { %v475_v61 = vpop.f32.mrf.mxu0 }
 0xe31   :  { %v479_v62 = vadd.f32 %v475_v61, %v458_v60 }
 0xe33   :  { %739 = vtanh.f32 %v479_v62  ;;  %v666_v1 = vmul.f32 -1.442695, %v479_v62 }
 0xe35   :  { %741 = vpow2.f32 %v666_v1 }
 0xe38   :  { %v477_v63 = vpop.f32.mrf.mxu0 }
 0xe39   :  { %v740_v0 = vpop.eup %739 }
 0xe3a   :  { %502 = vrot.lane.b32.xlu0 %v740_v0, %s782_s5 }
 0xe3b   :  { %v742_v2 = vpop.eup %741 }
 0xe3c   :  { %v483_v3 = vadd.f32 1.0, %v742_v2 }
 0xe3e   :  { %743 = vrcp.f32 %v483_v3  ;;  %v495_v9 = vand.u32 2147483648, %v483_v3  ;;  %vm489_vm13 = vweird.f32 %v483_v3  ;;  %v493_v10 = vand.u32 2147483647, %v483_v3 }
 0xe40   :  { %v496_v12 = vor.u32 1.1754944e-38, %v495_v9  ;;  %vm494_vm15 = vcmp.eq.f32.partialorder %v493_v10, 8.507059e+37 }
 0xe44   :  { %v744_v4 = vpop.eup %743 }
 0xe45   :  { %v485_v5 = vmul.f32 %v744_v4, %v483_v3  ;;  %vm490_vm12 = vweird.f32 %v744_v4 }
 0xe46   :  { %vm491_vm14 = vmor %vm489_vm13, %vm490_vm12 }
 0xe47   :  { %v486_v6 = vsub.f32 1.0, %v485_v5 }
 0xe49   :  { %v487_v7 = vmul.f32 %v744_v4, %v486_v6 }
 0xe4b   :  { %v488_v8 = vadd.f32 %v744_v4, %v487_v7 }
 0xe4d   :  { %v492_v11 = vsel %vm491_vm14, %v744_v4, %v488_v8 }
 0xe4e   :  { %v497_v14 = vsel %vm494_vm15, %v496_v12, %v492_v11 }
 0xe4f   :  { %v500_v16 = vmul.f32 %v497_v14, %v451_v54  ;;  %v690_v54 = vld [vmem:[%s893_s3 + $0x1] ss:$0 sm:$0xff] }
 0xeac   :  { %v503_v13 = vpop.permute.xlu0 %502 }
 0xead   :  { %v505_v15 = vmul.f32 %v503_v13, %v497_v14 }
 0xeaf   :  { %507 = vrot.lane.b32.xlu1 %v505_v15, %s783_s6 }
 0xf21   :  { %v508_v17 = vpop.permute.xlu1 %507 }
 0xf22   :  { %v510_v18 = vadd.f32 %v508_v17, %v500_v16 }
 0xf24   :  { %745 = vtanh.f32 %v510_v18 }
 0xf2a   :  { %v746_v19 = vpop.eup %745 }
 0xf2b   :  { %513 = vrot.lane.b32.xlu2 %v746_v19, %s782_s5 }
 0xf85   :  { %v514_v20 = vpop.permute.xlu2 %513 }
 0xf86   :  { %v516_v21 = vmul.f32 %v514_v20, %v497_v14 }
 0xf88   :  { %v518_v22 = vpack.c.bf16 %v516_v21, %v516_v21 }
 0xf8a   :  { %520 = vrot.lane.b32.xlu0 %v518_v22, %s783_s6 }
 0xffc   :  { %v521_v23 = vpop.permute.xlu0 %520 }
 0xffd   :  { %667 = vmatmul.msk.bf16.vlgmr.msra.gmra.mxu1 %vm68_vm2, %v521_v23 }
0x107a   :  { %v534_v25 = vpop.f32.mrf.mxu1 }
0x107b   :  { %v538_v26 = vadd.f32 %v534_v25, %v517_v24 }
0x107d   :  { %747 = vtanh.f32 %v538_v26  ;;  %v668_v29 = vmul.f32 -1.442695, %v538_v26 }
0x107f   :  { %749 = vpow2.f32 %v668_v29 }
0x1082   :  { %v536_v27 = vpop.f32.mrf.mxu1 }
0x1083   :  { %v748_v28 = vpop.eup %747 }
0x1084   :  { %561 = vrot.lane.b32.xlu1 %v748_v28, %s782_s5 }
0x1085   :  { %v750_v30 = vpop.eup %749 }
0x1086   :  { %v542_v31 = vadd.f32 1.0, %v750_v30 }
0x1088   :  { %751 = vrcp.f32 %v542_v31  ;;  %v554_v37 = vand.u32 2147483648, %v542_v31  ;;  %vm548_vm1 = vweird.f32 %v542_v31  ;;  %v552_v38 = vand.u32 2147483647, %v542_v31 }
0x108a   :  { %v555_v40 = vor.u32 1.1754944e-38, %v554_v37  ;;  %vm553_vm4 = vcmp.eq.f32.partialorder %v552_v38, 8.507059e+37 }
0x108e   :  { %v752_v32 = vpop.eup %751 }
0x108f   :  { %v544_v33 = vmul.f32 %v752_v32, %v542_v31  ;;  %vm549_vm0 = vweird.f32 %v752_v32 }
0x1090   :  { %vm550_vm3 = vmor %vm548_vm1, %vm549_vm0 }
0x1091   :  { %v545_v34 = vsub.f32 1.0, %v544_v33 }
0x1093   :  { %v546_v35 = vmul.f32 %v752_v32, %v545_v34 }
0x1095   :  { %v547_v36 = vadd.f32 %v752_v32, %v546_v35 }
0x1097   :  { %v551_v39 = vsel %vm550_vm3, %v752_v32, %v547_v36 }
0x1098   :  { %v556_v42 = vsel %vm553_vm4, %v555_v40, %v551_v39 }
0x1099   :  { %v559_v44 = vmul.f32 %v556_v42, %v510_v18 }
0x10f6   :  { %v562_v41 = vpop.permute.xlu1 %561 }
0x10f7   :  { %v564_v43 = vmul.f32 %v562_v41, %v556_v42 }
0x10f9   :  { %566 = vrot.lane.b32.xlu2 %v564_v43, %s783_s6 }
0x1153   :  { %v567_v45 = vpop.permute.xlu2 %566 }
0x1154   :  { %v569_v46 = vadd.f32 %v567_v45, %v559_v44 }
0x1156   :  { %753 = vtanh.f32 %v569_v46 }
0x115c   :  { %v754_v47 = vpop.eup %753 }
0x115d   :  { %572 = vrot.lane.b32.xlu0 %v754_v47, %s782_s5 }
0x11cf   :  { %v573_v50 = vpop.permute.xlu0 %572 }
0x11d0   :  { %v575_v51 = vmul.f32 %v573_v50, %v556_v42 }
0x11d2   :  { %v576_v52 = vpack.c.bf16 %v575_v51, %v575_v51 }
0x11d4   :  { %584 = vrot.lane.b32.xlu1 %v576_v52, %s783_s6 }
0x1246   :  { %v585_v53 = vpop.permute.xlu1 %584 }
0x1247   :  { %677 = vmatmul.msk.bf16.vlgmr.msra.gmra.mxu2 %vm68_vm2, %v585_v53 }
0x12ca   :  { %v610_v55 = vpop.f32.mrf.mxu2 }
0x12cb   :  { %v611_v56 = vadd.f32 %v690_v54, %v610_v55 }
0x12cd   :  { %615 = vst.msk [vmem:[#allocation3] sm:$0x3] %vm614_vm5, %v611_v56 }
0x12ce   :  { %626 = dma.vmem_to_hbm [thread:$0]  %s622_s14, 32, %s624_s17, [#allocation4]  }
0x12d2   :  { %v612_v57 = vpop.f32.mrf.mxu2 }
0x12d3   :  { %779 = dma.done.wait [#allocation4], 32  }
0x12d4   :  { %780 = vsyncadd [#allocation4], 4294967264 }
0x12d5   :  { %631 = vsyncpa [#allocation4], 1 }

</bundles_post_ra>
